<compile_context>
chip_gen: v5e
topology: v5e:2x2
jax: 0.10.0
libtpu: 0.0.40
codegen_flags: <defaults>
</compile_context>

<pallas_src>
import functools

import jax
import jax.numpy as jnp
from jax.experimental import pallas as pl
from jax.experimental.pallas import tpu as pltpu


def encoder_stack_kernel(x0_ref, bias_ref,
                         wqkv_ref, bqkv_ref, wo_ref, bo_ref,
                         ln1w_ref, ln1b_ref,
                         w1_ref, b1_ref, w2_ref, b2_ref,
                         ln2w_ref, ln2b_ref,
                         wdec_ref, bdec_ref,
                         logits_ref,
                         x_scr,
                         *, nhead, eps=1e-5):
    """grid = (batch_blocks, n_layers).  One post-norm TransformerEncoderLayer per layer
    step; the decoder matmul is fused into the last layer step."""
    layer = pl.program_id(1)

    # Load the embedded + pos-encoded input (bf16 on the wire) into the resident
    # f32 activation scratch.
    @pl.when(layer == 0)
    def _():
        x_scr[...] = x0_ref[...].astype(jnp.float32)

    x = x_scr[...]                        # (Bb, S, D) f32 running activation
    bias = bias_ref[...]                  # (Bb, 1, S) additive key-padding bias
    D = x.shape[-1]
    dh = D // nhead
    scale = 1.0 / (float(dh) ** 0.5)

    def layer_norm(h, w_ref, b_ref):
        # single-pass statistics: var = E[x^2] - mu^2 (two independent reductions)
        mu = jnp.mean(h, axis=-1, keepdims=True)
        ex2 = jnp.mean(h * h, axis=-1, keepdims=True)
        var = ex2 - mu * mu
        return (h - mu) * jax.lax.rsqrt(var + eps) * w_ref[...] + b_ref[...]

    # ---- fused QKV projection: one wide bf16 matmul, f32 accumulation ----
    xb = x.astype(jnp.bfloat16)
    qkv = jnp.einsum('bsd,de->bse', xb, wqkv_ref[...],
                     preferred_element_type=jnp.float32) + bqkv_ref[...]
    # cast once (half-width data for the per-head lane slices below)
    qb = qkv[..., 0:D].astype(jnp.bfloat16)
    kb = qkv[..., D:2 * D].astype(jnp.bfloat16)
    vb = qkv[..., 2 * D:3 * D].astype(jnp.bfloat16)

    # ---- multi-head attention (scores/softmax/PV are inherently dh-wide) ----
    heads = []
    for h in range(nhead):
        sl = slice(h * dh, (h + 1) * dh)
        s = jnp.einsum('bqd,bkd->bqk', qb[..., sl], kb[..., sl],
                       preferred_element_type=jnp.float32) * scale + bias
        m = jnp.max(s, axis=-1, keepdims=True)
        e = jnp.exp(s - m)
        inv = pl.reciprocal(jnp.sum(e, axis=-1, keepdims=True), approx=True)
        p = (e * inv).astype(jnp.bfloat16)
        heads.append(jnp.einsum('bqk,bkd->bqd', p, vb[..., sl],
                                preferred_element_type=jnp.float32))
    attn = jnp.concatenate(heads, axis=-1)                 # (Bb, S, D) f32
    # single wide output projection on the concatenated heads
    attn = jnp.einsum('bsd,de->bse', attn.astype(jnp.bfloat16), wo_ref[...],
                      preferred_element_type=jnp.float32) + bo_ref[...]

    # ---- residual + LayerNorm 1 (norm_first=False, PyTorch default) ----
    h1 = layer_norm(x + attn, ln1w_ref, ln1b_ref)

    # ---- feed-forward (ReLU, PyTorch default), bf16 matmuls ----
    ff = jnp.einsum('bsd,df->bsf', h1.astype(jnp.bfloat16), w1_ref[...],
                    preferred_element_type=jnp.float32) + b1_ref[...]
    ff = jnp.maximum(ff, 0.0)
    ff = jnp.einsum('bsf,fd->bsd', ff.astype(jnp.bfloat16), w2_ref[...],
                    preferred_element_type=jnp.float32) + b2_ref[...]

    # ---- residual + LayerNorm 2 ----
    y = layer_norm(h1 + ff, ln2w_ref, ln2b_ref)
    x_scr[...] = y

    # ---- fused decoder on the CLS token, lane-dense (padded) logits ----
    @pl.when(layer == pl.num_programs(1) - 1)
    def _():
        cls = y[:, 0:1, :].astype(jnp.bfloat16)            # (Bb, 1, D)
        logits_ref[...] = (jnp.einsum('bsd,de->bse', cls, wdec_ref[...],
                                      preferred_element_type=jnp.float32)
                           + bdec_ref[...])


def _vmem_bytes_estimate(bb, S, D, F, Np):
    """Rough per-grid-step VMEM footprint (double-buffered blocks + live f32 temps)."""
    bf, f4 = 2, 4
    x0 = 2 * bb * S * D * bf                         # bf16 input block, x2 buffers
    bias = 2 * bb * S * f4
    wts = 2 * ((D * 3 * D + D * D + D * F + F * D) * bf
               + (3 * D + 6 * D + F) * f4)           # per-layer weights + biases/LN
    dec = 2 * (D * Np * bf + Np * f4)                # decoder weight/bias (constant)
    out = 2 * bb * Np * f4                           # logits block
    scr = bb * S * D * f4                            # resident activation scratch
    live = bb * S * (3 * D + 2 * D + F + S) * f4     # qkv, h1/attn, ff, scores
    return x0 + bias + wts + dec + out + scr + live


def _choose_block_b(B, S, D, F, Np, vmem_budget=36 << 20, mxu_rows=256):
    """Pick the batch tile: fill >=256 MXU rows, stay inside a v7x-safe VMEM budget,
    avoid >2x batch padding, and keep >=2 blocks for megacore when fill allows."""
    bb = 1
    while bb * S < mxu_rows:
        bb *= 2
    cap = pl.next_power_of_2(max(B, 1))
    while bb > cap:
        bb //= 2
    bb = max(bb, 1)
    while bb > 1 and _vmem_bytes_estimate(bb, S, D, F, Np) > vmem_budget:
        bb //= 2
    # keep >= 2 batch blocks (both v7x TensorCores busy) while per-block rows stay
    # >= half an MXU pass; no-op on v5e/v6e (single TC).
    while (-(-B // bb)) < 2 and bb > 1 and (bb // 2) * S >= mxu_rows // 2:
        bb //= 2
    return bb


def transformer_pick_scorer_forward(pool, params, *, n_cards, nhead, block_b=None):
    """pool: (B, S0) int32 card ids in [0, n_cards] (0 = pad)."""
    B, _ = pool.shape
    L, D, _ = params['wqkv'].shape
    F = params['w1'].shape[-1]

    # _input_process: prepend CLS token (id = n_cards + 1), build pad mask.
    cls_tok = jnp.full((B, 1), n_cards + 1, dtype=pool.dtype)
    src = jnp.concatenate([cls_tok, pool], axis=1)                 # (B, S)
    S = src.shape[1]
    assert S <= params['pos'].shape[1], "sequence longer than positional table (45)"
    pad_mask = (src == 0)

    # Embedding gather + learnable positional encoding (plain-JAX glue).
    # Ship the embedded input in bf16 (halves input DMA); residual stream stays f32
    # inside the kernel.
    x = (params['embedding'][src] + params['pos'][:, :S]).astype(jnp.bfloat16)
    bias = jnp.where(pad_mask, -1e30, 0.0).astype(jnp.float32)[:, None, :]  # (B,1,S)

    # Pad decoder output to a multiple of 128 lanes (lane-dense, unmasked stores).
    Np = ((n_cards + 127) // 128) * 128
    wdec = jnp.zeros((D, Np), jnp.bfloat16).at[:, :n_cards].set(
        params['dec_w'].astype(jnp.bfloat16))
    bdec = jnp.zeros((1, Np), jnp.float32).at[:, :n_cards].set(params['dec_b'])

    # ---- batch tiling: block_b is the primary tuning knob ----
    if block_b is None:
        block_b = _choose_block_b(B, S, D, F, Np)
    nb = -(-B // block_b)
    Bp = nb * block_b
    if Bp != B:                                # pad batch (pad rows sliced off below)
        x = jnp.pad(x, ((0, Bp - B), (0, 0), (0, 0)))
        bias = jnp.pad(bias, ((0, Bp - B), (0, 0), (0, 0)))

    # Raise the scoped-VMEM limit (defaults: 16 MiB v5e / 32 MiB v6e,v7x) with headroom,
    # clamped to 48 MiB so it is safe under v7x's 64 MiB/TC physical VMEM.
    est = _vmem_bytes_estimate(block_b, S, D, F, Np)
    vmem_limit = int(min(max(2 * est, 32 << 20), 48 << 20))

    batch3 = lambda b, l: (b, 0, 0)
    layer3 = lambda b, l: (l, 0, 0)
    const2 = lambda b, l: (0, 0)

    grid_spec = pltpu.PrefetchScalarGridSpec(
        num_scalar_prefetch=0,
        grid=(nb, L),
        in_specs=[
            pl.BlockSpec((block_b, S, D), batch3),        # x0 (embedded input, bf16)
            pl.BlockSpec((block_b, 1, S), batch3),        # key-padding bias
            pl.BlockSpec((None, D, 3 * D), layer3),       # wqkv (bf16)
            pl.BlockSpec((None, 1, 3 * D), layer3),       # bqkv
            pl.BlockSpec((None, D, D), layer3),           # wo   (bf16)
            pl.BlockSpec((None, 1, D), layer3),           # bo
            pl.BlockSpec((None, 1, D), layer3),           # ln1w
            pl.BlockSpec((None, 1, D), layer3),           # ln1b
            pl.BlockSpec((None, D, F), layer3),           # w1   (bf16)
            pl.BlockSpec((None, 1, F), layer3),           # b1
            pl.BlockSpec((None, F, D), layer3),           # w2   (bf16)
            pl.BlockSpec((None, 1, D), layer3),           # b2
            pl.BlockSpec((None, 1, D), layer3),           # ln2w
            pl.BlockSpec((None, 1, D), layer3),           # ln2b
            pl.BlockSpec((D, Np), const2),                # decoder weight (bf16, DMA'd once)
            pl.BlockSpec((1, Np), const2),                # decoder bias
        ],
        out_specs=pl.BlockSpec((block_b, 1, Np), batch3),
        scratch_shapes=[pltpu.VMEM((block_b, S, D), jnp.float32)],
    )

    logits = pl.pallas_call(
        functools.partial(encoder_stack_kernel, nhead=nhead),
        out_shape=jax.ShapeDtypeStruct((Bp, 1, Np), jnp.float32),
        grid_spec=grid_spec,
        compiler_params=pltpu.CompilerParams(
            dimension_semantics=("parallel", "arbitrary"),
            vmem_limit_bytes=vmem_limit),
    )(x, bias,
      params['wqkv'], params['bqkv'], params['wo'], params['bo'],
      params['ln1w'], params['ln1b'], params['w1'], params['b1'],
      params['w2'], params['b2'], params['ln2w'], params['ln2b'],
      wdec, bdec)

    return logits.reshape(Bp, Np)[:B, :n_cards]


def init_params(key, n_cards, d_model, nhead, dim_ff, n_layers):
    keys = jax.random.split(key, 3 + n_layers)

    emb = jax.random.normal(keys[0], (n_cards + 2, d_model), jnp.float32)
    emb = emb.at[0].set(0.0)                                   # padding_idx=0
    pos = jax.random.uniform(keys[1], (1, 45, d_model), jnp.float32, -0.1, 0.1)

    def linear(k, fan_in, fan_out):
        bound = 1.0 / (fan_in ** 0.5)
        kw, kb = jax.random.split(k)
        w = jax.random.uniform(kw, (fan_in, fan_out), jnp.float32, -bound, bound)
        b = jax.random.uniform(kb, (1, fan_out), jnp.float32, -bound, bound)
        return w, b

    per = {n: [] for n in ('wqkv', 'bqkv', 'wo', 'bo', 'w1', 'b1', 'w2', 'b2')}
    for i in range(n_layers):
        lk = jax.random.split(keys[2 + i], 6)
        wq, bq = linear(lk[0], d_model, d_model)
        wk, bk = linear(lk[1], d_model, d_model)
        wv, bv = linear(lk[2], d_model, d_model)
        wo, bo = linear(lk[3], d_model, d_model)
        w1, b1 = linear(lk[4], d_model, dim_ff)
        w2, b2 = linear(lk[5], dim_ff, d_model)
        per['wqkv'].append(jnp.concatenate([wq, wk, wv], axis=1))
        per['bqkv'].append(jnp.concatenate([bq, bk, bv], axis=1))
        per['wo'].append(wo); per['bo'].append(bo)
        per['w1'].append(w1); per['b1'].append(b1)
        per['w2'].append(w2); per['b2'].append(b2)

    def stack(name, bf16=False):
        a = jnp.stack(per[name], axis=0)
        return a.astype(jnp.bfloat16) if bf16 else a

    dec_w, dec_b = linear(keys[2 + n_layers], d_model, n_cards)
    ones = jnp.ones((n_layers, 1, d_model), jnp.float32)
    zeros = jnp.zeros((n_layers, 1, d_model), jnp.float32)

    return dict(
        embedding=emb, pos=pos,
        wqkv=stack('wqkv', True), bqkv=stack('bqkv'),
        wo=stack('wo', True), bo=stack('bo'),
        ln1w=ones, ln1b=zeros,
        w1=stack('w1', True), b1=stack('b1'),
        w2=stack('w2', True), b2=stack('b2'),
        ln2w=ones, ln2b=zeros,
        dec_w=dec_w, dec_b=dec_b)


if __name__ == "__main__":
    # Small, forward-consistent shapes.
    n_cards, d_model, nhead, dim_ff, n_layers = 32, 32, 4, 64, 2
    B, S0 = 2, 8

    key = jax.random.PRNGKey(0)
    pkey, dkey = jax.random.split(key)
    params = init_params(pkey, n_cards, d_model, nhead, dim_ff, n_layers)

    pool = jax.random.randint(dkey, (B, S0), 0, n_cards + 1, dtype=jnp.int32)
    # make sure some padding (id 0) is present to exercise the key-padding mask
    pool = pool.at[:, -2:].set(0)

    out = transformer_pick_scorer_forward(pool, params, n_cards=n_cards, nhead=nhead)
    out = jax.block_until_ready(out)
    assert out.shape == (B, n_cards) and out.dtype == jnp.float32
    # TODO(synk): dropout is an eval-mode identity; training-mode dropout RNG not implemented.
    print("KERNEL_OK")
</pallas_src>

<mosaic_0001>
module attributes {stable_mosaic.version = 11 : i64} {
  func.func @encoder_stack_kernel(%arg0: i32, %arg1: i32, %arg2: memref<2x9x32xbf16, #tpu.memory_space<vmem>>, %arg3: memref<2x1x9xf32, #tpu.memory_space<vmem>>, %arg4: memref<1x32x96xbf16, #tpu.memory_space<vmem>>, %arg5: memref<1x1x96xf32, #tpu.memory_space<vmem>>, %arg6: memref<1x32x32xbf16, #tpu.memory_space<vmem>>, %arg7: memref<1x1x32xf32, #tpu.memory_space<vmem>>, %arg8: memref<1x1x32xf32, #tpu.memory_space<vmem>>, %arg9: memref<1x1x32xf32, #tpu.memory_space<vmem>>, %arg10: memref<1x32x64xbf16, #tpu.memory_space<vmem>>, %arg11: memref<1x1x64xf32, #tpu.memory_space<vmem>>, %arg12: memref<1x64x32xbf16, #tpu.memory_space<vmem>>, %arg13: memref<1x1x32xf32, #tpu.memory_space<vmem>>, %arg14: memref<1x1x32xf32, #tpu.memory_space<vmem>>, %arg15: memref<1x1x32xf32, #tpu.memory_space<vmem>>, %arg16: memref<32x128xbf16, #tpu.memory_space<vmem>>, %arg17: memref<1x128xf32, #tpu.memory_space<vmem>>, %arg18: memref<2x1x128xf32, #tpu.memory_space<vmem>>, %arg19: memref<2x9x32xf32, #tpu.memory_space<vmem>>) attributes {dimension_semantics = [#tpu.dimension_semantics<parallel>, #tpu.dimension_semantics<arbitrary>], iteration_bounds = array<i64: 1, 2>, scalar_prefetch = 0 : i64, scratch_operands = 1 : i64, tpu.core_type = #tpu.core_type<tc>, window_params = [{transform_indices = @transform_0, window_bounds = array<i64: 2, 9, 32>}, {transform_indices = @transform_1, window_bounds = array<i64: 2, 1, 9>}, {transform_indices = @transform_2, window_bounds = array<i64: 1, 32, 96>}, {transform_indices = @transform_3, window_bounds = array<i64: 1, 1, 96>}, {transform_indices = @transform_4, window_bounds = array<i64: 1, 32, 32>}, {transform_indices = @transform_5, window_bounds = array<i64: 1, 1, 32>}, {transform_indices = @transform_6, window_bounds = array<i64: 1, 1, 32>}, {transform_indices = @transform_7, window_bounds = array<i64: 1, 1, 32>}, {transform_indices = @transform_8, window_bounds = array<i64: 1, 32, 64>}, {transform_indices = @transform_9, window_bounds = array<i64: 1, 1, 64>}, {transform_indices = @transform_10, window_bounds = array<i64: 1, 64, 32>}, {transform_indices = @transform_11, window_bounds = array<i64: 1, 1, 32>}, {transform_indices = @transform_12, window_bounds = array<i64: 1, 1, 32>}, {transform_indices = @transform_13, window_bounds = array<i64: 1, 1, 32>}, {pipeline_mode = #tpu.pipeline_mode<synchronous>, transform_indices = @transform_14, window_bounds = array<i64: 32, 128>}, {pipeline_mode = #tpu.pipeline_mode<synchronous>, transform_indices = @transform_15, window_bounds = array<i64: 1, 128>}, {transform_indices = @transform_16, window_bounds = array<i64: 2, 1, 128>}]} {
    %c0_i32 = arith.constant 0 : i32
    %0 = arith.cmpi eq, %arg1, %c0_i32 : i32
    %1 = arith.extui %0 : i1 to i32
    %c0_i32_0 = arith.constant 0 : i32
    %2 = arith.cmpi ne, %1, %c0_i32_0 : i32
    scf.if %2 {
      %c0_80 = arith.constant 0 : index
      %c0_81 = arith.constant 0 : index
      %c0_82 = arith.constant 0 : index
      %192 = vector.load %arg2[%c0_80, %c0_81, %c0_82] : memref<2x9x32xbf16, #tpu.memory_space<vmem>>, vector<2x9x32xbf16>
      %193 = arith.extf %192 : vector<2x9x32xbf16> to vector<2x9x32xf32>
      %c0_83 = arith.constant 0 : index
      %c0_84 = arith.constant 0 : index
      %c0_85 = arith.constant 0 : index
      %194 = vector.load %arg19[%c0_83, %c0_84, %c0_85] : memref<2x9x32xf32, #tpu.memory_space<vmem>>, vector<2x9x32xf32>
      tpu.vector_store %arg19[%c0_83, %c0_84, %c0_85], %193 {strides = array<i32>} : memref<2x9x32xf32, #tpu.memory_space<vmem>>, vector<2x9x32xf32>,
    } else {
    }
    %c0 = arith.constant 0 : index
    %c0_1 = arith.constant 0 : index
    %c0_2 = arith.constant 0 : index
    %3 = vector.load %arg19[%c0, %c0_1, %c0_2] : memref<2x9x32xf32, #tpu.memory_space<vmem>>, vector<2x9x32xf32>
    %c0_3 = arith.constant 0 : index
    %c0_4 = arith.constant 0 : index
    %c0_5 = arith.constant 0 : index
    %4 = vector.load %arg3[%c0_3, %c0_4, %c0_5] : memref<2x1x9xf32, #tpu.memory_space<vmem>>, vector<2x1x9xf32>
    %5 = arith.truncf %3 : vector<2x9x32xf32> to vector<2x9x32xbf16>
    %c0_6 = arith.constant 0 : index
    %c0_7 = arith.constant 0 : index
    %c0_8 = arith.constant 0 : index
    %6 = vector.load %arg4[%c0_6, %c0_7, %c0_8] : memref<1x32x96xbf16, #tpu.memory_space<vmem>>, vector<1x32x96xbf16>
    %7 = vector.shape_cast %6 : vector<1x32x96xbf16> to vector<32x96xbf16>
    "tpu.trace_start"() <{level = 10 : i32, message = "bsd,de->bse"}> : () -> ()
    %cst = arith.constant dense<0.000000e+00> : vector<2x9x96xf32>
    %8 = tpu.matmul %5, %7, %cst {dimension_numbers = #tpu.dot_dimension_numbers<[2], [0], [0, 1], [1], [0, 0, 0, 1, 1, 1], [], []>} : vector<2x9x32xbf16>, vector<32x96xbf16>, vector<2x9x96xf32> -> vector<2x9x96xf32>
    "tpu.trace_stop"() : () -> ()
    %c0_9 = arith.constant 0 : index
    %c0_10 = arith.constant 0 : index
    %c0_11 = arith.constant 0 : index
    %9 = vector.load %arg5[%c0_9, %c0_10, %c0_11] : memref<1x1x96xf32, #tpu.memory_space<vmem>>, vector<1x1x96xf32>
    %10 = vector.shape_cast %9 : vector<1x1x96xf32> to vector<1x96xf32>
    %11 = vector.shape_cast %10 : vector<1x96xf32> to vector<1x1x96xf32>
    %12 = vector.broadcast %11 : vector<1x1x96xf32> to vector<2x9x96xf32>
    %13 = arith.addf %8, %12 : vector<2x9x96xf32>
    %14 = vector.extract_strided_slice %13 {offsets = [0, 0, 0], sizes = [2, 9, 32], strides = [1, 1, 1]} : vector<2x9x96xf32> to vector<2x9x32xf32>
    %15 = arith.truncf %14 : vector<2x9x32xf32> to vector<2x9x32xbf16>
    %16 = vector.extract_strided_slice %13 {offsets = [0, 0, 32], sizes = [2, 9, 32], strides = [1, 1, 1]} : vector<2x9x96xf32> to vector<2x9x32xf32>
    %17 = arith.truncf %16 : vector<2x9x32xf32> to vector<2x9x32xbf16>
    %18 = vector.extract_strided_slice %13 {offsets = [0, 0, 64], sizes = [2, 9, 32], strides = [1, 1, 1]} : vector<2x9x96xf32> to vector<2x9x32xf32>
    %19 = arith.truncf %18 : vector<2x9x32xf32> to vector<2x9x32xbf16>
    %20 = vector.extract_strided_slice %15 {offsets = [0, 0, 0], sizes = [2, 9, 8], strides = [1, 1, 1]} : vector<2x9x32xbf16> to vector<2x9x8xbf16>
    %21 = vector.extract_strided_slice %17 {offsets = [0, 0, 0], sizes = [2, 9, 8], strides = [1, 1, 1]} : vector<2x9x32xbf16> to vector<2x9x8xbf16>
    "tpu.trace_start"() <{level = 10 : i32, message = "bqd,bkd->bqk"}> : () -> ()
    %cst_12 = arith.constant dense<0.000000e+00> : vector<2x9x9xf32>
    %22 = tpu.matmul %20, %21, %cst_12 {dimension_numbers = #tpu.dot_dimension_numbers<[2], [2], [1], [1], [0, 0, 0, 1, 1, 1], [0], [0]>} : vector<2x9x8xbf16>, vector<2x9x8xbf16>, vector<2x9x9xf32> -> vector<2x9x9xf32>
    "tpu.trace_stop"() : () -> ()
    %cst_13 = arith.constant 0.353553385 : f32
    %23 = vector.broadcast %cst_13 : f32 to vector<2x9x9xf32>
    %24 = arith.mulf %22, %23 : vector<2x9x9xf32>
    %25 = vector.broadcast %4 : vector<2x1x9xf32> to vector<2x9x9xf32>
    %26 = arith.addf %24, %25 : vector<2x9x9xf32>
    %cst_14 = arith.constant dense<0xFF800000> : vector<2x9xf32>
    %27 = vector.multi_reduction <maximumf>, %26, %cst_14 [2] : vector<2x9x9xf32> to vector<2x9xf32>
    %28 = vector.shape_cast %27 : vector<2x9xf32> to vector<2x9x1xf32>
    %29 = vector.broadcast %28 : vector<2x9x1xf32> to vector<2x9x9xf32>
    %30 = arith.subf %26, %29 : vector<2x9x9xf32>
    %31 = math.exp %30 : vector<2x9x9xf32>
    %cst_15 = arith.constant dense<0.000000e+00> : vector<2x9xf32>
    %32 = vector.multi_reduction <add>, %31, %cst_15 [2] : vector<2x9x9xf32> to vector<2x9xf32>
    %33 = vector.shape_cast %32 : vector<2x9xf32> to vector<2x9x1xf32>
    %34 = tpu.reciprocal %33 {approx = true} : vector<2x9x1xf32> -> vector<2x9x1xf32>
    %35 = vector.broadcast %34 : vector<2x9x1xf32> to vector<2x9x9xf32>
    %36 = arith.mulf %31, %35 : vector<2x9x9xf32>
    %37 = arith.truncf %36 : vector<2x9x9xf32> to vector<2x9x9xbf16>
    %38 = vector.extract_strided_slice %19 {offsets = [0, 0, 0], sizes = [2, 9, 8], strides = [1, 1, 1]} : vector<2x9x32xbf16> to vector<2x9x8xbf16>
    "tpu.trace_start"() <{level = 10 : i32, message = "bqk,bkd->bqd"}> : () -> ()
    %cst_16 = arith.constant dense<0.000000e+00> : vector<2x9x8xf32>
    %39 = tpu.matmul %37, %38, %cst_16 {dimension_numbers = #tpu.dot_dimension_numbers<[2], [1], [1], [2], [0, 0, 0, 1, 1, 2], [0], [0]>} : vector<2x9x9xbf16>, vector<2x9x8xbf16>, vector<2x9x8xf32> -> vector<2x9x8xf32>
    "tpu.trace_stop"() : () -> ()
    %40 = vector.extract_strided_slice %15 {offsets = [0, 0, 8], sizes = [2, 9, 8], strides = [1, 1, 1]} : vector<2x9x32xbf16> to vector<2x9x8xbf16>
    %41 = vector.extract_strided_slice %17 {offsets = [0, 0, 8], sizes = [2, 9, 8], strides = [1, 1, 1]} : vector<2x9x32xbf16> to vector<2x9x8xbf16>
    "tpu.trace_start"() <{level = 10 : i32, message = "bqd,bkd->bqk"}> : () -> ()
    %cst_17 = arith.constant dense<0.000000e+00> : vector<2x9x9xf32>
    %42 = tpu.matmul %40, %41, %cst_17 {dimension_numbers = #tpu.dot_dimension_numbers<[2], [2], [1], [1], [0, 0, 0, 1, 1, 1], [0], [0]>} : vector<2x9x8xbf16>, vector<2x9x8xbf16>, vector<2x9x9xf32> -> vector<2x9x9xf32>
    "tpu.trace_stop"() : () -> ()
    %cst_18 = arith.constant 0.353553385 : f32
    %43 = vector.broadcast %cst_18 : f32 to vector<2x9x9xf32>
    %44 = arith.mulf %42, %43 : vector<2x9x9xf32>
    %45 = vector.broadcast %4 : vector<2x1x9xf32> to vector<2x9x9xf32>
    %46 = arith.addf %44, %45 : vector<2x9x9xf32>
    %cst_19 = arith.constant dense<0xFF800000> : vector<2x9xf32>
    %47 = vector.multi_reduction <maximumf>, %46, %cst_19 [2] : vector<2x9x9xf32> to vector<2x9xf32>
    %48 = vector.shape_cast %47 : vector<2x9xf32> to vector<2x9x1xf32>
    %49 = vector.broadcast %48 : vector<2x9x1xf32> to vector<2x9x9xf32>
    %50 = arith.subf %46, %49 : vector<2x9x9xf32>
    %51 = math.exp %50 : vector<2x9x9xf32>
    %cst_20 = arith.constant dense<0.000000e+00> : vector<2x9xf32>
    %52 = vector.multi_reduction <add>, %51, %cst_20 [2] : vector<2x9x9xf32> to vector<2x9xf32>
    %53 = vector.shape_cast %52 : vector<2x9xf32> to vector<2x9x1xf32>
    %54 = tpu.reciprocal %53 {approx = true} : vector<2x9x1xf32> -> vector<2x9x1xf32>
    %55 = vector.broadcast %54 : vector<2x9x1xf32> to vector<2x9x9xf32>
    %56 = arith.mulf %51, %55 : vector<2x9x9xf32>
    %57 = arith.truncf %56 : vector<2x9x9xf32> to vector<2x9x9xbf16>
    %58 = vector.extract_strided_slice %19 {offsets = [0, 0, 8], sizes = [2, 9, 8], strides = [1, 1, 1]} : vector<2x9x32xbf16> to vector<2x9x8xbf16>
    "tpu.trace_start"() <{level = 10 : i32, message = "bqk,bkd->bqd"}> : () -> ()
    %cst_21 = arith.constant dense<0.000000e+00> : vector<2x9x8xf32>
    %59 = tpu.matmul %57, %58, %cst_21 {dimension_numbers = #tpu.dot_dimension_numbers<[2], [1], [1], [2], [0, 0, 0, 1, 1, 2], [0], [0]>} : vector<2x9x9xbf16>, vector<2x9x8xbf16>, vector<2x9x8xf32> -> vector<2x9x8xf32>
    "tpu.trace_stop"() : () -> ()
    %60 = vector.extract_strided_slice %15 {offsets = [0, 0, 16], sizes = [2, 9, 8], strides = [1, 1, 1]} : vector<2x9x32xbf16> to vector<2x9x8xbf16>
    %61 = vector.extract_strided_slice %17 {offsets = [0, 0, 16], sizes = [2, 9, 8], strides = [1, 1, 1]} : vector<2x9x32xbf16> to vector<2x9x8xbf16>
    "tpu.trace_start"() <{level = 10 : i32, message = "bqd,bkd->bqk"}> : () -> ()
    %cst_22 = arith.constant dense<0.000000e+00> : vector<2x9x9xf32>
    %62 = tpu.matmul %60, %61, %cst_22 {dimension_numbers = #tpu.dot_dimension_numbers<[2], [2], [1], [1], [0, 0, 0, 1, 1, 1], [0], [0]>} : vector<2x9x8xbf16>, vector<2x9x8xbf16>, vector<2x9x9xf32> -> vector<2x9x9xf32>
    "tpu.trace_stop"() : () -> ()
    %cst_23 = arith.constant 0.353553385 : f32
    %63 = vector.broadcast %cst_23 : f32 to vector<2x9x9xf32>
    %64 = arith.mulf %62, %63 : vector<2x9x9xf32>
    %65 = vector.broadcast %4 : vector<2x1x9xf32> to vector<2x9x9xf32>
    %66 = arith.addf %64, %65 : vector<2x9x9xf32>
    %cst_24 = arith.constant dense<0xFF800000> : vector<2x9xf32>
    %67 = vector.multi_reduction <maximumf>, %66, %cst_24 [2] : vector<2x9x9xf32> to vector<2x9xf32>
    %68 = vector.shape_cast %67 : vector<2x9xf32> to vector<2x9x1xf32>
    %69 = vector.broadcast %68 : vector<2x9x1xf32> to vector<2x9x9xf32>
    %70 = arith.subf %66, %69 : vector<2x9x9xf32>
    %71 = math.exp %70 : vector<2x9x9xf32>
    %cst_25 = arith.constant dense<0.000000e+00> : vector<2x9xf32>
    %72 = vector.multi_reduction <add>, %71, %cst_25 [2] : vector<2x9x9xf32> to vector<2x9xf32>
    %73 = vector.shape_cast %72 : vector<2x9xf32> to vector<2x9x1xf32>
    %74 = tpu.reciprocal %73 {approx = true} : vector<2x9x1xf32> -> vector<2x9x1xf32>
    %75 = vector.broadcast %74 : vector<2x9x1xf32> to vector<2x9x9xf32>
    %76 = arith.mulf %71, %75 : vector<2x9x9xf32>
    %77 = arith.truncf %76 : vector<2x9x9xf32> to vector<2x9x9xbf16>
    %78 = vector.extract_strided_slice %19 {offsets = [0, 0, 16], sizes = [2, 9, 8], strides = [1, 1, 1]} : vector<2x9x32xbf16> to vector<2x9x8xbf16>
    "tpu.trace_start"() <{level = 10 : i32, message = "bqk,bkd->bqd"}> : () -> ()
    %cst_26 = arith.constant dense<0.000000e+00> : vector<2x9x8xf32>
    %79 = tpu.matmul %77, %78, %cst_26 {dimension_numbers = #tpu.dot_dimension_numbers<[2], [1], [1], [2], [0, 0, 0, 1, 1, 2], [0], [0]>} : vector<2x9x9xbf16>, vector<2x9x8xbf16>, vector<2x9x8xf32> -> vector<2x9x8xf32>
    "tpu.trace_stop"() : () -> ()
    %80 = vector.extract_strided_slice %15 {offsets = [0, 0, 24], sizes = [2, 9, 8], strides = [1, 1, 1]} : vector<2x9x32xbf16> to vector<2x9x8xbf16>
    %81 = vector.extract_strided_slice %17 {offsets = [0, 0, 24], sizes = [2, 9, 8], strides = [1, 1, 1]} : vector<2x9x32xbf16> to vector<2x9x8xbf16>
    "tpu.trace_start"() <{level = 10 : i32, message = "bqd,bkd->bqk"}> : () -> ()
    %cst_27 = arith.constant dense<0.000000e+00> : vector<2x9x9xf32>
    %82 = tpu.matmul %80, %81, %cst_27 {dimension_numbers = #tpu.dot_dimension_numbers<[2], [2], [1], [1], [0, 0, 0, 1, 1, 1], [0], [0]>} : vector<2x9x8xbf16>, vector<2x9x8xbf16>, vector<2x9x9xf32> -> vector<2x9x9xf32>
    "tpu.trace_stop"() : () -> ()
    %cst_28 = arith.constant 0.353553385 : f32
    %83 = vector.broadcast %cst_28 : f32 to vector<2x9x9xf32>
    %84 = arith.mulf %82, %83 : vector<2x9x9xf32>
    %85 = vector.broadcast %4 : vector<2x1x9xf32> to vector<2x9x9xf32>
    %86 = arith.addf %84, %85 : vector<2x9x9xf32>
    %cst_29 = arith.constant dense<0xFF800000> : vector<2x9xf32>
    %87 = vector.multi_reduction <maximumf>, %86, %cst_29 [2] : vector<2x9x9xf32> to vector<2x9xf32>
    %88 = vector.shape_cast %87 : vector<2x9xf32> to vector<2x9x1xf32>
    %89 = vector.broadcast %88 : vector<2x9x1xf32> to vector<2x9x9xf32>
    %90 = arith.subf %86, %89 : vector<2x9x9xf32>
    %91 = math.exp %90 : vector<2x9x9xf32>
    %cst_30 = arith.constant dense<0.000000e+00> : vector<2x9xf32>
    %92 = vector.multi_reduction <add>, %91, %cst_30 [2] : vector<2x9x9xf32> to vector<2x9xf32>
    %93 = vector.shape_cast %92 : vector<2x9xf32> to vector<2x9x1xf32>
    %94 = tpu.reciprocal %93 {approx = true} : vector<2x9x1xf32> -> vector<2x9x1xf32>
    %95 = vector.broadcast %94 : vector<2x9x1xf32> to vector<2x9x9xf32>
    %96 = arith.mulf %91, %95 : vector<2x9x9xf32>
    %97 = arith.truncf %96 : vector<2x9x9xf32> to vector<2x9x9xbf16>
    %98 = vector.extract_strided_slice %19 {offsets = [0, 0, 24], sizes = [2, 9, 8], strides = [1, 1, 1]} : vector<2x9x32xbf16> to vector<2x9x8xbf16>
    "tpu.trace_start"() <{level = 10 : i32, message = "bqk,bkd->bqd"}> : () -> ()
    %cst_31 = arith.constant dense<0.000000e+00> : vector<2x9x8xf32>
    %99 = tpu.matmul %97, %98, %cst_31 {dimension_numbers = #tpu.dot_dimension_numbers<[2], [1], [1], [2], [0, 0, 0, 1, 1, 2], [0], [0]>} : vector<2x9x9xbf16>, vector<2x9x8xbf16>, vector<2x9x8xf32> -> vector<2x9x8xf32>
    "tpu.trace_stop"() : () -> ()
    %100 = tpu.concatenate %39, %59, %79, %99 in 2 : vector<2x9x8xf32>, vector<2x9x8xf32>, vector<2x9x8xf32>, vector<2x9x8xf32> -> vector<2x9x32xf32>
    %101 = arith.truncf %100 : vector<2x9x32xf32> to vector<2x9x32xbf16>
    %c0_32 = arith.constant 0 : index
    %c0_33 = arith.constant 0 : index
    %c0_34 = arith.constant 0 : index
    %102 = vector.load %arg6[%c0_32, %c0_33, %c0_34] : memref<1x32x32xbf16, #tpu.memory_space<vmem>>, vector<1x32x32xbf16>
    %103 = vector.shape_cast %102 : vector<1x32x32xbf16> to vector<32x32xbf16>
    "tpu.trace_start"() <{level = 10 : i32, message = "bsd,de->bse"}> : () -> ()
    %cst_35 = arith.constant dense<0.000000e+00> : vector<2x9x32xf32>
    %104 = tpu.matmul %101, %103, %cst_35 {dimension_numbers = #tpu.dot_dimension_numbers<[2], [0], [0, 1], [1], [0, 0, 0, 1, 1, 1], [], []>} : vector<2x9x32xbf16>, vector<32x32xbf16>, vector<2x9x32xf32> -> vector<2x9x32xf32>
    "tpu.trace_stop"() : () -> ()
    %c0_36 = arith.constant 0 : index
    %c0_37 = arith.constant 0 : index
    %c0_38 = arith.constant 0 : index
    %105 = vector.load %arg7[%c0_36, %c0_37, %c0_38] : memref<1x1x32xf32, #tpu.memory_space<vmem>>, vector<1x1x32xf32>
    %106 = vector.shape_cast %105 : vector<1x1x32xf32> to vector<1x32xf32>
    %107 = vector.shape_cast %106 : vector<1x32xf32> to vector<1x1x32xf32>
    %108 = vector.broadcast %107 : vector<1x1x32xf32> to vector<2x9x32xf32>
    %109 = arith.addf %104, %108 : vector<2x9x32xf32>
    %110 = arith.addf %3, %109 : vector<2x9x32xf32>
    %cst_39 = arith.constant dense<0.000000e+00> : vector<2x9xf32>
    %111 = vector.multi_reduction <add>, %110, %cst_39 [2] : vector<2x9x32xf32> to vector<2x9xf32>
    %112 = vector.shape_cast %111 : vector<2x9xf32> to vector<2x9x1xf32>
    %cst_40 = arith.constant 3.200000e+01 : f32
    %113 = vector.broadcast %cst_40 : f32 to vector<2x9x1xf32>
    %114 = arith.divf %112, %113 : vector<2x9x1xf32>
    %115 = arith.mulf %110, %110 : vector<2x9x32xf32>
    %cst_41 = arith.constant dense<0.000000e+00> : vector<2x9xf32>
    %116 = vector.multi_reduction <add>, %115, %cst_41 [2] : vector<2x9x32xf32> to vector<2x9xf32>
    %117 = vector.shape_cast %116 : vector<2x9xf32> to vector<2x9x1xf32>
    %cst_42 = arith.constant 3.200000e+01 : f32
    %118 = vector.broadcast %cst_42 : f32 to vector<2x9x1xf32>
    %119 = arith.divf %117, %118 : vector<2x9x1xf32>
    %120 = arith.mulf %114, %114 : vector<2x9x1xf32>
    %121 = arith.subf %119, %120 : vector<2x9x1xf32>
    %122 = vector.broadcast %114 : vector<2x9x1xf32> to vector<2x9x32xf32>
    %123 = arith.subf %110, %122 : vector<2x9x32xf32>
    %cst_43 = arith.constant 9.99999974E-6 : f32
    %124 = vector.broadcast %cst_43 : f32 to vector<2x9x1xf32>
    %125 = arith.addf %121, %124 : vector<2x9x1xf32>
    %126 = math.rsqrt %125 : vector<2x9x1xf32>
    %127 = vector.broadcast %126 : vector<2x9x1xf32> to vector<2x9x32xf32>
    %128 = arith.mulf %123, %127 : vector<2x9x32xf32>
    %c0_44 = arith.constant 0 : index
    %c0_45 = arith.constant 0 : index
    %c0_46 = arith.constant 0 : index
    %129 = vector.load %arg8[%c0_44, %c0_45, %c0_46] : memref<1x1x32xf32, #tpu.memory_space<vmem>>, vector<1x1x32xf32>
    %130 = vector.shape_cast %129 : vector<1x1x32xf32> to vector<1x32xf32>
    %131 = vector.shape_cast %130 : vector<1x32xf32> to vector<1x1x32xf32>
    %132 = vector.broadcast %131 : vector<1x1x32xf32> to vector<2x9x32xf32>
    %133 = arith.mulf %128, %132 : vector<2x9x32xf32>
    %c0_47 = arith.constant 0 : index
    %c0_48 = arith.constant 0 : index
    %c0_49 = arith.constant 0 : index
    %134 = vector.load %arg9[%c0_47, %c0_48, %c0_49] : memref<1x1x32xf32, #tpu.memory_space<vmem>>, vector<1x1x32xf32>
    %135 = vector.shape_cast %134 : vector<1x1x32xf32> to vector<1x32xf32>
    %136 = vector.shape_cast %135 : vector<1x32xf32> to vector<1x1x32xf32>
    %137 = vector.broadcast %136 : vector<1x1x32xf32> to vector<2x9x32xf32>
    %138 = arith.addf %133, %137 : vector<2x9x32xf32>
    %139 = arith.truncf %138 : vector<2x9x32xf32> to vector<2x9x32xbf16>
    %c0_50 = arith.constant 0 : index
    %c0_51 = arith.constant 0 : index
    %c0_52 = arith.constant 0 : index
    %140 = vector.load %arg10[%c0_50, %c0_51, %c0_52] : memref<1x32x64xbf16, #tpu.memory_space<vmem>>, vector<1x32x64xbf16>
    %141 = vector.shape_cast %140 : vector<1x32x64xbf16> to vector<32x64xbf16>
    "tpu.trace_start"() <{level = 10 : i32, message = "bsd,df->bsf"}> : () -> ()
    %cst_53 = arith.constant dense<0.000000e+00> : vector<2x9x64xf32>
    %142 = tpu.matmul %139, %141, %cst_53 {dimension_numbers = #tpu.dot_dimension_numbers<[2], [0], [0, 1], [1], [0, 0, 0, 1, 1, 1], [], []>} : vector<2x9x32xbf16>, vector<32x64xbf16>, vector<2x9x64xf32> -> vector<2x9x64xf32>
    "tpu.trace_stop"() : () -> ()
    %c0_54 = arith.constant 0 : index
    %c0_55 = arith.constant 0 : index
    %c0_56 = arith.constant 0 : index
    %143 = vector.load %arg11[%c0_54, %c0_55, %c0_56] : memref<1x1x64xf32, #tpu.memory_space<vmem>>, vector<1x1x64xf32>
    %144 = vector.shape_cast %143 : vector<1x1x64xf32> to vector<1x64xf32>
    %145 = vector.shape_cast %144 : vector<1x64xf32> to vector<1x1x64xf32>
    %146 = vector.broadcast %145 : vector<1x1x64xf32> to vector<2x9x64xf32>
    %147 = arith.addf %142, %146 : vector<2x9x64xf32>
    %cst_57 = arith.constant 0.000000e+00 : f32
    %148 = vector.broadcast %cst_57 : f32 to vector<2x9x64xf32>
    %149 = arith.maximumf %147, %148 : vector<2x9x64xf32>
    %150 = arith.truncf %149 : vector<2x9x64xf32> to vector<2x9x64xbf16>
    %c0_58 = arith.constant 0 : index
    %c0_59 = arith.constant 0 : index
    %c0_60 = arith.constant 0 : index
    %151 = vector.load %arg12[%c0_58, %c0_59, %c0_60] : memref<1x64x32xbf16, #tpu.memory_space<vmem>>, vector<1x64x32xbf16>
    %152 = vector.shape_cast %151 : vector<1x64x32xbf16> to vector<64x32xbf16>
    "tpu.trace_start"() <{level = 10 : i32, message = "bsf,fd->bsd"}> : () -> ()
    %cst_61 = arith.constant dense<0.000000e+00> : vector<2x9x32xf32>
    %153 = tpu.matmul %150, %152, %cst_61 {dimension_numbers = #tpu.dot_dimension_numbers<[2], [0], [0, 1], [1], [0, 0, 0, 1, 1, 1], [], []>} : vector<2x9x64xbf16>, vector<64x32xbf16>, vector<2x9x32xf32> -> vector<2x9x32xf32>
    "tpu.trace_stop"() : () -> ()
    %c0_62 = arith.constant 0 : index
    %c0_63 = arith.constant 0 : index
    %c0_64 = arith.constant 0 : index
    %154 = vector.load %arg13[%c0_62, %c0_63, %c0_64] : memref<1x1x32xf32, #tpu.memory_space<vmem>>, vector<1x1x32xf32>
    %155 = vector.shape_cast %154 : vector<1x1x32xf32> to vector<1x32xf32>
    %156 = vector.shape_cast %155 : vector<1x32xf32> to vector<1x1x32xf32>
    %157 = vector.broadcast %156 : vector<1x1x32xf32> to vector<2x9x32xf32>
    %158 = arith.addf %153, %157 : vector<2x9x32xf32>
    %159 = arith.addf %138, %158 : vector<2x9x32xf32>
    %cst_65 = arith.constant dense<0.000000e+00> : vector<2x9xf32>
    %160 = vector.multi_reduction <add>, %159, %cst_65 [2] : vector<2x9x32xf32> to vector<2x9xf32>
    %161 = vector.shape_cast %160 : vector<2x9xf32> to vector<2x9x1xf32>
    %cst_66 = arith.constant 3.200000e+01 : f32
    %162 = vector.broadcast %cst_66 : f32 to vector<2x9x1xf32>
    %163 = arith.divf %161, %162 : vector<2x9x1xf32>
    %164 = arith.mulf %159, %159 : vector<2x9x32xf32>
    %cst_67 = arith.constant dense<0.000000e+00> : vector<2x9xf32>
    %165 = vector.multi_reduction <add>, %164, %cst_67 [2] : vector<2x9x32xf32> to vector<2x9xf32>
    %166 = vector.shape_cast %165 : vector<2x9xf32> to vector<2x9x1xf32>
    %cst_68 = arith.constant 3.200000e+01 : f32
    %167 = vector.broadcast %cst_68 : f32 to vector<2x9x1xf32>
    %168 = arith.divf %166, %167 : vector<2x9x1xf32>
    %169 = arith.mulf %163, %163 : vector<2x9x1xf32>
    %170 = arith.subf %168, %169 : vector<2x9x1xf32>
    %171 = vector.broadcast %163 : vector<2x9x1xf32> to vector<2x9x32xf32>
    %172 = arith.subf %159, %171 : vector<2x9x32xf32>
    %cst_69 = arith.constant 9.99999974E-6 : f32
    %173 = vector.broadcast %cst_69 : f32 to vector<2x9x1xf32>
    %174 = arith.addf %170, %173 : vector<2x9x1xf32>
    %175 = math.rsqrt %174 : vector<2x9x1xf32>
    %176 = vector.broadcast %175 : vector<2x9x1xf32> to vector<2x9x32xf32>
    %177 = arith.mulf %172, %176 : vector<2x9x32xf32>
    %c0_70 = arith.constant 0 : index
    %c0_71 = arith.constant 0 : index
    %c0_72 = arith.constant 0 : index
    %178 = vector.load %arg14[%c0_70, %c0_71, %c0_72] : memref<1x1x32xf32, #tpu.memory_space<vmem>>, vector<1x1x32xf32>
    %179 = vector.shape_cast %178 : vector<1x1x32xf32> to vector<1x32xf32>
    %180 = vector.shape_cast %179 : vector<1x32xf32> to vector<1x1x32xf32>
    %181 = vector.broadcast %180 : vector<1x1x32xf32> to vector<2x9x32xf32>
    %182 = arith.mulf %177, %181 : vector<2x9x32xf32>
    %c0_73 = arith.constant 0 : index
    %c0_74 = arith.constant 0 : index
    %c0_75 = arith.constant 0 : index
    %183 = vector.load %arg15[%c0_73, %c0_74, %c0_75] : memref<1x1x32xf32, #tpu.memory_space<vmem>>, vector<1x1x32xf32>
    %184 = vector.shape_cast %183 : vector<1x1x32xf32> to vector<1x32xf32>
    %185 = vector.shape_cast %184 : vector<1x32xf32> to vector<1x1x32xf32>
    %186 = vector.broadcast %185 : vector<1x1x32xf32> to vector<2x9x32xf32>
    %187 = arith.addf %182, %186 : vector<2x9x32xf32>
    %c0_76 = arith.constant 0 : index
    %c0_77 = arith.constant 0 : index
    %c0_78 = arith.constant 0 : index
    %188 = vector.load %arg19[%c0_76, %c0_77, %c0_78] : memref<2x9x32xf32, #tpu.memory_space<vmem>>, vector<2x9x32xf32>
    tpu.vector_store %arg19[%c0_76, %c0_77, %c0_78], %187 {strides = array<i32>} : memref<2x9x32xf32, #tpu.memory_space<vmem>>, vector<2x9x32xf32>,
    %c1_i32 = arith.constant 1 : i32
    %189 = arith.cmpi eq, %arg1, %c1_i32 : i32
    %190 = arith.extui %189 : i1 to i32
    %c0_i32_79 = arith.constant 0 : i32
    %191 = arith.cmpi ne, %190, %c0_i32_79 : i32
    scf.if %191 {
      %192 = vector.extract_strided_slice %187 {offsets = [0, 0, 0], sizes = [2, 1, 32], strides = [1, 1, 1]} : vector<2x9x32xf32> to vector<2x1x32xf32>
      %193 = arith.truncf %192 : vector<2x1x32xf32> to vector<2x1x32xbf16>
      %c0_80 = arith.constant 0 : index
      %c0_81 = arith.constant 0 : index
      %194 = vector.load %arg16[%c0_80, %c0_81] : memref<32x128xbf16, #tpu.memory_space<vmem>>, vector<32x128xbf16>
      "tpu.trace_start"() <{level = 10 : i32, message = "bsd,de->bse"}> : () -> ()
      %cst_82 = arith.constant dense<0.000000e+00> : vector<2x1x128xf32>
      %195 = tpu.matmul %193, %194, %cst_82 {dimension_numbers = #tpu.dot_dimension_numbers<[2], [0], [0, 1], [1], [0, 0, 0, 1, 1, 1], [], []>} : vector<2x1x32xbf16>, vector<32x128xbf16>, vector<2x1x128xf32> -> vector<2x1x128xf32>
      "tpu.trace_stop"() : () -> ()
      %c0_83 = arith.constant 0 : index
      %c0_84 = arith.constant 0 : index
      %196 = vector.load %arg17[%c0_83, %c0_84] : memref<1x128xf32, #tpu.memory_space<vmem>>, vector<1x128xf32>
      %197 = vector.shape_cast %196 : vector<1x128xf32> to vector<1x1x128xf32>
      %198 = vector.broadcast %197 : vector<1x1x128xf32> to vector<2x1x128xf32>
      %199 = arith.addf %195, %198 : vector<2x1x128xf32>
      %c0_85 = arith.constant 0 : index
      %c0_86 = arith.constant 0 : index
      %c0_87 = arith.constant 0 : index
      %200 = vector.load %arg18[%c0_85, %c0_86, %c0_87] : memref<2x1x128xf32, #tpu.memory_space<vmem>>, vector<2x1x128xf32>
      tpu.vector_store %arg18[%c0_85, %c0_86, %c0_87], %199 {strides = array<i32>} : memref<2x1x128xf32, #tpu.memory_space<vmem>>, vector<2x1x128xf32>,
    } else {
    }
    return
  }
  func.func @transform_0(%arg0: i32, %arg1: i32) -> (i32, i32, i32) {
    %c0_i32 = arith.constant 0 : i32
    %c0_i32_0 = arith.constant 0 : i32
    %c0_i32_1 = arith.constant 0 : i32
    return %arg0, %c0_i32, %c0_i32_0 : i32, i32, i32
  }
  func.func @transform_1(%arg0: i32, %arg1: i32) -> (i32, i32, i32) {
    %c0_i32 = arith.constant 0 : i32
    %c0_i32_0 = arith.constant 0 : i32
    %c0_i32_1 = arith.constant 0 : i32
    return %arg0, %c0_i32, %c0_i32_0 : i32, i32, i32
  }
  func.func @transform_2(%arg0: i32, %arg1: i32) -> (i32, i32, i32) {
    %c0_i32 = arith.constant 0 : i32
    %c0_i32_0 = arith.constant 0 : i32
    %c0_i32_1 = arith.constant 0 : i32
    return %arg1, %c0_i32, %c0_i32_0 : i32, i32, i32
  }
  func.func @transform_3(%arg0: i32, %arg1: i32) -> (i32, i32, i32) {
    %c0_i32 = arith.constant 0 : i32
    %c0_i32_0 = arith.constant 0 : i32
    %c0_i32_1 = arith.constant 0 : i32
    return %arg1, %c0_i32, %c0_i32_0 : i32, i32, i32
  }
  func.func @transform_4(%arg0: i32, %arg1: i32) -> (i32, i32, i32) {
    %c0_i32 = arith.constant 0 : i32
    %c0_i32_0 = arith.constant 0 : i32
    %c0_i32_1 = arith.constant 0 : i32
    return %arg1, %c0_i32, %c0_i32_0 : i32, i32, i32
  }
  func.func @transform_5(%arg0: i32, %arg1: i32) -> (i32, i32, i32) {
    %c0_i32 = arith.constant 0 : i32
    %c0_i32_0 = arith.constant 0 : i32
    %c0_i32_1 = arith.constant 0 : i32
    return %arg1, %c0_i32, %c0_i32_0 : i32, i32, i32
  }
  func.func @transform_6(%arg0: i32, %arg1: i32) -> (i32, i32, i32) {
    %c0_i32 = arith.constant 0 : i32
    %c0_i32_0 = arith.constant 0 : i32
    %c0_i32_1 = arith.constant 0 : i32
    return %arg1, %c0_i32, %c0_i32_0 : i32, i32, i32
  }
  func.func @transform_7(%arg0: i32, %arg1: i32) -> (i32, i32, i32) {
    %c0_i32 = arith.constant 0 : i32
    %c0_i32_0 = arith.constant 0 : i32
    %c0_i32_1 = arith.constant 0 : i32
    return %arg1, %c0_i32, %c0_i32_0 : i32, i32, i32
  }
  func.func @transform_8(%arg0: i32, %arg1: i32) -> (i32, i32, i32) {
    %c0_i32 = arith.constant 0 : i32
    %c0_i32_0 = arith.constant 0 : i32
    %c0_i32_1 = arith.constant 0 : i32
    return %arg1, %c0_i32, %c0_i32_0 : i32, i32, i32
  }
  func.func @transform_9(%arg0: i32, %arg1: i32) -> (i32, i32, i32) {
    %c0_i32 = arith.constant 0 : i32
    %c0_i32_0 = arith.constant 0 : i32
    %c0_i32_1 = arith.constant 0 : i32
    return %arg1, %c0_i32, %c0_i32_0 : i32, i32, i32
  }
  func.func @transform_10(%arg0: i32, %arg1: i32) -> (i32, i32, i32) {
    %c0_i32 = arith.constant 0 : i32
    %c0_i32_0 = arith.constant 0 : i32
    %c0_i32_1 = arith.constant 0 : i32
    return %arg1, %c0_i32, %c0_i32_0 : i32, i32, i32
  }
  func.func @transform_11(%arg0: i32, %arg1: i32) -> (i32, i32, i32) {
    %c0_i32 = arith.constant 0 : i32
    %c0_i32_0 = arith.constant 0 : i32
    %c0_i32_1 = arith.constant 0 : i32
    return %arg1, %c0_i32, %c0_i32_0 : i32, i32, i32
  }
  func.func @transform_12(%arg0: i32, %arg1: i32) -> (i32, i32, i32) {
    %c0_i32 = arith.constant 0 : i32
    %c0_i32_0 = arith.constant 0 : i32
    %c0_i32_1 = arith.constant 0 : i32
    return %arg1, %c0_i32, %c0_i32_0 : i32, i32, i32
  }
  func.func @transform_13(%arg0: i32, %arg1: i32) -> (i32, i32, i32) {
    %c0_i32 = arith.constant 0 : i32
    %c0_i32_0 = arith.constant 0 : i32
    %c0_i32_1 = arith.constant 0 : i32
    return %arg1, %c0_i32, %c0_i32_0 : i32, i32, i32
  }
  func.func @transform_14(%arg0: i32, %arg1: i32) -> (i32, i32) {
    %c0_i32 = arith.constant 0 : i32
    %c0_i32_0 = arith.constant 0 : i32
    %c0_i32_1 = arith.constant 0 : i32
    return %c0_i32, %c0_i32_0 : i32, i32
  }
  func.func @transform_15(%arg0: i32, %arg1: i32) -> (i32, i32) {
    %c0_i32 = arith.constant 0 : i32
    %c0_i32_0 = arith.constant 0 : i32
    %c0_i32_1 = arith.constant 0 : i32
    return %c0_i32, %c0_i32_0 : i32, i32
  }
  func.func @transform_16(%arg0: i32, %arg1: i32) -> (i32, i32, i32) {
    %c0_i32 = arith.constant 0 : i32
    %c0_i32_0 = arith.constant 0 : i32
    %c0_i32_1 = arith.constant 0 : i32
    return %arg0, %c0_i32, %c0_i32_0 : i32, i32, i32
  }
}

</mosaic_0001>

<bundles_post_ra>
// kernel: tpu_custom_call.1
= control target key start
LH: loop header
LB: loop body
LE: loop exit
PB: predicated region body
PF: predicated region fallthrough
CT: control target
= control target key end

     0   :  { %s4956_s0 = inlined_call_operand.vmem [shape: bf16[2,9,32], index: 0, kind: input, shape index: {}]   ;;  %s4957_s1 = inlined_call_operand.vmem [shape: f32[2,1,9], index: 1, kind: input, shape index: {}]   ;;  %s4958_s2 = inlined_call_operand.vmem [shape: bf16[2,32,96], index: 2, kind: input, shape index: {}]   ;;  %s4959_s3 = inlined_call_operand.hbm [shape: f32[2,1,96], index: 3, kind: input, shape index: {}]   ;;  %s4960_s4 = inlined_call_operand.vmem [shape: bf16[2,32,32], index: 4, kind: input, shape index: {}]   ;;  %s4961_s5 = inlined_call_operand.hbm [shape: f32[2,1,32], index: 5, kind: input, shape index: {}]   ;;  %s4962_s6 = inlined_call_operand.hbm [shape: f32[2,1,32], index: 6, kind: input, shape index: {}]   ;;  %s4963_s7 = inlined_call_operand.hbm [shape: f32[2,1,32], index: 7, kind: input, shape index: {}]   ;;  %s4964_s8 = inlined_call_operand.vmem [shape: bf16[2,32,64], index: 8, kind: input, shape index: {}]   ;;  %s4965_s9 = inlined_call_operand.hbm [shape: f32[2,1,64], index: 9, kind: input, shape index: {}]   ;;  %s4966_s10 = inlined_call_operand.vmem [shape: bf16[2,64,32], index: 10, kind: input, shape index: {}]   ;;  %s4967_s11 = inlined_call_operand.hbm [shape: f32[2,1,32], index: 11, kind: input, shape index: {}]   ;;  %s4968_s12 = inlined_call_operand.vmem [shape: f32[2,1,32], index: 12, kind: input, shape index: {}]   ;;  %s4969_s13 = inlined_call_operand.hbm [shape: f32[2,1,32], index: 13, kind: input, shape index: {}]   ;;  %s4970_s14 = inlined_call_operand.hbm [shape: bf16[32,128], index: 14, kind: input, shape index: {}]   ;;  %s4971_s15 = inlined_call_operand.vmem [shape: f32[1,128], index: 15, kind: input, shape index: {}]   ;;  %s4972_s16 = inlined_call_operand.hbm [shape: f32[2,1,128], index: 16, kind: output, shape index: {}]  }
   0x1   :  { %4981 = sst [smem:[#allocation28_spill]] %s4956_s0 }
   0x2   :  { %4982 = sst [smem:[#allocation29_spill]] %s4957_s1 }
   0x3   :  { %4983 = sst [smem:[#allocation30_spill]] %s4959_s3 }
   0x4   :  { %4984 = sst [smem:[#allocation31_spill]] %s4961_s5 }
   0x5   :  { %4985 = sst [smem:[#allocation32_spill]] %s4962_s6 }
   0x6   :  { %4986 = sst [smem:[#allocation33_spill]] %s4963_s7 }
   0x7   :  { %4987 = sst [smem:[#allocation34_spill]] %s4967_s11 }
   0x8   :  { %4988 = sst [smem:[#allocation35_spill]] %s4968_s12 }
   0x9   :  { %4989 = sst [smem:[#allocation36_spill]] %s4970_s14 }
   0xa   :  { %4990 = sst [smem:[#allocation37_spill]] %s4971_s15 }
   0xb   :  { %4991 = sst [smem:[#allocation38_spill]] %s4972_s16 }
   0xc   :  { %21 = vsyncpa [#allocation4], 0 }
   0xd   :  { %23 = vsyncpa [#allocation4 + $0x1], 0 }
   0xe   :  { %24 = vsyncpa [#allocation7], 0 }
   0xf   :  { %26 = vsyncpa [#allocation7 + $0x1], 0 }
  0x10   :  { %27 = vsyncpa [#allocation10], 0 }
  0x11   :  { %29 = vsyncpa [#allocation10 + $0x1], 0 }
  0x12   :  { %30 = vsyncpa [#allocation13], 0 }
  0x13   :  { %32 = vsyncpa [#allocation13 + $0x1], 0 }
  0x14   :  { %33 = vsyncpa [#allocation16], 0 }
  0x15   :  { %34 = vsyncpa [#allocation5], 0  ;;  %s4112_s21 = smov 0   ;;  %s4114_s22 = smov 0  }
  0x16   :  { %s4116_s23 = smov 0   ;;  %s4118_s24 = smov 0  }
  0x17   :  { %s4120_s25 = smov 0   ;;  %s4122_s26 = smov 0  }
  0x18 LB: > { %4992 = sst [smem:[#allocation24_spill]] %s3992_s23  ;;  %s49_s27 = sadd.s32 1, %s4000_s25  ;;  %s4004_s26 = sphi %s4122_s26, %s40_s26   ;;  %s4000_s25 = sphi %s4120_s25, %s5029_s25   ;;  %s3996_s24 = sphi %s4118_s24, %s5028_s24   ;;  %s3992_s23 = sphi %s4116_s23, %s5024_s23   ;;  %s3988_s22 = sphi %s4114_s22, %s5027_s22   ;;  %s3984_s21 = sphi %s4112_s21, %s5026_s21  }
  0x19   : > { %4993 = sst [smem:[#allocation25_spill]] %s4004_s26  ;;  %s137_s28 = sadd.s32 1, %s3992_s23 }
  0x1a   : > { %p50_p0 = scmp.ge.s32.totalorder %s49_s27, 2  ;;  %p144_p1 = scmp.ne.s32.totalorder %s3992_s23, %s3988_s22 }
  0x1b   : > { %p145_p2 = scmp.eq.s32.totalorder %s4004_s26, 0  ;;  %p3482_p4 = scmp.lt.s32.totalorder %s4004_s26, 2 }
  0x1c   : > { %s5031_s27 = smov (%p50_p0, %s49_s27), 0  ;;  %s4153_s30 = sand.u32 1, %s3992_s23  }
  0x1d   : > { %4994 = sst [smem:[#allocation26_spill]] %s5031_s27  ;;  %p146_p3 = por %p145_p2, %p144_p1 }
  0x1e   : > { %s134_s29 = ssub.s32 %s4000_s25, %s5031_s27  ;;  %s4160_s17 = sand.u32 1, %s4004_s26  }
  0x1f   : > { %p135_p5 = scmp.eq.s32.totalorder %s134_s29, 0  ;;  %p4155_p6 = pnand %p3482_p4, %p146_p3 }
  0x20   : > { %s4997_s5 = sld [smem:[#allocation31_spill]]  ;;  %s573_s29 = scalar_lea.vmem [#allocation6], %s4153_s30 }
  0x21   : > { %s4163_s18 = scalar_select %p135_p5, %s3992_s23, %s137_s28  }
  0x22   : > { %s580_s16 = sshll.u32 %s573_s29, 4  ;;  %s4976_s1 = scalar_lea.sflag [#allocation7], %s4160_s17  ;;  %s581_s16 = int_to_ptr.vmem [resolvable:$true] %s580_s16 }
  0x23   : > { %4996 = sst [smem:[#allocation27_spill]] %s4163_s18  ;;  %s657_s28 = scalar_lea.vmem [#allocation12], %s4153_s30 }
  0x24   : > { %s4998_s7 = sld [smem:[#allocation33_spill]]  ;;  %p150_p7 = scmp.ne.s32.totalorder %s3988_s22, %s3984_s21 }
  0x25   : > { %s4999_s11 = sld [smem:[#allocation34_spill]]  ;;  %p3301_p9 = scmp.ge.s32.totalorder %s4004_s26, 1 }
  0x26   : > { %s576_s27 = scalar_lea.hbm %s4997_s5, %s4000_s25  ;;  %s607_s5 = scalar_lea.vmem [#allocation9], %s4153_s30 }
  0x27   : > { %s578_s15 = sshll.u32 %s576_s27, 4  ;;  %s614_s29 = sshll.u32 %s607_s5, 4  ;;  %s579_s15 = int_to_ptr.hbm [resolvable:$true] %s578_s15  ;;  %s615_s29 = int_to_ptr.vmem [resolvable:$true] %s614_s29 }
  0x28   : > { %3465 = dma.hbm_to_vmem [thread:$0]  (!%p4155_p6), %s579_s15, 16, %s581_s16, %s4976_s1  }
  0x29   : > { %s4978_s27 = scalar_lea.sflag [#allocation10], %s4160_s17  ;;  %s664_s1 = sshll.u32 %s657_s28, 4  ;;  %s665_s1 = int_to_ptr.vmem [resolvable:$true] %s664_s1 }
  0x2a   : > { %s610_s19 = scalar_lea.hbm %s4998_s7, %s4000_s25  ;;  %s4196_s5 = sadd.s32 4294967295, %s4004_s26  }
  0x2b   : > { %s612_s20 = sshll.u32 %s610_s19, 4  ;;  %s660_s18 = scalar_lea.hbm %s4999_s11, %s4000_s25  ;;  %s613_s20 = int_to_ptr.hbm [resolvable:$true] %s612_s20 }
  0x2c   : > { %3471 = dma.hbm_to_vmem [thread:$0]  (!%p4155_p6), %s613_s20, 16, %s615_s29, %s4978_s27  }
  0x2d   : > { %s662_s7 = sshll.u32 %s660_s18, 4  ;;  %s4977_s19 = scalar_lea.sflag [#allocation13], %s4160_s17  ;;  %s663_s7 = int_to_ptr.hbm [resolvable:$true] %s662_s7 }
  0x2e   : > { %3477 = dma.hbm_to_vmem [thread:$0]  (!%p4155_p6), %s663_s7, 16, %s665_s1, %s4977_s19  }
  0x2f   : > { %p151_p8 = scmp.eq.s32.totalorder %s4196_s5, 0  ;;  %p489_p10 = scmp.lt.s32.totalorder %s4004_s26, 3 }
  0x30   : > { %s5002_s14 = sld [smem:[#allocation36_spill]]  ;;  %s4006_s21 = smov [#allocation15]  }
  0x31   : > { %p4205_p11 = por %p151_p8, %p150_p7  ;;  %p4209_p12 = pnand %p3301_p9, %p489_p10 }
  0x32   : > { %s520_s16 = sshll.u32 %s4006_s21, 4  ;;  %s5003_s3 = sld [smem:[#allocation30_spill]]  ;;  %s521_s16 = int_to_ptr.vmem [resolvable:$true] %s520_s16 }
  0x33   : > { %p3455_p13 = pneg %p4209_p12  ;;  %s4007_s27 = smov 64  }
  0x34   : > { %s4008_s1 = smov 4   ;;  %s548_s11 = scalar_lea.vmem [#allocation3], %s4153_s30 }
  0x35   : > { %p3456_p0 = pnand %p3455_p13, %p151_p8  ;;  %s546_s21 = scalar_lea.sflag [#allocation4], %s4153_s30 }
  0x36   : > { %s518_s15 = sshll.u32 %s5002_s14, 4  ;;  %s555_s14 = sshll.u32 %s548_s11, 4  ;;  %s519_s15 = int_to_ptr.hbm [resolvable:$true] %s518_s15  ;;  %s556_s14 = int_to_ptr.vmem [resolvable:$true] %s555_s14 }
  0x37   : > { %3458 = dma.hbm_to_vmem [thread:$0]  (!%p3456_p0), %s519_s15, 256, %s521_s16, [#allocation16], %s4007_s27, %s4007_s27, %s4008_s1  }
  0x38   : > { %s551_s19 = scalar_lea.hbm %s5003_s3, %s4000_s25  ;;  %s5004_s6 = sld [smem:[#allocation32_spill]] }
  0x39   : > { %s553_s7 = sshll.u32 %s551_s19, 4  ;;  %s590_s26 = scalar_lea.vmem [#allocation8], %s4153_s30  ;;  %s554_s7 = int_to_ptr.hbm [resolvable:$true] %s553_s7 }
  0x3a   : > { %3462 = dma.hbm_to_vmem [thread:$0]  (!%p4155_p6), %s554_s7, 16, %s556_s14, %s546_s21  }
  0x3b   : > { %s597_s27 = sshll.u32 %s590_s26, 4  ;;  %s5005_s11 = scalar_lea.sflag [#allocation7], %s4160_s17  ;;  %s598_s27 = int_to_ptr.vmem [resolvable:$true] %s597_s27 }
  0x3c   : > { %s635_s16 = scalar_lea.hbm %s4965_s9, %s4000_s25  ;;  %s632_s1 = scalar_lea.vmem [#allocation11], %s4153_s30 }
  0x3d   : > { %s637_s14 = sshll.u32 %s635_s16, 4  ;;  %s639_s7 = sshll.u32 %s632_s1, 4  ;;  %s638_s14 = int_to_ptr.hbm [resolvable:$true] %s637_s14  ;;  %s640_s7 = int_to_ptr.vmem [resolvable:$true] %s639_s7 }
  0x3e   : > { %s593_s3 = scalar_lea.hbm %s5004_s6, %s4000_s25  ;;  %s683_s18 = scalar_lea.hbm %s4969_s13, %s4000_s25 }
  0x3f   : > { %s595_s23 = sshll.u32 %s593_s3, 4  ;;  %s5006_s3 = scalar_lea.sflag [#allocation10], %s4160_s17  ;;  %s596_s23 = int_to_ptr.hbm [resolvable:$true] %s595_s23 }
  0x40   : > { %3468 = dma.hbm_to_vmem [thread:$0]  (!%p4155_p6), %s596_s23, 16, %s598_s27, %s5005_s11  }
  0x41   : > { %3474 = dma.hbm_to_vmem [thread:$0]  (!%p4155_p6), %s638_s14, 16, %s640_s7, %s5006_s3  }
  0x42   : > { %s685_s28 = sshll.u32 %s683_s18, 4  ;;  %s680_s6 = scalar_lea.vmem [#allocation14], %s4153_s30  ;;  %s686_s28 = int_to_ptr.hbm [resolvable:$true] %s685_s28 }
  0x43   : > { %s687_s12 = sshll.u32 %s680_s6, 4  ;;  %s5007_s23 = scalar_lea.sflag [#allocation13], %s4160_s17  ;;  %s688_s12 = int_to_ptr.vmem [resolvable:$true] %s687_s12 }
  0x44   : > { %3480 = dma.hbm_to_vmem [thread:$0]  (!%p4155_p6), %s686_s28, 16, %s688_s12, %s5007_s23  }
  0x45   : > { %696 = sbr.rel (%p4209_p12) target bundleno = 2295 (0x8f7), region = 84  ;;  %s4258_s27 = sand.u32 (!%p4209_p12), 1, %s3988_s22  }
  0x46   : > { %s699_s11 = scalar_lea.sflag (!%p4209_p12), [#allocation4], %s4258_s27  ;;  %s701_s19 = scalar_lea.vmem (!%p4209_p12), [#allocation3], %s4258_s27 }
  0x4a   : > { %3959 = dma.done.wait (%p4205_p11), %s699_s11, 16  }
  0x4b   : > { %3961 = vsyncadd (%p4205_p11), %s699_s11, 4294967280  ;;  %s707_s6 = sand.u32 1, %s4196_s5  }
  0x4c   : > { %s708_s12 = scalar_lea.sflag [#allocation7], %s707_s6 }
  0x4d   : > { %3963 = dma.done.wait (%p4205_p11), %s708_s12, 32  }
  0x4e   : > { %3965 = vsyncadd (%p4205_p11), %s708_s12, 4294967264  ;;  %s726_s17 = scalar_lea.sflag [#allocation10], %s707_s6 }
  0x4f   : > { %3967 = dma.done.wait (%p4205_p11), %s726_s17, 32  }
  0x50   : > { %3969 = vsyncadd (%p4205_p11), %s726_s17, 4294967264  ;;  %s744_s16 = scalar_lea.sflag [#allocation13], %s707_s6 }
  0x51   : > { %3971 = dma.done.wait (%p4205_p11), %s744_s16, 32  }
  0x52   : > { %3973 = vsyncadd (%p4205_p11), %s744_s16, 4294967264 }
  0x53   : > { %3975 = dma.done.wait (%p151_p8), [#allocation16], 256  }
  0x54   : > { %3977 = vsyncadd (%p151_p8), [#allocation16], 4294967040  ;;  %p873_p1 = scmp.lt.s32.totalorder %s3996_s24, 1  ;;  %s5008_s0 = sld [smem:[#allocation35_spill]] }
  0x55   : > { %p3316_p2 = scmp.ne.s32.totalorder %s3996_s24, 0 }
  0x56   : > { %s4291_s7 = scalar_select %p873_p1, %s3996_s24, 1 }
  0x57   : > { %901 = sbr.rel (%p3316_p2) target bundleno = 100 (0x64), region = 120  ;;  %s5009_s23 = sld [smem:[#allocation28_spill]] (!%p3316_p2) }
  0x58   : > { %s3417_s3 = sshll.u32 %s4291_s7, 4  ;;  %s3420_s26 = sshll.u32 %s4291_s7, 5 }
  0x59   : > { %s877_s18 = scalar_lea.vmem %s4958_s2, %s3417_s3  ;;  %s4301_s11 = scalar_lea.vmem %s4960_s4, %s3417_s3 }
  0x5a   : > { %s4306_s17 = scalar_lea.vmem %s4964_s8, %s3417_s3  ;;  %s4311_s14 = scalar_lea.vmem %s4966_s10, %s3420_s26 }
  0x5b   : > { %s895_s20 = scalar_lea.vmem %s5008_s0, %s4291_s7 }
  0x5c   : > { %vm910_vm0 = vcmask 261120   ;;  %vm912_vm1 = vcmask 253952  }
  0x5d   : > { %s5010_s30 = smov %s5009_s23  ;;  %v902_v0 = vld [vmem:[%s5009_s23] sm:$0xf] }
  0x5e   : > { %v903_v1 = vld [vmem:[%s5010_s30 + $0x4] sm:$0x1]  ;;  %v906_v2 = vunpack.c.l.bf16 %v902_v0  ;;  %v904_v4 = vld [vmem:[%s5010_s30 + $0x8] sm:$0xf]  ;;  %v905_v5 = vld [vmem:[%s5010_s30 + $0xc] sm:$0x1] }
  0x5f   : > { %v907_v3 = vunpack.c.l.bf16 %v903_v1  ;;  %v908_v6 = vunpack.c.l.bf16 %v904_v4  ;;  %v909_v7 = vunpack.c.l.bf16 %v905_v5 }
  0x60   : > { %911 = vst.msk [vmem:[#allocation2] sm:$0xff] %vm910_vm0, %v906_v2 }
  0x61   : > { %913 = vst.msk [vmem:[#allocation2 + $0x8] sm:$0x1] %vm912_vm1, %v907_v3 }
  0x62   : > { %914 = vst.msk [vmem:[#allocation2 + $0x10] sm:$0xff] %vm910_vm0, %v908_v6 }
  0x63   : > { %915 = vst.msk [vmem:[#allocation2 + $0x18] sm:$0x1] %vm912_vm1, %v909_v7 }
  0x64 PF: > { %v3422_v8 = vld [vmem:[%s877_s18 + $0x8] sm:$0xff]  ;;  %v3421_v9 = vld [vmem:[%s877_s18] sm:$0xff]  ;;  %vm941_vm2 = vcmask 1040384   ;;  %vm946_vm3 = vcmask 1041409   ;;  %vm950_vm4 = vcmask 1042434   ;;  %vm954_vm5 = vcmask 1043459  }
  0x65   : > { %1094 = vmatpush.bf16.msra.mxu0 %v3422_v8  ;;  %vm1083_vm6 = vcmask 261120   ;;  %v3570_v48 = vld [vmem:[%s701_s19] ss:$0 sm:$0xff]  ;;  %s4009_s19 = smov 120   ;;  %s4010_s15 = smov 112   ;;  %vm1247_vm7 = vcmask 64512  }
  0x66   : > { %v997_v49 = vrot.slane %v3570_v48, 1  ;;  %v998_v50 = vrot.slane %v3570_v48, 2  ;;  %v999_v52 = vrot.slane %v3570_v48, 3  ;;  %v1000_v53 = vrot.slane %v3570_v48, 4  ;;  %s4011_s18 = smov 88   ;;  %s4012_s12 = smov 96  }
  0x67   : > { %v916_v10 = vld [vmem:[#allocation2] sm:$0xff]  ;;  %v1001_v54 = vrot.slane %v3570_v48, 5  ;;  %v1002_v55 = vrot.slane %v3570_v48, 6  ;;  %v1003_v56 = vrot.slane %v3570_v48, 7  ;;  %s4013_s16 = smov 72   ;;  %s4014_s21 = smov 80  }
  0x68   : > { %v917_v11 = vld [vmem:[#allocation2 + $0x8] sm:$0x1]  ;;  %v922_v13 = vpack.c.bf16 %v916_v10, %v916_v10  ;;  %s4015_s28 = smov 56   ;;  %s4016_s23 = smov 104   ;;  %vm1379_vm8 = vcmask 1043456   ;;  %vm1380_vm9 = vcmask 1044480  }
  0x69   : > { %v918_v12 = vld [vmem:[#allocation2 + $0x10] sm:$0xff]  ;;  %v923_v14 = vpack.c.bf16 %v917_v11, %v917_v11  ;;  %1095 = vmatpush.bf16.msra.mxu0 %v3421_v9  ;;  %s4017_s6 = smov 64   ;;  %s5011_s26 = sld [smem:[#allocation29_spill]]  ;;  %vm1314_vm10 = vcmask 72704   ;;  %vm1318_vm11 = vcmask 65536   ;;  %vm1958_vm12 = vcmask 130048  }
  0x6a   : > { %v924_v15 = vpack.c.bf16 %v918_v12, %v918_v12  ;;  %v919_v16 = vld [vmem:[#allocation2 + $0x18] sm:$0x1]  ;;  %v937_v17 = vrot.slane %v922_v13, 3  ;;  %vm1963_vm13 = vcmask 195584   ;;  %vm2205_vm14 = vcmask 253952   ;;  %p3401_p3 = scmp.ne.s32.totalorder %s3996_s24, 1 }
  0x6b   : > { %v938_v18 = vrot.slane %v923_v14, 3  ;;  %v925_v20 = vpack.c.bf16 %v919_v16, %v919_v16 }
  0x6c   : > { %v939_v19 = vrot.slane %v924_v15, 3  ;;  %v944_v21 = vsel %vm941_vm2, %v922_v13, %v937_v17  ;;  %v947_v22 = vsel %vm946_vm3, %v922_v13, %v937_v17  ;;  %v951_v23 = vsel %vm950_vm4, %v922_v13, %v937_v17 }
  0x6d   : > { %v955_v24 = vsel %vm954_vm5, %v922_v13, %v937_v17  ;;  %v949_v25 = vrot.slane %v947_v22, 1  ;;  %v953_v26 = vrot.slane %v951_v23, 2  ;;  %v960_v28 = vsel %vm941_vm2, %v923_v14, %v938_v18  ;;  %1014 = vst [vmem:[#allocation1] ss:$9 sm:$0xff] %v944_v21 }
  0x6e   : > { %v957_v27 = vrot.slane %v955_v24, 3  ;;  %v964_v29 = vsel %vm941_vm2, %v924_v15, %v939_v19  ;;  %v966_v30 = vsel %vm946_vm3, %v924_v15, %v939_v19  ;;  %v969_v31 = vsel %vm950_vm4, %v924_v15, %v939_v19 }
  0x6f   : > { %v972_v32 = vsel %vm954_vm5, %v924_v15, %v939_v19  ;;  %v968_v33 = vrot.slane %v966_v30, 1  ;;  %v971_v34 = vrot.slane %v969_v31, 2  ;;  %v989_v36 = vunpack.i.h.s16 %v964_v29  ;;  %1017 = vst [vmem:[#allocation1 + $0x1] ss:$9 sm:$0xff] %v949_v25  ;;  %s5012_s0 = smov %s5011_s26 }
  0x70   : > { %v974_v35 = vrot.slane %v972_v32, 3  ;;  %v3317_v37 = vpack.i.b16 %v964_v29, %v960_v28  ;;  %1020 = vst [vmem:[#allocation1 + $0x2] ss:$9 sm:$0xff] %v953_v26  ;;  %v940_v43 = vrot.slane %v925_v20, 3 }
  0x71   : > { %v991_v38 = vunpack.i.h.s16 %v968_v33  ;;  %v993_v39 = vunpack.i.h.s16 %v971_v34  ;;  %v3318_v40 = vpack.i.b16 %v968_v33, %v989_v36  ;;  %1023 = vst [vmem:[#allocation1 + $0x3] ss:$9 sm:$0xff] %v957_v27 }
  0x72   : > { %1026 = vst [vmem:[#allocation1 + $0x4] ss:$9 sm:$0xff] %v3317_v37  ;;  %v995_v44 = vunpack.i.h.s16 %v974_v35  ;;  %v977_v45 = vsel %vm941_vm2, %v925_v20, %v940_v43 }
  0x73   : > { %v3319_v41 = vpack.i.b16 %v971_v34, %v991_v38  ;;  %v3320_v42 = vpack.i.b16 %v974_v35, %v993_v39  ;;  %1029 = vst [vmem:[#allocation1 + $0x5] ss:$9 sm:$0xff] %v3318_v40 }
  0x74   : > { %v3321_v46 = vpack.i.b16 %v977_v45, %v995_v44 }
  0x75   : > { %1032 = vst [vmem:[#allocation1 + $0x6] ss:$9 sm:$0xff] %v3319_v41 }
  0x76   : > { %1035 = vst [vmem:[#allocation1 + $0x7] ss:$9 sm:$0xff] %v3320_v42 }
  0x7d   : > { %v1036_v47 = vld [vmem:[#allocation1] sm:$0xff] }
  0x7e   : > { %3330 = vmatmul.msk.bf16.vlgmr.msra.gmra.mxu0 %vm1083_vm6, %v1036_v47  ;;  %1038 = vst [vmem:[#allocation1] ss:$9 sm:$0xff] %v3321_v46 }
  0x85   : > { %v1039_v51 = vld [vmem:[#allocation1] sm:$0xff] }
  0x86   : > { %1052 = vst [vmem:[#allocation1] ss:$9 sm:$0xff] %v3570_v48 }
  0x87   : > { %1054 = vst [vmem:[#allocation1 + $0x1] ss:$9 sm:$0xff] %v997_v49 }
  0x88   : > { %1056 = vst [vmem:[#allocation1 + $0x2] ss:$9 sm:$0xff] %v998_v50 }
  0x89   : > { %1058 = vst [vmem:[#allocation1 + $0x3] ss:$9 sm:$0xff] %v999_v52 }
  0x8a   : > { %1060 = vst [vmem:[#allocation1 + $0x4] ss:$9 sm:$0xff] %v1000_v53 }
  0x8b   : > { %1062 = vst [vmem:[#allocation1 + $0x5] ss:$9 sm:$0xff] %v1001_v54 }
  0x8c   : > { %1064 = vst [vmem:[#allocation1 + $0x6] ss:$9 sm:$0xff] %v1002_v55 }
  0x8d   : > { %1066 = vst [vmem:[#allocation1 + $0x7] ss:$9 sm:$0xff] %v1003_v56 }
  0x8e   : > { %3331 = vmatmul.msk.bf16.gmra.mxu0 %vm1083_vm6, %v1039_v51 }
  0x94   : > { %v1067_v57 = vld [vmem:[#allocation1] sm:$0xff] }
  0x95   : > { %1068 = vst [vmem:[#allocation1] ss:$9 sm:$0xff] %v3570_v48 }
  0x96   : > { %1069 = vst [vmem:[#allocation1 + $0x1] ss:$9 sm:$0xff] %v3570_v48 }
  0x97   : > { %1070 = vst [vmem:[#allocation1 + $0x2] ss:$9 sm:$0xff] %v997_v49 }
  0x98   : > { %1071 = vst [vmem:[#allocation1 + $0x3] ss:$9 sm:$0xff] %v998_v50 }
  0x99   : > { %1072 = vst [vmem:[#allocation1 + $0x4] ss:$9 sm:$0xff] %v999_v52 }
  0x9a   : > { %1073 = vst [vmem:[#allocation1 + $0x5] ss:$9 sm:$0xff] %v1000_v53 }
  0x9b   : > { %1074 = vst [vmem:[#allocation1 + $0x6] ss:$9 sm:$0xff] %v1001_v54 }
  0x9c   : > { %1075 = vst [vmem:[#allocation1 + $0x7] ss:$9 sm:$0xff] %v1002_v55 }
  0xa3   : > { %v1076_v58 = vld [vmem:[#allocation1] sm:$0xff] }
  0xa4   : > { %1077 = vst [vmem:[#allocation1] ss:$9 sm:$0xff] %v1003_v56 }
  0xa5   : > { %1078 = vst [vmem:[#allocation1 + $0x1] ss:$9 sm:$0xff] %v3570_v48 }
  0xac   : > { %v1079_v59 = vld [vmem:[#allocation1] sm:$0xff] }
  0xfb   : > { %v1097_v60 = vpop.f32.mrf.mxu0 }
  0xfc   : > { %v4344_v61 = vadd.f32 %v1097_v60, %v1067_v57 }
  0xfe   : > { %v4347_v62 = vrot.slane %v4344_v61, 1  ;;  %v4350_v63 = vrot.slane %v4344_v61, 2  ;;  %v4353_v0 = vrot.slane %v4344_v61, 3  ;;  %1124 = vst [vmem:[#allocation1] ss:$9 sm:$0xff] %v4344_v61  ;;  %v4357_v1 = vrot.slane %v4344_v61, 4 }
  0xff   : > { %v4360_v2 = vrot.slane %v4344_v61, 5  ;;  %v4364_v3 = vrot.slane %v4344_v61, 6  ;;  %v4368_v4 = vrot.slane %v4344_v61, 7 }
 0x100   : > { %1126 = vst [vmem:[#allocation1 + $0x1] ss:$9 sm:$0xff] %v4347_v62 }
 0x101   : > { %1128 = vst [vmem:[#allocation1 + $0x2] ss:$9 sm:$0xff] %v4350_v63 }
 0x102   : > { %1130 = vst [vmem:[#allocation1 + $0x3] ss:$9 sm:$0xff] %v4353_v0 }
 0x103   : > { %1132 = vst [vmem:[#allocation1 + $0x4] ss:$9 sm:$0xff] %v4357_v1  ;;  %v1099_v5 = vpop.f32.mrf.mxu0 }
 0x104   : > { %1134 = vst [vmem:[#allocation1 + $0x5] ss:$9 sm:$0xff] %v4360_v2  ;;  %v4375_v7 = vadd.f32 %v1099_v5, %v1076_v58 }
 0x105   : > { %1136 = vst [vmem:[#allocation1 + $0x6] ss:$9 sm:$0xff] %v4364_v3 }
 0x106   : > { %1138 = vst [vmem:[#allocation1 + $0x7] ss:$9 sm:$0xff] %v4368_v4  ;;  %v4379_v10 = vrot.slane %v4375_v7, 1  ;;  %v4382_v11 = vrot.slane %v4375_v7, 2  ;;  %v4385_v13 = vrot.slane %v4375_v7, 3  ;;  %v4389_v14 = vrot.slane %v4375_v7, 4 }
 0x107   : > { %v4393_v16 = vrot.slane %v4375_v7, 5  ;;  %v4397_v17 = vrot.slane %v4375_v7, 6  ;;  %v4403_v20 = vrot.slane %v4375_v7, 7 }
 0x10b   : > { %v1102_v6 = vpop.f32.mrf.mxu0 }
 0x10c   : > { %v4400_v18 = vadd.f32 %v1102_v6, %v1079_v59 }
 0x10d   : > { %v1139_v8 = vld [vmem:[#allocation1] sm:$0xff] }
 0x10e   : > { %1140 = vst [vmem:[#allocation1] ss:$9 sm:$0xff] %v4375_v7  ;;  %v1157_v15 = vpack.c.bf16 %v1139_v8, %v1139_v8  ;;  %v4413_v24 = vrot.slane %v4400_v18, 1 }
 0x110   : > { %v1237_v21 = vunpack.c.l.b16 %v1157_v15 }
 0x113   : > { %v1104_v9 = vpop.f32.mrf.mxu0 }
 0x115   : > { %v1141_v12 = vld [vmem:[#allocation1] sm:$0xff] }
 0x116   : > { %1142 = vst [vmem:[#allocation1] ss:$9 sm:$0xff] %v4379_v10  ;;  %v1158_v19 = vpack.c.bf16 %v1141_v12, %v1141_v12 }
 0x117   : > { %1143 = vst [vmem:[#allocation1 + $0x1] ss:$9 sm:$0xff] %v4382_v11 }
 0x118   : > { %1144 = vst [vmem:[#allocation1 + $0x2] ss:$9 sm:$0xff] %v4385_v13  ;;  %v1238_v22 = vunpack.c.l.b16 %v1158_v19 }
 0x119   : > { %1145 = vst [vmem:[#allocation1 + $0x3] ss:$9 sm:$0xff] %v4389_v14 }
 0x11a   : > { %1146 = vst [vmem:[#allocation1 + $0x4] ss:$9 sm:$0xff] %v4393_v16  ;;  %v4409_v23 = vpack.c.b16 %v1238_v22, %v1237_v21 }
 0x11b   : > { %1147 = vst [vmem:[#allocation1 + $0x5] ss:$9 sm:$0xff] %v4397_v17 }
 0x11c   : > { %1148 = vst [vmem:[#allocation1 + $0x6] ss:$9 sm:$0xff] %v4403_v20  ;;  %1432 = vrot.lane.b32.xlu2 %v4409_v23, %s4009_s19 }
 0x11d   : > { %1149 = vst [vmem:[#allocation1 + $0x7] ss:$9 sm:$0xff] %v4400_v18 }
 0x124   : > { %v1150_v25 = vld [vmem:[#allocation1] sm:$0xff] }
 0x125   : > { %1151 = vst [vmem:[#allocation1] ss:$9 sm:$0xff] %v4413_v24  ;;  %v1159_v26 = vpack.c.bf16 %v1150_v25, %v1150_v25 }
 0x127   : > { %v1270_v29 = vunpack.c.l.b16 %v1159_v26 }
 0x12c   : > { %v1152_v27 = vld [vmem:[#allocation1] sm:$0xff] }
 0x12d   : > { %1161 = vst [vmem:[#allocation1] ss:$9 sm:$0xff] %v4344_v61  ;;  %v1160_v28 = vpack.c.bf16 %v1152_v27, %v1152_v27 }
 0x12e   : > { %1163 = vst [vmem:[#allocation1 + $0x1] ss:$9 sm:$0xff] %v4347_v62 }
 0x12f   : > { %1165 = vst [vmem:[#allocation1 + $0x2] ss:$9 sm:$0xff] %v4350_v63  ;;  %v1271_v30 = vunpack.c.l.b16 %v1160_v28  ;;  %v4495_v28 = vld [vmem:[%s5011_s26] ss:$0 sm:$0xff]  ;;  %s5019_s26 = scalar_lea.vmem [#allocation14], %s4258_s27 }
 0x130   : > { %1167 = vst [vmem:[#allocation1 + $0x3] ss:$9 sm:$0xff] %v4353_v0 }
 0x131   : > { %1169 = vst [vmem:[#allocation1 + $0x4] ss:$9 sm:$0xff] %v4357_v1  ;;  %v4421_v31 = vpack.c.b16 %v1271_v30, %v1270_v29 }
 0x132   : > { %1171 = vst [vmem:[#allocation1 + $0x5] ss:$9 sm:$0xff] %v4360_v2 }
 0x133   : > { %1173 = vst [vmem:[#allocation1 + $0x6] ss:$9 sm:$0xff] %v4364_v3  ;;  %1456 = vrot.lane.b32.xlu2 %v4421_v31, %s4009_s19 }
 0x134   : > { %1175 = vst [vmem:[#allocation1 + $0x7] ss:$9 sm:$0xff] %v4368_v4 }
 0x13b   : > { %v1176_v32 = vld [vmem:[#allocation1] sm:$0xff]  ;;  %1590 = vrot.lane.b32.xlu2 %v4409_v23, %s4010_s15 }
 0x13c   : > { %1177 = vst [vmem:[#allocation1] ss:$9 sm:$0xff] %v4375_v7  ;;  %v1194_v33 = vpack.c.bf16 %v1176_v32, %v1176_v32 }
 0x13e   : > { %v1242_v36 = vunpack.c.l.b16 %v1194_v33 }
 0x143   : > { %v1178_v34 = vld [vmem:[#allocation1] sm:$0xff] }
 0x144   : > { %1179 = vst [vmem:[#allocation1] ss:$9 sm:$0xff] %v4379_v10  ;;  %v1195_v35 = vpack.c.bf16 %v1178_v34, %v1178_v34 }
 0x145   : > { %1180 = vst [vmem:[#allocation1 + $0x1] ss:$9 sm:$0xff] %v4382_v11 }
 0x146   : > { %1181 = vst [vmem:[#allocation1 + $0x2] ss:$9 sm:$0xff] %v4385_v13  ;;  %v1243_v37 = vunpack.c.l.b16 %v1195_v35 }
 0x147   : > { %1182 = vst [vmem:[#allocation1 + $0x3] ss:$9 sm:$0xff] %v4389_v14 }
 0x148   : > { %1183 = vst [vmem:[#allocation1 + $0x4] ss:$9 sm:$0xff] %v4393_v16  ;;  %v1244_v38 = vpack.c.b16 %v1243_v37, %v1242_v36 }
 0x149   : > { %1184 = vst [vmem:[#allocation1 + $0x5] ss:$9 sm:$0xff] %v4397_v17 }
 0x14a   : > { %1185 = vst [vmem:[#allocation1 + $0x6] ss:$9 sm:$0xff] %v4403_v20  ;;  %1434 = vrot.lane.b32.xlu1 %v1244_v38, %s4011_s18 }
 0x14b   : > { %1186 = vst [vmem:[#allocation1 + $0x7] ss:$9 sm:$0xff] %v4400_v18 }
 0x152   : > { %v1187_v39 = vld [vmem:[#allocation1] sm:$0xff] }
 0x153   : > { %1188 = vst [vmem:[#allocation1] ss:$9 sm:$0xff] %v4413_v24  ;;  %v1196_v40 = vpack.c.bf16 %v1187_v39, %v1187_v39 }
 0x155   : > { %v1275_v43 = vunpack.c.l.b16 %v1196_v40  ;;  %v4510_v40 = vld [vmem:[%s5012_s0 + $0x1] ss:$0 sm:$0xff] }
 0x15a   : > { %v1189_v41 = vld [vmem:[#allocation1] sm:$0xff] }
 0x15b   : > { %1198 = vst [vmem:[#allocation1] ss:$9 sm:$0xff] %v4344_v61  ;;  %v1197_v42 = vpack.c.bf16 %v1189_v41, %v1189_v41 }
 0x15c   : > { %1200 = vst [vmem:[#allocation1 + $0x1] ss:$9 sm:$0xff] %v4347_v62 }
 0x15d   : > { %1202 = vst [vmem:[#allocation1 + $0x2] ss:$9 sm:$0xff] %v4350_v63  ;;  %v1276_v44 = vunpack.c.l.b16 %v1197_v42 }
 0x15e   : > { %1204 = vst [vmem:[#allocation1 + $0x3] ss:$9 sm:$0xff] %v4353_v0 }
 0x15f   : > { %1206 = vst [vmem:[#allocation1 + $0x4] ss:$9 sm:$0xff] %v4357_v1  ;;  %v1277_v45 = vpack.c.b16 %v1276_v44, %v1275_v43 }
 0x160   : > { %1208 = vst [vmem:[#allocation1 + $0x5] ss:$9 sm:$0xff] %v4360_v2 }
 0x161   : > { %1210 = vst [vmem:[#allocation1 + $0x6] ss:$9 sm:$0xff] %v4364_v3  ;;  %1458 = vrot.lane.b32.xlu1 %v1277_v45, %s4011_s18  ;;  %1278 = vrot.lane.b32.xlu0 %v1277_v45, %s4012_s12  ;;  %s4020_s18 = smov 40  }
 0x162   : > { %1212 = vst [vmem:[#allocation1 + $0x7] ss:$9 sm:$0xff] %v4368_v4  ;;  %1774 = vrot.lane.b32.xlu2 %v1277_v45, %s4013_s16 }
 0x169   : > { %v1213_v46 = vld [vmem:[#allocation1] sm:$0xff]  ;;  %1616 = vrot.lane.b32.xlu1 %v1277_v45, %s4014_s21  ;;  %1245 = vrot.lane.b32.xlu0 %v1244_v38, %s4012_s12  ;;  %s4021_s12 = smov 8  }
 0x16a   : > { %1214 = vst [vmem:[#allocation1] ss:$9 sm:$0xff] %v4375_v7  ;;  %v1231_v47 = vpack.c.bf16 %v1213_v46, %v1213_v46 }
 0x16c   : > { %v1371_v50 = vunpack.c.l.b16 %v1231_v47 }
 0x171   : > { %v1215_v48 = vld [vmem:[#allocation1] sm:$0xff]  ;;  %1750 = vrot.lane.b32.xlu1 %v1244_v38, %s4013_s16  ;;  %1592 = vrot.lane.b32.xlu0 %v1244_v38, %s4014_s21  ;;  %s4022_s16 = smov 16   ;;  %s4023_s21 = smov 24  }
 0x172   : > { %1216 = vst [vmem:[#allocation1] ss:$9 sm:$0xff] %v4379_v10  ;;  %v1232_v49 = vpack.c.bf16 %v1215_v48, %v1215_v48 }
 0x173   : > { %1217 = vst [vmem:[#allocation1 + $0x1] ss:$9 sm:$0xff] %v4382_v11 }
 0x174   : > { %1218 = vst [vmem:[#allocation1 + $0x2] ss:$9 sm:$0xff] %v4385_v13  ;;  %v1372_v51 = vunpack.c.l.b16 %v1232_v49 }
 0x175   : > { %1219 = vst [vmem:[#allocation1 + $0x3] ss:$9 sm:$0xff] %v4389_v14 }
 0x176   : > { %1220 = vst [vmem:[#allocation1 + $0x4] ss:$9 sm:$0xff] %v4393_v16  ;;  %v4453_v52 = vpack.c.b16 %v1372_v51, %v1371_v50  ;;  %v1433_v61 = vpop.permute.xlu2 %1432  ;;  %v4018_v16 = vmov 65535  }
 0x177   : > { %1221 = vst [vmem:[#allocation1 + $0x5] ss:$9 sm:$0xff] %v4397_v17  ;;  %v1381_v17 = vsel %vm1379_vm8, 4294967295, %v4018_v16 }
 0x178   : > { %1222 = vst [vmem:[#allocation1 + $0x6] ss:$9 sm:$0xff] %v4403_v20  ;;  %1541 = vrot.lane.b32.xlu2 %v4453_v52, %s4015_s28 }
 0x179   : > { %1223 = vst [vmem:[#allocation1 + $0x7] ss:$9 sm:$0xff] %v4400_v18  ;;  %1772 = vrot.lane.b32.xlu1 %v4421_v31, %s4016_s23  ;;  %1614 = vrot.lane.b32.xlu0 %v4421_v31, %s4010_s15  ;;  %v4481_v18 = vsel %vm1380_vm9, %v1381_v17, 0  ;;  %s4019_s15 = smov 48  }
 0x180   : > { %v1224_v53 = vld [vmem:[#allocation1] sm:$0xff] }
 0x181   : > { %1225 = vst [vmem:[#allocation1] ss:$9 sm:$0xff] %v4413_v24  ;;  %1374 = vrot.lane.b32.xlu1 %v4453_v52, %s4017_s6  ;;  %1748 = vrot.lane.b32.xlu0 %v4409_v23, %s4016_s23  ;;  %v1233_v54 = vpack.c.bf16 %v1224_v53, %v1224_v53  ;;  %s5015_s23 = scalar_lea.vmem [#allocation9], %s4258_s27 }
 0x183   : > { %v1407_v57 = vunpack.c.l.b16 %v1233_v54 }
 0x188   : > { %v1226_v55 = vld [vmem:[#allocation1] sm:$0xff] }
 0x189   : > { %v1234_v56 = vpack.c.bf16 %v1226_v55, %v1226_v55 }
 0x18b   : > { %v1408_v58 = vunpack.c.l.b16 %v1234_v56 }
 0x18d   : > { %v4466_v59 = vpack.c.b16 %v1408_v58, %v1407_v57  ;;  %v1457_v2 = vpop.permute.xlu2 %1456 }
 0x18f   : > { %1410 = vrot.lane.b32.xlu0 %v4466_v59, %s4017_s6 }
 0x195   : > { %v1591_v8 = vpop.permute.xlu2 %1590 }
 0x1bc   : > { %v1435_v60 = vpop.permute.xlu1 %1434  ;;  %v1775_v12 = vpop.permute.xlu2 %1774 }
 0x1bd   : > { %v1440_v7 = vsel %vm1247_vm7, %v1435_v60, 0  ;;  %v1780_v14 = vsel %vm1247_vm7, %v1775_v12, 0 }
 0x1d3   : > { %v1459_v62 = vpop.permute.xlu1 %1458  ;;  %v1279_v63 = vpop.permute.xlu0 %1278 }
 0x1d4   : > { %v1284_v0 = vsel %vm1247_vm7, %v1279_v63, 0  ;;  %v1464_v1 = vsel %vm1247_vm7, %v1459_v62, 0 }
 0x1d5   : > { %1293 = vmatpush.bf16.xpose.msra.mxu2 %v1284_v0 }
 0x1db   : > { %v1617_v3 = vpop.permute.xlu1 %1616  ;;  %v1246_v4 = vpop.permute.xlu0 %1245 }
 0x1dc   : > { %v1622_v5 = vsel %vm1247_vm7, %v1617_v3, 0  ;;  %3333 = vmatmul.msk.bf16.vlgmr.msra.gmra.mxu2 %vm1247_vm7, %v4421_v31  ;;  %v1252_v6 = vsel %vm1247_vm7, %v1246_v4, 0 }
 0x1dd   : > { %1473 = vmatpush.bf16.xpose.msrb.mxu2 %v1464_v1  ;;  %1261 = vmatpush.bf16.xpose.msra.mxu1 %v1252_v6 }
 0x1e3   : > { %v1751_v9 = vpop.permute.xlu1 %1750  ;;  %v1593_v10 = vpop.permute.xlu0 %1592 }
 0x1e4   : > { %v1598_v11 = vsel %vm1247_vm7, %v1593_v10, 0  ;;  %3332 = vmatmul.msk.bf16.vlgmr.msra.gmra.mxu1 %vm1247_vm7, %v4409_v23  ;;  %v1756_v20 = vsel %vm1247_vm7, %v1751_v9, 0  ;;  %v1542_v23 = vpop.permute.xlu2 %1541 }
 0x1e5   : > { %1631 = vmatpush.bf16.xpose.msra.mxu2 %v1622_v5  ;;  %1449 = vmatpush.bf16.xpose.msrb.mxu1 %v1440_v7  ;;  %v1547_v26 = vand.u32 %v1542_v23, %v4481_v18 }
 0x1eb   : > { %v1773_v13 = vpop.permute.xlu1 %1772  ;;  %v1615_v15 = vpop.permute.xlu0 %1614 }
 0x1ec   : > { %3337 = vmatmul.msk.bf16.vlgmr.msrb.gmra.mxu2 %vm1247_vm7, %v1457_v2 }
 0x1ed   : > { %1607 = vmatpush.bf16.xpose.msra.mxu1 %v1598_v11  ;;  %1789 = vmatpush.bf16.xpose.msrb.mxu2 %v1780_v14 }
 0x1f3   : > { %v1375_v19 = vpop.permute.xlu1 %1374  ;;  %v1749_v22 = vpop.permute.xlu0 %1748 }
 0x1f4   : > { %v1384_v21 = vand.u32 %v4481_v18, %v1375_v19  ;;  %3336 = vmatmul.msk.bf16.vlgmr.msrb.gmra.mxu1 %vm1247_vm7, %v1433_v61 }
 0x1f5   : > { %1765 = vmatpush.bf16.xpose.msrb.mxu1 %v1756_v20 }
 0x1f6   : > { %1393 = vmatpush.bf16.msrb.mxu0 %v1384_v21 }
 0x1fc   : > { %3341 = vmatmul.msk.bf16.vlgmr.msra.gmra.mxu2 %vm1247_vm7, %v1615_v15 }
 0x201   : > { %v1411_v24 = vpop.permute.xlu0 %1410 }
 0x202   : > { %v1416_v25 = vand.u32 %v1411_v24, %v4481_v18 }
 0x204   : > { %1425 = vmatpush.bf16.msra.mxu3 %v1416_v25  ;;  %3340 = vmatmul.msk.bf16.vlgmr.msra.gmra.mxu1 %vm1247_vm7, %v1591_v8 }
 0x208   : > { %1556 = vmatpush.bf16.msrb.mxu3 %v1547_v26 }
 0x20c   : > { %3345 = vmatmul.msk.bf16.vlgmr.msrb.gmra.mxu2 %vm1247_vm7, %v1773_v13 }
 0x214   : > { %3344 = vmatmul.msk.bf16.vlgmr.msrb.gmra.mxu1 %vm1247_vm7, %v1749_v22 }
 0x25f   : > { %v1295_v27 = vpop.f32.mrf.mxu2 }
 0x260   : > { %v1302_v46 = vmul.f32 0.35355338, %v1295_v27 }
 0x261   : > { %v1263_v29 = vpop.f32.mrf.mxu1 }
 0x262   : > { %v1300_v30 = vmul.f32 0.35355338, %v1263_v29  ;;  %v4523_v51 = vadd.f32 %v4510_v40, %v1302_v46 }
 0x264   : > { %v4498_v31 = vadd.f32 %v4495_v28, %v1300_v30  ;;  %v1322_v57 = vsel %vm1314_vm10, %v4523_v51, -inf }
 0x266   : > { %v1315_v32 = vsel %vm1314_vm10, %v4498_v31, -inf }
 0x267   : > { %1316 = vmax.xlane.f32.xlu1 %v1315_v32  ;;  %v1297_v33 = vpop.f32.mrf.mxu2 }
 0x268   : > { %v1303_v54 = vmul.f32 0.35355338, %v1297_v33 }
 0x269   : > { %v1265_v34 = vpop.f32.mrf.mxu1 }
 0x26a   : > { %v1301_v35 = vmul.f32 0.35355338, %v1265_v34  ;;  %v4536_v62 = vadd.f32 %v4510_v40, %v1303_v54 }
 0x26c   : > { %v4503_v36 = vadd.f32 %v4495_v28, %v1301_v35  ;;  %v1325_v1 = vsel %vm1318_vm11, %v4536_v62, -inf }
 0x26e   : > { %v1319_v37 = vsel %vm1318_vm11, %v4503_v36, -inf }
 0x26f   : > { %1320 = vmax.xlane.f32.xlu2 %v1319_v37  ;;  %v1475_v38 = vpop.f32.mrf.mxu2 }
 0x270   : > { %v1482_v39 = vmul.f32 0.35355338, %v1475_v38 }
 0x271   : > { %v1451_v41 = vpop.f32.mrf.mxu1 }
 0x272   : > { %v1480_v42 = vmul.f32 0.35355338, %v1451_v41  ;;  %v4513_v43 = vadd.f32 %v4510_v40, %v1482_v39 }
 0x274   : > { %v1494_v44 = vsel %vm1314_vm10, %v4513_v43, -inf  ;;  %v4518_v45 = vadd.f32 %v4495_v28, %v1480_v42 }
 0x275   : > { %1495 = vmax.xlane.f32.xlu1 %v1494_v44 }
 0x276   : > { %v1488_v47 = vsel %vm1314_vm10, %v4518_v45, -inf }
 0x277   : > { %1489 = vmax.xlane.f32.xlu2 %v1488_v47  ;;  %v1477_v48 = vpop.f32.mrf.mxu2 }
 0x278   : > { %v1483_v55 = vmul.f32 0.35355338, %v1477_v48 }
 0x279   : > { %v1453_v49 = vpop.f32.mrf.mxu1 }
 0x27a   : > { %v1481_v50 = vmul.f32 0.35355338, %v1453_v49  ;;  %v4533_v61 = vadd.f32 %v4510_v40, %v1483_v55 }
 0x27c   : > { %v4526_v53 = vadd.f32 %v4495_v28, %v1481_v50  ;;  %v1497_v0 = vsel %vm1318_vm11, %v4533_v61, -inf }
 0x27e   : > { %v1491_v56 = vsel %vm1318_vm11, %v4526_v53, -inf }
 0x27f   : > { %1492 = vmax.xlane.f32.xlu0 %v1491_v56  ;;  %1323 = vmax.xlane.f32.xlu2 %v1322_v57  ;;  %v1633_v58 = vpop.f32.mrf.mxu2 }
 0x280   : > { %v1640_v63 = vmul.f32 0.35355338, %v1633_v58 }
 0x281   : > { %v1609_v60 = vpop.f32.mrf.mxu1 }
 0x282   : > { %v1638_v2 = vmul.f32 0.35355338, %v1609_v60  ;;  %v4543_v6 = vadd.f32 %v4510_v40, %v1640_v63 }
 0x284   : > { %v4546_v7 = vadd.f32 %v4495_v28, %v1638_v2  ;;  %v1652_v10 = vsel %vm1314_vm10, %v4543_v6, -inf }
 0x286   : > { %v1646_v13 = vsel %vm1314_vm10, %v4546_v7, -inf }
 0x287   : > { %v1635_v3 = vpop.f32.mrf.mxu2  ;;  %1498 = vmax.xlane.f32.xlu2 %v1497_v0  ;;  %1326 = vmax.xlane.f32.xlu0 %v1325_v1 }
 0x288   : > { %v1641_v11 = vmul.f32 0.35355338, %v1635_v3 }
 0x289   : > { %v1611_v4 = vpop.f32.mrf.mxu1 }
 0x28a   : > { %v1639_v5 = vmul.f32 0.35355338, %v1611_v4  ;;  %v4558_v16 = vadd.f32 %v4510_v40, %v1641_v11 }
 0x28c   : > { %v4549_v8 = vadd.f32 %v4495_v28, %v1639_v5  ;;  %v1655_v21 = vsel %vm1318_vm11, %v4558_v16, -inf }
 0x28e   : > { %v1649_v9 = vsel %vm1318_vm11, %v4549_v8, -inf }
 0x28f   : > { %1650 = vmax.xlane.f32.xlu1 %v1649_v9  ;;  %v1791_v12 = vpop.f32.mrf.mxu2  ;;  %1653 = vmax.xlane.f32.xlu2 %v1652_v10 }
 0x290   : > { %1647 = vmax.xlane.f32.xlu0 %v1646_v13  ;;  %v1798_v27 = vmul.f32 0.35355338, %v1791_v12 }
 0x291   : > { %v1767_v14 = vpop.f32.mrf.mxu1 }
 0x292   : > { %v1796_v15 = vmul.f32 0.35355338, %v1767_v14  ;;  %v4578_v32 = vadd.f32 %v4510_v40, %v1798_v27 }
 0x294   : > { %v4561_v17 = vadd.f32 %v4495_v28, %v1796_v15  ;;  %v1810_v33 = vsel %vm1314_vm10, %v4578_v32, -inf }
 0x296   : > { %v1804_v19 = vsel %vm1314_vm10, %v4561_v17, -inf }
 0x297   : > { %1805 = vmax.xlane.f32.xlu1 %v1804_v19  ;;  %v1793_v20 = vpop.f32.mrf.mxu2 }
 0x298   : > { %v1799_v22 = vmul.f32 0.35355338, %v1793_v20  ;;  %1656 = vmax.xlane.f32.xlu0 %v1655_v21 }
 0x299   : > { %v1769_v23 = vpop.f32.mrf.mxu1 }
 0x29a   : > { %v1797_v24 = vmul.f32 0.35355338, %v1769_v23  ;;  %v4568_v25 = vadd.f32 %v4510_v40, %v1799_v22 }
 0x29c   : > { %v4571_v26 = vadd.f32 %v4495_v28, %v1797_v24  ;;  %v1813_v30 = vsel %vm1318_vm11, %v4568_v25, -inf }
 0x29e   : > { %v1807_v29 = vsel %vm1318_vm11, %v4571_v26, -inf }
 0x29f   : > { %1808 = vmax.xlane.f32.xlu2 %v1807_v29 }
 0x2a0   : > { %1814 = vmax.xlane.f32.xlu0 %v1813_v30 }
 0x2a7   : > { %1811 = vmax.xlane.f32.xlu2 %v1810_v33 }
 0x2da   : > { %v1317_v34 = vpop.xlane.xlu1 %1316 }
 0x2db   : > { %v1328_v28 = vsub.f32 %v4498_v31, %v1317_v34 }
 0x2dd   : > { %v1332_v35 = vmul.f32 1.442695, %v1328_v28 }
 0x2df   : > { %3580 = vpow2.f32 %v1332_v35 }
 0x2e2   : > { %v1321_v37 = vpop.xlane.xlu2 %1320 }
 0x2e3   : > { %v1329_v38 = vsub.f32 %v4503_v36, %v1321_v37 }
 0x2e5   : > { %v4584_v39 = vpop.eup %3580  ;;  %v1334_v41 = vmul.f32 1.442695, %v1329_v38 }
 0x2e6   : > { %v1340_v42 = vsel %vm1314_vm10, %v4584_v39, 0.0 }
 0x2e7   : > { %3582 = vpow2.f32 %v1334_v41  ;;  %1341 = vadd.xlane.f32.xlu1 %v1340_v42 }
 0x2e8   : > { %v1496_v36 = vpop.xlane.xlu1 %1495 }
 0x2e9   : > { %v1502_v56 = vsub.f32 %v4513_v43, %v1496_v36 }
 0x2ea   : > { %v1490_v40 = vpop.xlane.xlu2 %1489 }
 0x2eb   : > { %v1500_v44 = vsub.f32 %v4518_v45, %v1490_v40  ;;  %v1508_v60 = vmul.f32 1.442695, %v1502_v56 }
 0x2ed   : > { %v4589_v46 = vpop.eup %3582  ;;  %v1504_v47 = vmul.f32 1.442695, %v1500_v44 }
 0x2ee   : > { %v1343_v31 = vsel %vm1318_vm11, %v4589_v46, 0.0 }
 0x2ef   : > { %3584 = vpow2.f32 %v1504_v47  ;;  %1344 = vadd.xlane.f32.xlu2 %v1343_v31 }
 0x2f2   : > { %v1493_v48 = vpop.xlane.xlu0 %1492  ;;  %v1324_v49 = vpop.xlane.xlu2 %1323 }
 0x2f3   : > { %v1501_v50 = vsub.f32 %v4526_v53, %v1493_v48  ;;  %v1330_v54 = vsub.f32 %v4523_v51, %v1324_v49 }
 0x2f5   : > { %v4595_v55 = vpop.eup %3584  ;;  %v1506_v45 = vmul.f32 1.442695, %v1501_v50  ;;  %v1336_v57 = vmul.f32 1.442695, %v1330_v54 }
 0x2f6   : > { %v1512_v58 = vsel %vm1314_vm10, %v4595_v55, 0.0 }
 0x2f7   : > { %3586 = vpow2.f32 %v1506_v45  ;;  %1513 = vadd.xlane.f32.xlu1 %v1512_v58 }
 0x2f8   : > { %3588 = vpow2.f32 %v1336_v57 }
 0x2f9   : > { %3590 = vpow2.f32 %v1508_v60 }
 0x2fa   : > { %v1499_v63 = vpop.xlane.xlu2 %1498  ;;  %v1327_v0 = vpop.xlane.xlu0 %1326 }
 0x2fb   : > { %v1331_v1 = vsub.f32 %v4536_v62, %v1327_v0  ;;  %v1503_v34 = vsub.f32 %v4533_v61, %v1499_v63 }
 0x2fd   : > { %v4601_v53 = vpop.eup %3586  ;;  %v1338_v51 = vmul.f32 1.442695, %v1331_v1  ;;  %v1510_v35 = vmul.f32 1.442695, %v1503_v34 }
 0x2fe   : > { %v4603_v2 = vpop.eup %3588  ;;  %v1515_v43 = vsel %vm1318_vm11, %v4601_v53, 0.0 }
 0x2ff   : > { %1516 = vadd.xlane.f32.xlu2 %v1515_v43  ;;  %v1346_v3 = vsel %vm1314_vm10, %v4603_v2, 0.0  ;;  %3592 = vpow2.f32 %v1338_v51  ;;  %v4609_v5 = vpop.eup %3590 }
 0x300   : > { %1347 = vadd.xlane.f32.xlu0 %v1346_v3  ;;  %v1518_v19 = vsel %vm1314_vm10, %v4609_v5, 0.0 }
 0x302   : > { %v1651_v4 = vpop.xlane.xlu1 %1650  ;;  %v1654_v9 = vpop.xlane.xlu2 %1653 }
 0x303   : > { %v1659_v62 = vsub.f32 %v4549_v8, %v1651_v4  ;;  %v1648_v10 = vpop.xlane.xlu0 %1647  ;;  %v1660_v14 = vsub.f32 %v4543_v6, %v1654_v9 }
 0x304   : > { %v1658_v11 = vsub.f32 %v4546_v7, %v1648_v10 }
 0x305   : > { %v1664_v12 = vmul.f32 1.442695, %v1659_v62  ;;  %v4613_v13 = vpop.eup %3592  ;;  %v1666_v8 = vmul.f32 1.442695, %v1660_v14 }
 0x306   : > { %v1662_v15 = vmul.f32 1.442695, %v1658_v11  ;;  %v1349_v20 = vsel %vm1318_vm11, %v4613_v13, 0.0 }
 0x307   : > { %3594 = vpow2.f32 %v1664_v12  ;;  %1519 = vadd.xlane.f32.xlu2 %v1518_v19  ;;  %1350 = vadd.xlane.f32.xlu1 %v1349_v20 }
 0x308   : > { %3596 = vpow2.f32 %v1662_v15 }
 0x309   : > { %3598 = vpow2.f32 %v1666_v8 }
 0x30a   : > { %v1806_v21 = vpop.xlane.xlu1 %1805 }
 0x30b   : > { %v1816_v7 = vsub.f32 %v4561_v17, %v1806_v21  ;;  %v1657_v28 = vpop.xlane.xlu0 %1656 }
 0x30c   : > { %v1661_v37 = vsub.f32 %v4558_v16, %v1657_v28 }
 0x30d   : > { %v4621_v22 = vpop.eup %3594  ;;  %v1820_v23 = vmul.f32 1.442695, %v1816_v7 }
 0x30e   : > { %v1673_v6 = vsel %vm1318_vm11, %v4621_v22, 0.0  ;;  %v4625_v24 = vpop.eup %3596  ;;  %v1668_v38 = vmul.f32 1.442695, %v1661_v37 }
 0x30f   : > { %3600 = vpow2.f32 %v1820_v23  ;;  %1674 = vadd.xlane.f32.xlu2 %v1673_v6  ;;  %v1670_v27 = vsel %vm1314_vm10, %v4625_v24, 0.0  ;;  %v4629_v29 = vpop.eup %3598 }
 0x310   : > { %1671 = vadd.xlane.f32.xlu1 %v1670_v27  ;;  %v1676_v33 = vsel %vm1314_vm10, %v4629_v29, 0.0  ;;  %3602 = vpow2.f32 %v1510_v35 }
 0x311   : > { %3604 = vpow2.f32 %v1668_v38 }
 0x312   : > { %v1809_v44 = vpop.xlane.xlu2 %1808 }
 0x313   : > { %v1815_v41 = vpop.xlane.xlu0 %1814  ;;  %v1817_v16 = vsub.f32 %v4571_v26, %v1809_v44 }
 0x314   : > { %1568 = vrot.lane.b32.xlu0 %v4466_v59, %s4015_s28  ;;  %v1819_v40 = vsub.f32 %v4568_v25, %v1815_v41  ;;  %s5014_s28 = scalar_lea.vmem [#allocation8], %s4258_s27 }
 0x315   : > { %v4633_v17 = vpop.eup %3600  ;;  %v1822_v50 = vmul.f32 1.442695, %v1817_v16 }
 0x316   : > { %v1828_v30 = vsel %vm1314_vm10, %v4633_v17, 0.0  ;;  %v4643_v42 = vpop.eup %3602  ;;  %v1826_v47 = vmul.f32 1.442695, %v1819_v40 }
 0x317   : > { %1829 = vadd.xlane.f32.xlu2 %v1828_v30  ;;  %v1521_v61 = vsel %vm1318_vm11, %v4643_v42, 0.0  ;;  %v4648_v31 = vpop.eup %3604 }
 0x318   : > { %1677 = vadd.xlane.f32.xlu1 %v1676_v33  ;;  %3606 = vpow2.f32 %v1826_v47  ;;  %v1679_v36 = vsel %vm1318_vm11, %v4648_v31, 0.0 }
 0x319   : > { %3608 = vpow2.f32 %v1822_v50 }
 0x31a   : > { %v1812_v48 = vpop.xlane.xlu2 %1811 }
 0x31b   : > { %v1818_v25 = vsub.f32 %v4578_v32, %v1812_v48 }
 0x31d   : > { %v1824_v56 = vmul.f32 1.442695, %v1818_v25 }
 0x31e   : > { %v4653_v49 = vpop.eup %3606 }
 0x31f   : > { %v1837_v54 = vsel %vm1318_vm11, %v4653_v49, 0.0  ;;  %3610 = vpow2.f32 %v1824_v56  ;;  %v4658_v45 = vpop.eup %3608 }
 0x320   : > { %v1831_v57 = vsel %vm1318_vm11, %v4658_v45, 0.0 }
 0x325   : > { %v4662_v26 = vpop.eup %3610 }
 0x326   : > { %v1834_v60 = vsel %vm1314_vm10, %v4662_v26, 0.0 }
 0x32f   : > { %1726 = vrot.lane.b32.xlu2 %v4466_v59, %s4019_s15 }
 0x331   : > { %1699 = vrot.lane.b32.xlu1 %v4453_v52, %s4019_s15 }
 0x33e   : > { %1522 = vadd.xlane.f32.xlu0 %v1521_v61 }
 0x346   : > { %1680 = vadd.xlane.f32.xlu0 %v1679_v36 }
 0x34e   : > { %1838 = vadd.xlane.f32.xlu0 %v1837_v54 }
 0x358   : > { %1832 = vadd.xlane.f32.xlu2 %v1831_v57 }
 0x35a   : > { %v1342_v58 = vpop.xlane.xlu1 %1341 }
 0x35b   : > { %1835 = vadd.xlane.f32.xlu1 %v1834_v60  ;;  %3612 = vrcp.f32 %v1342_v58 }
 0x361   : > { %v3613_v63 = vpop.eup %3612 }
 0x362   : > { %1884 = vrot.lane.b32.xlu0 %v4466_v59, %s4020_s18  ;;  %v1345_v32 = vpop.xlane.xlu2 %1344  ;;  %v1356_v0 = vmul.f32 %v3613_v63, %v4584_v39 }
 0x363   : > { %3614 = vrcp.f32 %v1345_v32 }
 0x364   : > { %v1360_v51 = vpack.c.bf16 %v1356_v0, %v1356_v0 }
 0x366   : > { %v1366_v4 = vunpack.c.l.b16 %v1360_v51 }
 0x369   : > { %v3615_v1 = vpop.eup %3614 }
 0x36a   : > { %v1357_v43 = vmul.f32 %v3615_v1, %v4589_v46  ;;  %v1514_v11 = vpop.xlane.xlu1 %1513 }
 0x36c   : > { %v1361_v3 = vpack.c.bf16 %v1357_v43, %v1357_v43 }
 0x36e   : > { %v1367_v62 = vunpack.c.l.b16 %v1361_v3 }
 0x370   : > { %1857 = vrot.lane.b32.xlu2 %v4453_v52, %s4020_s18  ;;  %v1368_v9 = vpack.c.b16 %v1367_v62, %v1366_v4 }
 0x372   : > { %3334 = vmatmul.msk.bf16.vlgmr.msrb.gmra.mxu0 %vm1314_vm10, %v1368_v9  ;;  %v1517_v10 = vpop.xlane.xlu2 %1516 }
 0x373   : > { %v1348_v59 = vpop.xlane.xlu0 %1347 }
 0x374   : > { %3616 = vrcp.f32 %v1348_v59 }
 0x37a   : > { %v1520_v12 = vpop.xlane.xlu2 %1519  ;;  %v1351_v14 = vpop.xlane.xlu1 %1350 }
 0x37b   : > { %v3617_v15 = vpop.eup %3616  ;;  %3618 = vrcp.f32 %v1351_v14 }
 0x37c   : > { %v1358_v39 = vmul.f32 %v3617_v15, %v4603_v2  ;;  %3620 = vrcp.f32 %v1517_v10 }
 0x37d   : > { %3622 = vrcp.f32 %v1514_v11 }
 0x37e   : > { %v1362_v8 = vpack.c.bf16 %v1358_v39, %v1358_v39 }
 0x380   : > { %v1402_v23 = vunpack.c.l.b16 %v1362_v8 }
 0x381   : > { %v3619_v19 = vpop.eup %3618 }
 0x382   : > { %v1675_v46 = vpop.xlane.xlu2 %1674  ;;  %v1359_v20 = vmul.f32 %v3619_v19, %v4613_v13  ;;  %v3621_v30 = vpop.eup %3620 }
 0x383   : > { %v3623_v2 = vpop.eup %3622  ;;  %v1529_v34 = vmul.f32 %v3621_v30, %v4601_v53  ;;  %v1672_v35 = vpop.xlane.xlu1 %1671  ;;  %3624 = vrcp.f32 %v1675_v46 }
 0x384   : > { %v1363_v52 = vpack.c.bf16 %v1359_v20, %v1359_v20  ;;  %v1528_v13 = vmul.f32 %v3623_v2, %v4595_v55  ;;  %3626 = vrcp.f32 %v1672_v35 }
 0x385   : > { %v1533_v28 = vpack.c.bf16 %v1529_v34, %v1529_v34  ;;  %3628 = vrcp.f32 %v1520_v12 }
 0x386   : > { %v1569_v21 = vpop.permute.xlu0 %1568  ;;  %v1403_v6 = vunpack.c.l.b16 %v1363_v52  ;;  %v1532_v38 = vpack.c.bf16 %v1528_v13, %v1528_v13 }
 0x387   : > { %v1574_v7 = vand.u32 %v1569_v21, %v4481_v18  ;;  %v1539_v40 = vunpack.c.l.b16 %v1533_v28 }
 0x388   : > { %v1404_v27 = vpack.c.b16 %v1403_v6, %v1402_v23  ;;  %v1538_v44 = vunpack.c.l.b16 %v1532_v38 }
 0x389   : > { %1583 = vmatpush.bf16.msra.mxu0 %v1574_v7  ;;  %v3625_v61 = vpop.eup %3624 }
 0x38a   : > { %v1830_v33 = vpop.xlane.xlu2 %1829  ;;  %3335 = vmatmul.msk.bf16.vlgmr.msra.gmra.mxu3 %vm1314_vm10, %v1404_v27  ;;  %v1540_v47 = vpack.c.b16 %v1539_v40, %v1538_v44  ;;  %v3627_v36 = vpop.eup %3626  ;;  %v1687_v53 = vmul.f32 %v3625_v61, %v4621_v22 }
 0x38b   : > { %v1678_v16 = vpop.xlane.xlu1 %1677  ;;  %v1686_v55 = vmul.f32 %v3627_v36, %v4625_v24  ;;  %v3629_v32 = vpop.eup %3628 }
 0x38c   : > { %v1691_v48 = vpack.c.bf16 %v1687_v53, %v1687_v53  ;;  %v1530_v63 = vmul.f32 %v3629_v32, %v4609_v5 }
 0x38d   : > { %v1690_v50 = vpack.c.bf16 %v1686_v55, %v1686_v55 }
 0x38e   : > { %v1697_v54 = vunpack.c.l.b16 %v1691_v48  ;;  %v1534_v0 = vpack.c.bf16 %v1530_v63, %v1530_v63 }
 0x38f   : > { %v1696_v56 = vunpack.c.l.b16 %v1690_v50 }
 0x390   : > { %v1565_v43 = vunpack.c.l.b16 %v1534_v0 }
 0x391   : > { %v1698_v58 = vpack.c.b16 %v1697_v54, %v1696_v56 }
 0x392   : > { %v1727_v37 = vpop.permute.xlu2 %1726 }
 0x393   : > { %v1732_v41 = vand.u32 %v1727_v37, %v4481_v18 }
 0x395   : > { %1741 = vmatpush.bf16.msrb.mxu0 %v1732_v41 }
 0x39a   : > { %3338 = vmatmul.msk.bf16.vlgmr.msrb.gmra.mxu3 %vm1314_vm10, %v1540_v47 }
 0x3a3   : > { %v1700_v25 = vpop.permute.xlu1 %1699 }
 0x3a4   : > { %v1705_v57 = vand.u32 %v1700_v25, %v4481_v18 }
 0x3a6   : > { %1714 = vmatpush.bf16.msra.mxu3 %v1705_v57 }
 0x3aa   : > { %3342 = vmatmul.msk.bf16.vlgmr.msra.gmra.mxu3 %vm1314_vm10, %v1698_v58 }
 0x3b1   : > { %v1523_v60 = vpop.xlane.xlu0 %1522 }
 0x3b2   : > { %3630 = vrcp.f32 %v1523_v60 }
 0x3b8   : > { %v3631_v22 = vpop.eup %3630 }
 0x3b9   : > { %v1531_v24 = vmul.f32 %v3631_v22, %v4643_v42  ;;  %v1681_v1 = vpop.xlane.xlu0 %1680  ;;  %v3424_v22 = vld [vmem:[%s4301_s11 + $0x8] sm:$0xff] }
 0x3ba   : > { %3632 = vrcp.f32 %v1681_v1  ;;  %2135 = vmatpush.bf16.msra.mxu1 %v3424_v22 }
 0x3bb   : > { %v1535_v51 = vpack.c.bf16 %v1531_v24, %v1531_v24  ;;  %3634 = vrcp.f32 %v1678_v16 }
 0x3bc   : > { %3636 = vrcp.f32 %v1830_v33 }
 0x3bd   : > { %v1566_v3 = vunpack.c.l.b16 %v1535_v51 }
 0x3bf   : > { %v1567_v4 = vpack.c.b16 %v1566_v3, %v1565_v43 }
 0x3c0   : > { %v3633_v62 = vpop.eup %3632 }
 0x3c1   : > { %3339 = vmatmul.msk.bf16.vlgmr.msra.gmra.mxu0 %vm1314_vm10, %v1567_v4  ;;  %v3635_v9 = vpop.eup %3634  ;;  %v1689_v10 = vmul.f32 %v3633_v62, %v4648_v31  ;;  %v1839_v59 = vpop.xlane.xlu0 %1838  ;;  %v3423_v4 = vld [vmem:[%s4301_s11] sm:$0xff]  ;;  %s5013_s11 = scalar_lea.vmem [#allocation6], %s4258_s27 }
 0x3c2   : > { %v1688_v11 = vmul.f32 %v3635_v9, %v4629_v29  ;;  %3638 = vrcp.f32 %v1839_v59  ;;  %v3637_v15 = vpop.eup %3636  ;;  %2136 = vmatpush.bf16.msra.mxu1 %v3423_v4 }
 0x3c3   : > { %v1693_v5 = vpack.c.bf16 %v1689_v10, %v1689_v10  ;;  %v1844_v19 = vmul.f32 %v3637_v15, %v4633_v17 }
 0x3c4   : > { %v1692_v12 = vpack.c.bf16 %v1688_v11, %v1688_v11 }
 0x3c5   : > { %v1724_v42 = vunpack.c.l.b16 %v1693_v5  ;;  %v1848_v29 = vpack.c.bf16 %v1844_v19, %v1844_v19 }
 0x3c6   : > { %v1723_v39 = vunpack.c.l.b16 %v1692_v12 }
 0x3c7   : > { %v1854_v33 = vunpack.c.l.b16 %v1848_v29 }
 0x3c8   : > { %v1725_v46 = vpack.c.b16 %v1724_v42, %v1723_v39  ;;  %v3639_v8 = vpop.eup %3638 }
 0x3c9   : > { %v1847_v6 = vmul.f32 %v3639_v8, %v4653_v49 }
 0x3cb   : > { %v1833_v14 = vpop.xlane.xlu2 %1832  ;;  %v1851_v13 = vpack.c.bf16 %v1847_v6, %v1847_v6 }
 0x3cc   : > { %3640 = vrcp.f32 %v1833_v14 }
 0x3cd   : > { %v1882_v37 = vunpack.c.l.b16 %v1851_v13 }
 0x3ce   : > { %v1836_v20 = vpop.xlane.xlu1 %1835 }
 0x3cf   : > { %3642 = vrcp.f32 %v1836_v20 }
 0x3d1   : > { %3343 = vmatmul.msk.bf16.vlgmr.msrb.gmra.mxu0 %vm1314_vm10, %v1725_v46 }
 0x3d2   : > { %v3641_v31 = vpop.eup %3640 }
 0x3d3   : > { %v1845_v52 = vmul.f32 %v3641_v31, %v4658_v45  ;;  %v1858_v21 = vpop.permute.xlu2 %1857 }
 0x3d4   : > { %v1863_v7 = vand.u32 %v1858_v21, %v4481_v18  ;;  %v1885_v23 = vpop.permute.xlu0 %1884 }
 0x3d5   : > { %v1849_v27 = vpack.c.bf16 %v1845_v52, %v1845_v52  ;;  %v1890_v30 = vand.u32 %v1885_v23, %v4481_v18  ;;  %v3643_v17 = vpop.eup %3642 }
 0x3d6   : > { %1872 = vmatpush.bf16.msrb.mxu3 %v1863_v7  ;;  %v1846_v34 = vmul.f32 %v3643_v17, %v4662_v26 }
 0x3d7   : > { %v1855_v2 = vunpack.c.l.b16 %v1849_v27  ;;  %1899 = vmatpush.bf16.msra.mxu0 %v1890_v30 }
 0x3d8   : > { %v1850_v35 = vpack.c.bf16 %v1846_v34, %v1846_v34 }
 0x3d9   : > { %v1856_v28 = vpack.c.b16 %v1855_v2, %v1854_v33 }
 0x3da   : > { %v1881_v45 = vunpack.c.l.b16 %v1850_v35 }
 0x3db   : > { %3346 = vmatmul.msk.bf16.vlgmr.msrb.gmra.mxu3 %vm1314_vm10, %v1856_v28 }
 0x3dc   : > { %v1883_v38 = vpack.c.b16 %v1882_v37, %v1881_v45 }
 0x3e1   : > { %3347 = vmatmul.msk.bf16.vlgmr.msra.gmra.mxu0 %vm1314_vm10, %v1883_v38 }
 0x3ef   : > { %v1395_v44 = vpop.f32.mrf.mxu0 }
 0x3f7   : > { %v1397_v26 = vpop.f32.mrf.mxu0 }
 0x40d   : > { %v1427_v49 = vpop.f32.mrf.mxu3 }
 0x415   : > { %v4697_v41 = vpop.f32.mrf.mxu3 }
 0x41d   : > { %v1558_v18 = vpop.f32.mrf.mxu3 }
 0x425   : > { %v1560_v40 = vpop.f32.mrf.mxu3 }
 0x426   : > { %1912 = vrot.lane.b32.xlu0 %v1560_v40, %s4021_s12 }
 0x42d   : > { %v1716_v16 = vpop.f32.mrf.mxu3 }
 0x435   : > { %v1718_v48 = vpop.f32.mrf.mxu3 }
 0x43e   : > { %v1585_v61 = vpop.f32.mrf.mxu0 }
 0x43f   : > { %v3555_v47 = vpack.i.bf16 %v1558_v18, %v1585_v61 }
 0x441   : > { %3556 = vrot.lane.b32.xlu2 %v3555_v47, %s4021_s12 }
 0x446   : > { %v1587_v36 = vpop.f32.mrf.mxu0 }
 0x44e   : > { %v1743_v53 = vpop.f32.mrf.mxu0 }
 0x44f   : > { %v3560_v55 = vpack.i.bf16 %v1716_v16, %v1743_v53 }
 0x451   : > { %3561 = vrot.lane.b32.xlu2 %v3560_v55, %s4022_s16 }
 0x456   : > { %v1745_v50 = vpop.f32.mrf.mxu0 }
 0x459   : > { %1928 = vrot.lane.b32.xlu2 %v1718_v48, %s4022_s16 }
 0x45e   : > { %v1901_v25 = vpop.f32.mrf.mxu0  ;;  %v1874_v54 = vpop.f32.mrf.mxu3 }
 0x45f   : > { %v3565_v56 = vpack.i.bf16 %v1874_v54, %v1901_v25 }
 0x461   : > { %1916 = vrot.lane.b32.xlu2 %v1587_v36, %s4021_s12  ;;  %3566 = vrot.lane.b32.xlu1 %v3565_v56, %s4023_s21 }
 0x466   : > { %v1876_v57 = vpop.f32.mrf.mxu3  ;;  %v1903_v58 = vpop.f32.mrf.mxu0 }
 0x467   : > { %1944 = vrot.lane.b32.xlu0 %v1876_v57, %s4023_s21 }
 0x469   : > { %1948 = vrot.lane.b32.xlu2 %v1903_v58, %s4023_s21  ;;  %v3573_v58 = vld [vmem:[%s5013_s11] ss:$0 sm:$0xff] }
 0x46f   : > { %1932 = vrot.lane.b32.xlu0 %v1745_v50, %s4022_s16 }
 0x498   : > { %v1913_v1 = vpop.permute.xlu0 %1912 }
 0x499   : > { %v1955_v39 = vsel %vm1247_vm7, %v1397_v26, %v1913_v1  ;;  %v2044_v1 = vrot.slane %v3573_v58, 6 }
 0x49b   : > { %v3557_v60 = vpop.permute.xlu2 %3556 }
 0x49c   : > { %v3559_v0 = vunpack.i.h.bf16 %v3557_v60  ;;  %v3558_v24 = vunpack.i.l.bf16 %v3557_v60  ;;  %v2039_v60 = vrot.slane %v3573_v58, 1 }
 0x49e   : > { %v1954_v62 = vsel %vm1247_vm7, %v1395_v44, %v3559_v0  ;;  %v1956_v9 = vsel %vm1247_vm7, %v1427_v49, %v3558_v24  ;;  %v2042_v0 = vrot.slane %v3573_v58, 4  ;;  %v2043_v24 = vrot.slane %v3573_v58, 5 }
 0x4ab   : > { %v3562_v32 = vpop.permute.xlu2 %3561 }
 0x4ac   : > { %v3564_v51 = vunpack.i.h.bf16 %v3562_v32  ;;  %v3563_v43 = vunpack.i.l.bf16 %v3562_v32  ;;  %v2040_v32 = vrot.slane %v3573_v58, 2 }
 0x4ae   : > { %v1959_v5 = vsel %vm1958_vm12, %v1954_v62, %v3564_v51  ;;  %v1961_v59 = vsel %vm1958_vm12, %v1956_v9, %v3563_v43  ;;  %v2045_v51 = vrot.slane %v3573_v58, 7 }
 0x4b3   : > { %v1929_v63 = vpop.permute.xlu2 %1928 }
 0x4b4   : > { %v1960_v46 = vsel %vm1958_vm12, %v1955_v39, %v1929_v63  ;;  %v2041_v63 = vrot.slane %v3573_v58, 3 }
 0x4bb   : > { %v1917_v19 = vpop.permute.xlu2 %1916 }
 0x4bc   : > { %v1957_v44 = vsel %vm1247_vm7, %v4697_v41, %v1917_v19 }
 0x4c3   : > { %v1949_v47 = vpop.permute.xlu2 %1948 }
 0x4d3   : > { %v3567_v3 = vpop.permute.xlu1 %3566 }
 0x4d4   : > { %v3569_v10 = vunpack.i.h.bf16 %v3567_v3  ;;  %v3568_v11 = vunpack.i.l.bf16 %v3567_v3 }
 0x4d6   : > { %v1964_v12 = vsel %vm1963_vm13, %v1959_v5, %v3569_v10  ;;  %v1966_v42 = vsel %vm1963_vm13, %v1961_v59, %v3568_v11 }
 0x4d7   : > { %v1968_v14 = vpack.c.bf16 %v1964_v12, %v1964_v12  ;;  %v1970_v15 = vpack.c.bf16 %v1966_v42, %v1966_v42 }
 0x4d9   : > { %v1983_v20 = vrot.slane %v1968_v14, 3  ;;  %v1985_v8 = vrot.slane %v1970_v15, 3  ;;  %v1945_v31 = vpop.permute.xlu0 %1944 }
 0x4da   : > { %v1965_v29 = vsel %vm1963_vm13, %v1960_v46, %v1945_v31 }
 0x4db   : > { %v1989_v52 = vsel %vm941_vm2, %v1968_v14, %v1983_v20  ;;  %v1991_v21 = vsel %vm946_vm3, %v1968_v14, %v1983_v20  ;;  %v1994_v7 = vsel %vm950_vm4, %v1968_v14, %v1983_v20  ;;  %v1997_v23 = vsel %vm954_vm5, %v1968_v14, %v1983_v20  ;;  %v3662_v20 = vld [vmem:[#allocation2] sm:$0xff] }
 0x4dc   : > { %v1993_v6 = vrot.slane %v1991_v21, 1  ;;  %v1996_v27 = vrot.slane %v1994_v7, 2  ;;  %v1999_v30 = vrot.slane %v1997_v23, 3  ;;  %v2006_v17 = vsel %vm941_vm2, %v1970_v15, %v1985_v8  ;;  %2056 = vst [vmem:[#allocation1] ss:$9 sm:$0xff] %v1989_v52 }
 0x4dd   : > { %v2008_v33 = vsel %vm946_vm3, %v1970_v15, %v1985_v8  ;;  %v2011_v2 = vsel %vm950_vm4, %v1970_v15, %v1985_v8  ;;  %v2031_v34 = vunpack.i.h.s16 %v2006_v17  ;;  %v1969_v13 = vpack.c.bf16 %v1965_v29, %v1965_v29 }
 0x4de   : > { %v2010_v28 = vrot.slane %v2008_v33, 1  ;;  %v2013_v35 = vrot.slane %v2011_v2, 2  ;;  %2059 = vst [vmem:[#allocation1 + $0x1] ss:$9 sm:$0xff] %v1993_v6  ;;  %v2014_v45 = vsel %vm954_vm5, %v1970_v15, %v1985_v8 }
 0x4df   : > { %2062 = vst [vmem:[#allocation1 + $0x2] ss:$9 sm:$0xff] %v1996_v27  ;;  %v1984_v37 = vrot.slane %v1969_v13, 3  ;;  %v2016_v18 = vrot.slane %v2014_v45, 3 }
 0x4e0   : > { %v2033_v38 = vunpack.i.h.s16 %v2010_v28  ;;  %v3349_v49 = vpack.i.b16 %v2010_v28, %v2031_v34  ;;  %2065 = vst [vmem:[#allocation1 + $0x3] ss:$9 sm:$0xff] %v1999_v30  ;;  %v2035_v40 = vunpack.i.h.s16 %v2013_v35 }
 0x4e1   : > { %v2002_v26 = vsel %vm941_vm2, %v1969_v13, %v1984_v37  ;;  %v1933_v61 = vpop.permute.xlu0 %1932  ;;  %v2037_v54 = vunpack.i.h.s16 %v2016_v18 }
 0x4e2   : > { %v3350_v36 = vpack.i.b16 %v2013_v35, %v2033_v38  ;;  %2071 = vst [vmem:[#allocation1 + $0x5] ss:$9 sm:$0xff] %v3349_v49  ;;  %v3348_v16 = vpack.i.b16 %v2006_v17, %v2002_v26  ;;  %v3351_v53 = vpack.i.b16 %v2016_v18, %v2035_v40  ;;  %v1962_v55 = vsel %vm1958_vm12, %v1957_v44, %v1933_v61  ;;  %v3663_v35 = vld [vmem:[#allocation2 + $0x10] sm:$0xff]  ;;  %v3664_v18 = vld [vmem:[#allocation2 + $0x8] sm:$0x1] }
 0x4e3   : > { %v1967_v48 = vsel %vm1963_vm13, %v1962_v55, %v1949_v47  ;;  %v3665_v61 = vld [vmem:[#allocation2 + $0x18] sm:$0x1] }
 0x4e4   : > { %2074 = vst [vmem:[#allocation1 + $0x6] ss:$9 sm:$0xff] %v3350_v36  ;;  %v1971_v50 = vpack.c.bf16 %v1967_v48, %v1967_v48 }
 0x4e5   : > { %2068 = vst [vmem:[#allocation1 + $0x4] ss:$9 sm:$0xff] %v3348_v16 }
 0x4e6   : > { %2077 = vst [vmem:[#allocation1 + $0x7] ss:$9 sm:$0xff] %v3351_v53  ;;  %v1986_v25 = vrot.slane %v1971_v50, 3 }
 0x4e8   : > { %v2019_v41 = vsel %vm941_vm2, %v1971_v50, %v1986_v25  ;;  %v4024_v50 = vmov 32.0  }
 0x4e9   : > { %v3352_v56 = vpack.i.b16 %v2019_v41, %v2037_v54  ;;  %3644 = vrcp.f32 %v4024_v50  ;;  %v3425_v50 = vld [vmem:[%s4306_s17] sm:$0xff] }
 0x4ed   : > { %v2078_v57 = vld [vmem:[#allocation1] sm:$0xff] }
 0x4ee   : > { %2080 = vst [vmem:[#allocation1] ss:$9 sm:$0xff] %v3352_v56  ;;  %3361 = vmatmul.msk.bf16.vlgmr.msra.gmra.mxu1 %vm1083_vm6, %v2078_v57 }
 0x4ef   : > { %v3645_v25 = vpop.eup %3644 }
 0x4f0   : > { %v2216_v54 = vmul.f32 32.0, %v3645_v25  ;;  %vm2220_vm15 = vweird.f32 %v3645_v25 }
 0x4f2   : > { %v2217_v41 = vsub.f32 1.0, %v2216_v54 }
 0x4f4   : > { %v2218_v56 = vmul.f32 %v3645_v25, %v2217_v41 }
 0x4f5   : > { %v2081_v22 = vld [vmem:[#allocation1] sm:$0xff] }
 0x4f6   : > { %2094 = vst [vmem:[#allocation1] ss:$9 sm:$0xff] %v3573_v58  ;;  %v2219_v57 = vadd.f32 %v3645_v25, %v2218_v56 }
 0x4f7   : > { %2096 = vst [vmem:[#allocation1 + $0x1] ss:$9 sm:$0xff] %v2039_v60 }
 0x4f8   : > { %2098 = vst [vmem:[#allocation1 + $0x2] ss:$9 sm:$0xff] %v2040_v32 }
 0x4f9   : > { %2100 = vst [vmem:[#allocation1 + $0x3] ss:$9 sm:$0xff] %v2041_v63 }
 0x4fa   : > { %2102 = vst [vmem:[#allocation1 + $0x4] ss:$9 sm:$0xff] %v2042_v0 }
 0x4fb   : > { %2104 = vst [vmem:[#allocation1 + $0x5] ss:$9 sm:$0xff] %v2043_v24 }
 0x4fc   : > { %2106 = vst [vmem:[#allocation1 + $0x6] ss:$9 sm:$0xff] %v2044_v1 }
 0x4fd   : > { %2108 = vst [vmem:[#allocation1 + $0x7] ss:$9 sm:$0xff] %v2045_v51 }
 0x4fe   : > { %3362 = vmatmul.msk.bf16.gmra.mxu1 %vm1083_vm6, %v2081_v22 }
 0x504   : > { %v2109_v43 = vld [vmem:[#allocation1] sm:$0xff] }
 0x505   : > { %2110 = vst [vmem:[#allocation1] ss:$9 sm:$0xff] %v3573_v58 }
 0x506   : > { %2111 = vst [vmem:[#allocation1 + $0x1] ss:$9 sm:$0xff] %v3573_v58 }
 0x507   : > { %2112 = vst [vmem:[#allocation1 + $0x2] ss:$9 sm:$0xff] %v2039_v60  ;;  %v4759_v60 = vsel %vm2220_vm15, %v3645_v25, %v2219_v57 }
 0x508   : > { %2113 = vst [vmem:[#allocation1 + $0x3] ss:$9 sm:$0xff] %v2040_v32 }
 0x509   : > { %2114 = vst [vmem:[#allocation1 + $0x4] ss:$9 sm:$0xff] %v2041_v63 }
 0x50a   : > { %2115 = vst [vmem:[#allocation1 + $0x5] ss:$9 sm:$0xff] %v2042_v0 }
 0x50b   : > { %2116 = vst [vmem:[#allocation1 + $0x6] ss:$9 sm:$0xff] %v2043_v24 }
 0x50c   : > { %2117 = vst [vmem:[#allocation1 + $0x7] ss:$9 sm:$0xff] %v2044_v1 }
 0x513   : > { %v2118_v3 = vld [vmem:[#allocation1] sm:$0xff] }
 0x514   : > { %2119 = vst [vmem:[#allocation1] ss:$9 sm:$0xff] %v2045_v51 }
 0x515   : > { %2120 = vst [vmem:[#allocation1 + $0x1] ss:$9 sm:$0xff] %v3573_v58 }
 0x51c   : > { %v2121_v4 = vld [vmem:[#allocation1] sm:$0xff] }
 0x56b   : > { %v2138_v62 = vpop.f32.mrf.mxu1 }
 0x56c   : > { %v2139_v9 = vadd.f32 %v2138_v62, %v2109_v43 }
 0x56e   : > { %v2150_v10 = vrot.slane %v2139_v9, 1  ;;  %v2151_v11 = vrot.slane %v2139_v9, 2  ;;  %v2152_v5 = vrot.slane %v2139_v9, 3  ;;  %2165 = vst [vmem:[#allocation1] ss:$9 sm:$0xff] %v2139_v9  ;;  %v2153_v59 = vrot.slane %v2139_v9, 4 }
 0x56f   : > { %v2154_v12 = vrot.slane %v2139_v9, 5  ;;  %v2155_v42 = vrot.slane %v2139_v9, 6  ;;  %v2156_v14 = vrot.slane %v2139_v9, 7 }
 0x570   : > { %2167 = vst [vmem:[#allocation1 + $0x1] ss:$9 sm:$0xff] %v2150_v10 }
 0x571   : > { %2169 = vst [vmem:[#allocation1 + $0x2] ss:$9 sm:$0xff] %v2151_v11 }
 0x572   : > { %2171 = vst [vmem:[#allocation1 + $0x3] ss:$9 sm:$0xff] %v2152_v5 }
 0x573   : > { %2173 = vst [vmem:[#allocation1 + $0x4] ss:$9 sm:$0xff] %v2153_v59  ;;  %v2140_v15 = vpop.f32.mrf.mxu1 }
 0x574   : > { %2175 = vst [vmem:[#allocation1 + $0x5] ss:$9 sm:$0xff] %v2154_v12  ;;  %v2141_v19 = vadd.f32 %v2140_v15, %v2118_v3 }
 0x575   : > { %2177 = vst [vmem:[#allocation1 + $0x6] ss:$9 sm:$0xff] %v2155_v42 }
 0x576   : > { %2179 = vst [vmem:[#allocation1 + $0x7] ss:$9 sm:$0xff] %v2156_v14  ;;  %v2157_v52 = vrot.slane %v2141_v19, 1  ;;  %v2158_v7 = vrot.slane %v2141_v19, 2  ;;  %v2159_v6 = vrot.slane %v2141_v19, 3  ;;  %v2160_v27 = vrot.slane %v2141_v19, 4 }
 0x577   : > { %v2161_v30 = vrot.slane %v2141_v19, 5  ;;  %v2162_v33 = vrot.slane %v2141_v19, 6  ;;  %v2163_v2 = vrot.slane %v2141_v19, 7 }
 0x57b   : > { %v2143_v39 = vpop.f32.mrf.mxu1 }
 0x57c   : > { %v2144_v34 = vadd.f32 %v2143_v39, %v2121_v4  ;;  %v4772_v39 = vld [vmem:[%s5014_s28] ss:$0 sm:$0xff] }
 0x57d   : > { %v2180_v46 = vld [vmem:[#allocation1] sm:$0xff] }
 0x57e   : > { %2181 = vst [vmem:[#allocation1] ss:$9 sm:$0xff] %v2141_v19  ;;  %v4731_v8 = vadd.f32 %v3662_v20, %v2180_v46  ;;  %v2164_v13 = vrot.slane %v2144_v34, 1 }
 0x580   : > { %v2202_v31 = vsel %vm1083_vm6, %v4731_v8, 0.0  ;;  %v2226_v21 = vmul.f32 %v4731_v8, %v4731_v8 }
 0x581   : > { %2203 = vadd.xlane.f32.xlu2 %v2202_v31  ;;  %v4779_v31 = vld [vmem:[%s5015_s23] ss:$0 sm:$0xff] }
 0x582   : > { %v2230_v17 = vsel %vm1083_vm6, %v2226_v21, 0.0 }
 0x583   : > { %v2145_v29 = vpop.f32.mrf.mxu1 }
 0x585   : > { %v2182_v23 = vld [vmem:[#allocation1] sm:$0xff] }
 0x586   : > { %2183 = vst [vmem:[#allocation1] ss:$9 sm:$0xff] %v2157_v52  ;;  %v4745_v40 = vadd.f32 %v3664_v18, %v2182_v23 }
 0x587   : > { %2184 = vst [vmem:[#allocation1 + $0x1] ss:$9 sm:$0xff] %v2158_v7 }
 0x588   : > { %2185 = vst [vmem:[#allocation1 + $0x2] ss:$9 sm:$0xff] %v2159_v6  ;;  %v2227_v26 = vmul.f32 %v4745_v40, %v4745_v40  ;;  %v2206_v36 = vsel %vm2205_vm14, %v4745_v40, 0.0 }
 0x589   : > { %2186 = vst [vmem:[#allocation1 + $0x3] ss:$9 sm:$0xff] %v2160_v27  ;;  %2231 = vadd.xlane.f32.xlu2 %v2230_v17 }
 0x58a   : > { %2187 = vst [vmem:[#allocation1 + $0x4] ss:$9 sm:$0xff] %v2161_v30  ;;  %v2233_v53 = vsel %vm2205_vm14, %v2227_v26, 0.0 }
 0x58b   : > { %2188 = vst [vmem:[#allocation1 + $0x5] ss:$9 sm:$0xff] %v2162_v33 }
 0x58c   : > { %2189 = vst [vmem:[#allocation1 + $0x6] ss:$9 sm:$0xff] %v2163_v2 }
 0x58d   : > { %2190 = vst [vmem:[#allocation1 + $0x7] ss:$9 sm:$0xff] %v2144_v34 }
 0x594   : > { %v2191_v28 = vld [vmem:[#allocation1] sm:$0xff] }
 0x595   : > { %2192 = vst [vmem:[#allocation1] ss:$9 sm:$0xff] %v2164_v13  ;;  %v4738_v45 = vadd.f32 %v3663_v35, %v2191_v28  ;;  %v3426_v28 = vld [vmem:[%s4306_s17 + $0x8] sm:$0xff]  ;;  %s5016_s17 = scalar_lea.vmem [#allocation11], %s4258_s27 }
 0x596   : > { %2489 = vmatpush.bf16.msra.mxu2 %v3426_v28 }
 0x597   : > { %v2209_v37 = vsel %vm1083_vm6, %v4738_v45, 0.0  ;;  %v2228_v38 = vmul.f32 %v4738_v45, %v4738_v45 }
 0x598   : > { %2210 = vadd.xlane.f32.xlu1 %v2209_v37 }
 0x599   : > { %v2236_v49 = vsel %vm1083_vm6, %v2228_v38, 0.0 }
 0x59a   : > { %2237 = vadd.xlane.f32.xlu0 %v2236_v49  ;;  %2490 = vmatpush.bf16.msra.mxu2 %v3425_v50 }
 0x59c   : > { %v2193_v44 = vld [vmem:[#allocation1] sm:$0xff] }
 0x59d   : > { %v4749_v47 = vadd.f32 %v3665_v61, %v2193_v44 }
 0x59f   : > { %v2229_v16 = vmul.f32 %v4749_v47, %v4749_v47  ;;  %v2212_v48 = vsel %vm2205_vm14, %v4749_v47, 0.0 }
 0x5a0   : > { %2207 = vadd.xlane.f32.xlu1 %v2206_v36 }
 0x5a1   : > { %v2239_v55 = vsel %vm2205_vm14, %v2229_v16, 0.0 }
 0x5a2   : > { %2234 = vadd.xlane.f32.xlu0 %v2233_v53  ;;  %2240 = vadd.xlane.f32.xlu2 %v2239_v55 }
 0x5a8   : > { %2213 = vadd.xlane.f32.xlu1 %v2212_v48 }
 0x5f4   : > { %v2204_v58 = vpop.xlane.xlu2 %2203 }
 0x5f5   : > { %v2222_v32 = vmul.f32 %v4759_v60, %v2204_v58 }
 0x5f7   : > { %v2246_v22 = vmul.f32 %v2222_v32, %v2222_v32  ;;  %v2254_v15 = vsub.f32 %v4731_v8, %v2222_v32 }
 0x5fc   : > { %v2232_v63 = vpop.xlane.xlu2 %2231 }
 0x5fd   : > { %v2242_v0 = vmul.f32 %v2232_v63, %v4759_v60 }
 0x5ff   : > { %v2250_v24 = vsub.f32 %v2242_v0, %v2246_v22 }
 0x601   : > { %v2258_v1 = vadd.f32 1e-05, %v2250_v24 }
 0x603   : > { %3646 = vrsqrt.f32 %v2258_v1  ;;  %vm2268_vm1 = vweird.f32 %v2258_v1 }
 0x609   : > { %v3647_v51 = vpop.eup %3646 }
 0x60a   : > { %v2263_v43 = vmul.f32 %v3647_v51, %v2258_v1  ;;  %vm2269_vm0 = vweird.f32 %v3647_v51 }
 0x60b   : > { %v2211_v3 = vpop.xlane.xlu1 %2210  ;;  %vm2270_vm7 = vmor %vm2268_vm1, %vm2269_vm0 }
 0x60c   : > { %v2264_v4 = vmul.f32 %v3647_v51, %v2263_v43  ;;  %v4764_v62 = vmul.f32 %v4759_v60, %v2211_v3 }
 0x60d   : > { %v2238_v9 = vpop.xlane.xlu0 %2237 }
 0x60e   : > { %v2265_v10 = vmul.f32 0.5, %v2264_v4  ;;  %v2248_v11 = vmul.f32 %v4764_v62, %v4764_v62  ;;  %v2244_v5 = vmul.f32 %v2238_v9, %v4759_v60  ;;  %v2256_v58 = vsub.f32 %v4738_v45, %v4764_v62 }
 0x610   : > { %v2266_v59 = vsub.f32 1.5, %v2265_v10  ;;  %v2252_v12 = vsub.f32 %v2244_v5, %v2248_v11 }
 0x612   : > { %v2267_v42 = vmul.f32 %v3647_v51, %v2266_v59  ;;  %v2260_v14 = vadd.f32 1e-05, %v2252_v12 }
 0x613   : > { %v2208_v19 = vpop.xlane.xlu1 %2207 }
 0x614   : > { %v2271_v46 = vsel %vm2270_vm7, %v3647_v51, %v2267_v42  ;;  %3648 = vrsqrt.f32 %v2260_v14  ;;  %v4775_v20 = vmul.f32 %v4759_v60, %v2208_v19  ;;  %vm2288_vm9 = vweird.f32 %v2260_v14 }
 0x615   : > { %v2302_v29 = vmul.f32 %v2271_v46, %v2254_v15  ;;  %v2235_v52 = vpop.xlane.xlu0 %2234  ;;  %v2241_v2 = vpop.xlane.xlu2 %2240 }
 0x616   : > { %v2247_v21 = vmul.f32 %v4775_v20, %v4775_v20  ;;  %v2243_v8 = vmul.f32 %v2235_v52, %v4759_v60  ;;  %v2245_v38 = vmul.f32 %v2241_v2, %v4759_v60  ;;  %v2255_v4 = vsub.f32 %v4745_v40, %v4775_v20 }
 0x617   : > { %v2310_v7 = vmul.f32 %v4772_v39, %v2302_v29 }
 0x618   : > { %v2251_v23 = vsub.f32 %v2243_v8, %v2247_v21 }
 0x619   : > { %v4786_v6 = vadd.f32 %v4779_v31, %v2310_v7 }
 0x61a   : > { %v3649_v27 = vpop.eup %3648  ;;  %v2259_v30 = vadd.f32 1e-05, %v2251_v23 }
 0x61b   : > { %v2322_v17 = vpack.c.bf16 %v4786_v6, %v4786_v6  ;;  %v2283_v33 = vmul.f32 %v3649_v27, %v2260_v14  ;;  %v2214_v34 = vpop.xlane.xlu1 %2213  ;;  %vm2289_vm8 = vweird.f32 %v3649_v27 }
 0x61c   : > { %3650 = vrsqrt.f32 %v2259_v30  ;;  %v4791_v13 = vmul.f32 %v4759_v60, %v2214_v34  ;;  %vm2290_vm10 = vmor %vm2288_vm9, %vm2289_vm8  ;;  %vm2278_vm12 = vweird.f32 %v2259_v30 }
 0x61d   : > { %v2337_v35 = vrot.slane %v2322_v17, 3  ;;  %v2284_v37 = vmul.f32 %v3649_v27, %v2283_v33 }
 0x61e   : > { %v2249_v49 = vmul.f32 %v4791_v13, %v4791_v13  ;;  %v2257_v34 = vsub.f32 %v4749_v47, %v4791_v13 }
 0x61f   : > { %v2343_v18 = vsel %vm941_vm2, %v2322_v17, %v2337_v35  ;;  %v2345_v44 = vsel %vm946_vm3, %v2322_v17, %v2337_v35  ;;  %v2348_v26 = vsel %vm950_vm4, %v2322_v17, %v2337_v35  ;;  %v2351_v61 = vsel %vm954_vm5, %v2322_v17, %v2337_v35 }
 0x620   : > { %v2347_v36 = vrot.slane %v2345_v44, 1  ;;  %v2350_v16 = vrot.slane %v2348_v26, 2  ;;  %v2353_v53 = vrot.slane %v2351_v61, 3  ;;  %2410 = vst [vmem:[#allocation1] ss:$9 sm:$0xff] %v2343_v18  ;;  %v2285_v55 = vmul.f32 0.5, %v2284_v37 }
 0x621   : > { %v2253_v48 = vsub.f32 %v2245_v38, %v2249_v49 }
 0x622   : > { %v3651_v25 = vpop.eup %3650  ;;  %2413 = vst [vmem:[#allocation1 + $0x1] ss:$9 sm:$0xff] %v2347_v36  ;;  %v2286_v54 = vsub.f32 1.5, %v2285_v55 }
 0x623   : > { %2416 = vst [vmem:[#allocation1 + $0x2] ss:$9 sm:$0xff] %v2350_v16  ;;  %v2273_v41 = vmul.f32 %v3651_v25, %v2259_v30  ;;  %v2261_v56 = vadd.f32 1e-05, %v2253_v48  ;;  %vm2279_vm11 = vweird.f32 %v3651_v25  ;;  %v3576_v16 = vld [vmem:[%s5016_s17] ss:$0 sm:$0xff] }
 0x624   : > { %2419 = vst [vmem:[#allocation1 + $0x3] ss:$9 sm:$0xff] %v2353_v53  ;;  %v2287_v57 = vmul.f32 %v3649_v27, %v2286_v54  ;;  %vm2280_vm13 = vmor %vm2278_vm12, %vm2279_vm11  ;;  %v2393_v53 = vrot.slane %v3576_v16, 1  ;;  %v2395_v55 = vrot.slane %v3576_v16, 3  ;;  %v2397_v50 = vrot.slane %v3576_v16, 5 }
 0x625   : > { %v2274_v32 = vmul.f32 %v3651_v25, %v2273_v41  ;;  %3652 = vrsqrt.f32 %v2261_v56  ;;  %vm2298_vm0 = vweird.f32 %v2261_v56  ;;  %v2399_v54 = vrot.slane %v3576_v16, 7 }
 0x626   : > { %v2291_v63 = vsel %vm2290_vm10, %v3649_v27, %v2287_v57 }
 0x627   : > { %v2304_v22 = vmul.f32 %v2291_v63, %v2256_v58  ;;  %v2275_v0 = vmul.f32 0.5, %v2274_v32 }
 0x629   : > { %v2312_v24 = vmul.f32 %v4772_v39, %v2304_v22  ;;  %v2276_v1 = vsub.f32 1.5, %v2275_v0 }
 0x62b   : > { %v3653_v51 = vpop.eup %3652  ;;  %v4806_v43 = vadd.f32 %v4779_v31, %v2312_v24  ;;  %v2277_v3 = vmul.f32 %v3651_v25, %v2276_v1 }
 0x62c   : > { %v2293_v45 = vmul.f32 %v3653_v51, %v2261_v56  ;;  %vm2299_vm15 = vweird.f32 %v3653_v51 }
 0x62d   : > { %v2324_v62 = vpack.c.bf16 %v4806_v43, %v4806_v43  ;;  %v2281_v9 = vsel %vm2280_vm13, %v3651_v25, %v2277_v3  ;;  %vm2300_vm1 = vmor %vm2298_vm0, %vm2299_vm15  ;;  %v2398_v25 = vrot.slane %v3576_v16, 6 }
 0x62e   : > { %v2303_v10 = vmul.f32 %v2281_v9, %v2255_v4  ;;  %v2294_v11 = vmul.f32 %v3653_v51, %v2293_v45 }
 0x62f   : > { %v2339_v5 = vrot.slane %v2324_v62, 3 }
 0x630   : > { %v2311_v59 = vmul.f32 %v4772_v39, %v2303_v10  ;;  %v2295_v12 = vmul.f32 0.5, %v2294_v11 }
 0x631   : > { %v2360_v42 = vsel %vm941_vm2, %v2324_v62, %v2339_v5  ;;  %v2362_v14 = vsel %vm946_vm3, %v2324_v62, %v2339_v5  ;;  %v2365_v15 = vsel %vm950_vm4, %v2324_v62, %v2339_v5  ;;  %v2368_v40 = vsel %vm954_vm5, %v2324_v62, %v2339_v5 }
 0x632   : > { %v4818_v19 = vadd.f32 %v4779_v31, %v2311_v59  ;;  %v2364_v46 = vrot.slane %v2362_v14, 1  ;;  %v2385_v20 = vunpack.i.h.s16 %v2360_v42  ;;  %v2367_v29 = vrot.slane %v2365_v15, 2 }
 0x633   : > { %v2370_v52 = vrot.slane %v2368_v40, 3  ;;  %v2296_v21 = vsub.f32 1.5, %v2295_v12  ;;  %v3429_v40 = vld [vmem:[%s4311_s14 + $0x10] sm:$0xff] }
 0x634   : > { %v2323_v8 = vpack.c.bf16 %v4818_v19, %v4818_v19  ;;  %v3364_v7 = vpack.i.b16 %v2364_v46, %v2385_v20  ;;  %v2387_v23 = vunpack.i.h.s16 %v2364_v46  ;;  %v2389_v27 = vunpack.i.h.s16 %v2367_v29 }
 0x635   : > { %v2297_v30 = vmul.f32 %v3653_v51, %v2296_v21  ;;  %v2391_v47 = vunpack.i.h.s16 %v2370_v52 }
 0x636   : > { %v2338_v17 = vrot.slane %v2323_v8, 3  ;;  %2425 = vst [vmem:[#allocation1 + $0x5] ss:$9 sm:$0xff] %v3364_v7  ;;  %v3365_v33 = vpack.i.b16 %v2367_v29, %v2387_v23  ;;  %v3366_v2 = vpack.i.b16 %v2370_v52, %v2389_v27  ;;  %v3428_v29 = vld [vmem:[%s4311_s14 + $0x8] sm:$0xff]  ;;  %v3427_v7 = vld [vmem:[%s4311_s14] sm:$0xff] }
 0x637   : > { %v2301_v28 = vsel %vm2300_vm1, %v3653_v51, %v2297_v30 }
 0x638   : > { %v2356_v35 = vsel %vm941_vm2, %v2323_v8, %v2338_v17  ;;  %2428 = vst [vmem:[#allocation1 + $0x6] ss:$9 sm:$0xff] %v3365_v33  ;;  %v2305_v37 = vmul.f32 %v2301_v28, %v2257_v34 }
 0x639   : > { %v3363_v38 = vpack.i.b16 %v2360_v42, %v2356_v35  ;;  %2431 = vst [vmem:[#allocation1 + $0x7] ss:$9 sm:$0xff] %v3366_v2  ;;  %v3430_v42 = vld [vmem:[%s4311_s14 + $0x18] sm:$0xff]  ;;  %s5017_s14 = scalar_lea.vmem [#allocation12], %s4258_s27 }
 0x63a   : > { %v2313_v49 = vmul.f32 %v4772_v39, %v2305_v37  ;;  %v2394_v39 = vrot.slane %v3576_v16, 2  ;;  %2785 = vmatpush.bf16.msra.mxu3 %v3430_v42 }
 0x63b   : > { %2422 = vst [vmem:[#allocation1 + $0x4] ss:$9 sm:$0xff] %v3363_v38 }
 0x63c   : > { %v4827_v18 = vadd.f32 %v4779_v31, %v2313_v49  ;;  %v2396_v31 = vrot.slane %v3576_v16, 4 }
 0x63e   : > { %v2325_v44 = vpack.c.bf16 %v4827_v18, %v4827_v18  ;;  %2786 = vmatpush.bf16.msra.mxu3 %v3429_v40 }
 0x640   : > { %v2340_v26 = vrot.slane %v2325_v44, 3 }
 0x642   : > { %v2432_v13 = vld [vmem:[#allocation1] sm:$0xff]  ;;  %v2373_v61 = vsel %vm941_vm2, %v2325_v44, %v2340_v26  ;;  %2787 = vmatpush.bf16.msra.mxu3 %v3428_v29 }
 0x643   : > { %v3367_v36 = vpack.i.b16 %v2373_v61, %v2391_v47  ;;  %3376 = vmatmul.msk.bf16.vlgmr.msra.gmra.mxu2 %vm1083_vm6, %v2432_v13 }
 0x645   : > { %2434 = vst [vmem:[#allocation1] ss:$9 sm:$0xff] %v3367_v36 }
 0x646   : > { %2788 = vmatpush.bf16.msra.mxu3 %v3427_v7 }
 0x64c   : > { %v2435_v48 = vld [vmem:[#allocation1] sm:$0xff] }
 0x64d   : > { %2448 = vst [vmem:[#allocation1] ss:$9 sm:$0xff] %v3576_v16 }
 0x64e   : > { %2450 = vst [vmem:[#allocation1 + $0x1] ss:$9 sm:$0xff] %v2393_v53 }
 0x64f   : > { %2452 = vst [vmem:[#allocation1 + $0x2] ss:$9 sm:$0xff] %v2394_v39 }
 0x650   : > { %2454 = vst [vmem:[#allocation1 + $0x3] ss:$9 sm:$0xff] %v2395_v55 }
 0x651   : > { %2456 = vst [vmem:[#allocation1 + $0x4] ss:$9 sm:$0xff] %v2396_v31 }
 0x652   : > { %2458 = vst [vmem:[#allocation1 + $0x5] ss:$9 sm:$0xff] %v2397_v50 }
 0x653   : > { %2460 = vst [vmem:[#allocation1 + $0x6] ss:$9 sm:$0xff] %v2398_v25  ;;  %3377 = vmatmul.msk.bf16.gmra.mxu2 %vm1083_vm6, %v2435_v48 }
 0x654   : > { %2462 = vst [vmem:[#allocation1 + $0x7] ss:$9 sm:$0xff] %v2399_v54 }
 0x65b   : > { %v2463_v41 = vld [vmem:[#allocation1] sm:$0xff] }
 0x65c   : > { %2464 = vst [vmem:[#allocation1] ss:$9 sm:$0xff] %v3576_v16 }
 0x65d   : > { %2465 = vst [vmem:[#allocation1 + $0x1] ss:$9 sm:$0xff] %v3576_v16 }
 0x65e   : > { %2466 = vst [vmem:[#allocation1 + $0x2] ss:$9 sm:$0xff] %v2393_v53 }
 0x65f   : > { %2467 = vst [vmem:[#allocation1 + $0x3] ss:$9 sm:$0xff] %v2394_v39 }
 0x660   : > { %2468 = vst [vmem:[#allocation1 + $0x4] ss:$9 sm:$0xff] %v2395_v55 }
 0x661   : > { %2469 = vst [vmem:[#allocation1 + $0x5] ss:$9 sm:$0xff] %v2396_v31 }
 0x662   : > { %2470 = vst [vmem:[#allocation1 + $0x6] ss:$9 sm:$0xff] %v2397_v50 }
 0x663   : > { %2471 = vst [vmem:[#allocation1 + $0x7] ss:$9 sm:$0xff] %v2398_v25 }
 0x66a   : > { %v2472_v56 = vld [vmem:[#allocation1] sm:$0xff] }
 0x66b   : > { %2473 = vst [vmem:[#allocation1] ss:$9 sm:$0xff] %v2399_v54 }
 0x66c   : > { %2474 = vst [vmem:[#allocation1 + $0x1] ss:$9 sm:$0xff] %v3576_v16 }
 0x673   : > { %v2475_v32 = vld [vmem:[#allocation1] sm:$0xff] }
 0x6c6   : > { %v2492_v57 = vpop.f32.mrf.mxu2 }
 0x6c7   : > { %v2493_v58 = vadd.f32 %v2492_v57, %v2463_v41 }
 0x6c9   : > { %v2504_v63 = vrot.slane %v2493_v58, 1  ;;  %v2505_v22 = vrot.slane %v2493_v58, 2  ;;  %v2506_v0 = vrot.slane %v2493_v58, 3  ;;  %v2507_v24 = vrot.slane %v2493_v58, 4 }
 0x6ca   : > { %v2508_v1 = vrot.slane %v2493_v58, 5  ;;  %v2509_v51 = vrot.slane %v2493_v58, 6  ;;  %v2534_v3 = vmax.f32 %v2493_v58, 0.0  ;;  %v2510_v4 = vrot.slane %v2493_v58, 7 }
 0x6cb   : > { %v2535_v45 = vmax.f32 %v2504_v63, 0.0  ;;  %v2536_v62 = vmax.f32 %v2505_v22, 0.0  ;;  %v2537_v9 = vmax.f32 %v2506_v0, 0.0  ;;  %v2538_v10 = vmax.f32 %v2507_v24, 0.0 }
 0x6cc   : > { %2570 = vst [vmem:[#allocation1] ss:$9 sm:$0xff] %v2534_v3  ;;  %v2539_v11 = vmax.f32 %v2508_v1, 0.0  ;;  %v2540_v5 = vmax.f32 %v2509_v51, 0.0  ;;  %v2541_v12 = vmax.f32 %v2510_v4, 0.0 }
 0x6cd   : > { %2572 = vst [vmem:[#allocation1 + $0x1] ss:$9 sm:$0xff] %v2535_v45 }
 0x6ce   : > { %2574 = vst [vmem:[#allocation1 + $0x2] ss:$9 sm:$0xff] %v2536_v62  ;;  %v2494_v59 = vpop.f32.mrf.mxu2 }
 0x6cf   : > { %2576 = vst [vmem:[#allocation1 + $0x3] ss:$9 sm:$0xff] %v2537_v9  ;;  %v2495_v14 = vadd.f32 %v2494_v59, %v2472_v56 }
 0x6d0   : > { %2578 = vst [vmem:[#allocation1 + $0x4] ss:$9 sm:$0xff] %v2538_v10 }
 0x6d1   : > { %2580 = vst [vmem:[#allocation1 + $0x5] ss:$9 sm:$0xff] %v2539_v11  ;;  %v2542_v46 = vmax.f32 %v2495_v14, 0.0  ;;  %v2511_v52 = vrot.slane %v2495_v14, 1  ;;  %v2512_v21 = vrot.slane %v2495_v14, 2  ;;  %v2513_v23 = vrot.slane %v2495_v14, 3 }
 0x6d2   : > { %2582 = vst [vmem:[#allocation1 + $0x6] ss:$9 sm:$0xff] %v2540_v5  ;;  %v2514_v27 = vrot.slane %v2495_v14, 4  ;;  %v2515_v30 = vrot.slane %v2495_v14, 5  ;;  %v2516_v33 = vrot.slane %v2495_v14, 6  ;;  %v2517_v28 = vrot.slane %v2495_v14, 7 }
 0x6d3   : > { %2584 = vst [vmem:[#allocation1 + $0x7] ss:$9 sm:$0xff] %v2541_v12  ;;  %v2543_v17 = vmax.f32 %v2511_v52, 0.0  ;;  %v2544_v2 = vmax.f32 %v2512_v21, 0.0  ;;  %v2545_v35 = vmax.f32 %v2513_v23, 0.0 }
 0x6d4   : > { %v2546_v37 = vmax.f32 %v2514_v27, 0.0  ;;  %v2547_v49 = vmax.f32 %v2515_v30, 0.0  ;;  %v2548_v44 = vmax.f32 %v2516_v33, 0.0  ;;  %v2549_v26 = vmax.f32 %v2517_v28, 0.0 }
 0x6d6   : > { %v2497_v15 = vpop.f32.mrf.mxu2 }
 0x6d7   : > { %v2498_v38 = vadd.f32 %v2497_v15, %v2475_v32 }
 0x6d9   : > { %v2550_v47 = vmax.f32 %v2498_v38, 0.0  ;;  %v2518_v13 = vrot.slane %v2498_v38, 1 }
 0x6da   : > { %v2585_v20 = vld [vmem:[#allocation1] sm:$0xff] }
 0x6db   : > { %2586 = vst [vmem:[#allocation1] ss:$9 sm:$0xff] %v2542_v46  ;;  %v2603_v61 = vpack.c.bf16 %v2585_v20, %v2585_v20  ;;  %v2551_v36 = vmax.f32 %v2518_v13, 0.0  ;;  %v3577_v20 = vld [vmem:[%s5017_s14] ss:$0 sm:$0xff] }
 0x6dc   : > { %v2678_v29 = vrot.slane %v3577_v20, 1  ;;  %v2679_v52 = vrot.slane %v3577_v20, 2  ;;  %v2681_v7 = vrot.slane %v3577_v20, 4  ;;  %v2682_v23 = vrot.slane %v3577_v20, 5 }
 0x6dd   : > { %v2622_v55 = vrot.slane %v2603_v61, 3  ;;  %v2683_v27 = vrot.slane %v3577_v20, 6  ;;  %v2684_v30 = vrot.slane %v3577_v20, 7 }
 0x6de   : > { %v2499_v8 = vpop.f32.mrf.mxu2 }
 0x6df   : > { %v2630_v50 = vsel %vm946_vm3, %v2603_v61, %v2622_v55  ;;  %v2633_v56 = vsel %vm950_vm4, %v2603_v61, %v2622_v55  ;;  %v2628_v63 = vsel %vm941_vm2, %v2603_v61, %v2622_v55  ;;  %v2636_v22 = vsel %vm954_vm5, %v2603_v61, %v2622_v55 }
 0x6e0   : > { %v2632_v1 = vrot.slane %v2630_v50, 1  ;;  %v2635_v45 = vrot.slane %v2633_v56, 2  ;;  %v2638_v9 = vrot.slane %v2636_v22, 3  ;;  %v2680_v8 = vrot.slane %v3577_v20, 3 }
 0x6e2   : > { %v2587_v34 = vld [vmem:[#allocation1] sm:$0xff] }
 0x6e3   : > { %2588 = vst [vmem:[#allocation1] ss:$9 sm:$0xff] %v2543_v17  ;;  %v2604_v53 = vpack.c.bf16 %v2587_v34, %v2587_v34 }
 0x6e4   : > { %2589 = vst [vmem:[#allocation1 + $0x1] ss:$9 sm:$0xff] %v2544_v2 }
 0x6e5   : > { %2590 = vst [vmem:[#allocation1 + $0x2] ss:$9 sm:$0xff] %v2545_v35  ;;  %v2623_v31 = vrot.slane %v2604_v53, 3 }
 0x6e6   : > { %2591 = vst [vmem:[#allocation1 + $0x3] ss:$9 sm:$0xff] %v2546_v37 }
 0x6e7   : > { %2592 = vst [vmem:[#allocation1 + $0x4] ss:$9 sm:$0xff] %v2547_v49  ;;  %v2641_v51 = vsel %vm941_vm2, %v2604_v53, %v2623_v31 }
 0x6e8   : > { %2593 = vst [vmem:[#allocation1 + $0x5] ss:$9 sm:$0xff] %v2548_v44 }
 0x6e9   : > { %2594 = vst [vmem:[#allocation1 + $0x6] ss:$9 sm:$0xff] %v2549_v26 }
 0x6ea   : > { %2595 = vst [vmem:[#allocation1 + $0x7] ss:$9 sm:$0xff] %v2550_v47 }
 0x6f1   : > { %v2596_v16 = vld [vmem:[#allocation1] sm:$0xff] }
 0x6f2   : > { %2597 = vst [vmem:[#allocation1] ss:$9 sm:$0xff] %v2551_v36  ;;  %v2605_v39 = vpack.c.bf16 %v2596_v16, %v2596_v16 }
 0x6f4   : > { %v2624_v48 = vrot.slane %v2605_v39, 3 }
 0x6f6   : > { %v2645_v25 = vsel %vm941_vm2, %v2605_v39, %v2624_v48  ;;  %v2647_v54 = vsel %vm946_vm3, %v2605_v39, %v2624_v48  ;;  %v2650_v41 = vsel %vm950_vm4, %v2605_v39, %v2624_v48  ;;  %v2653_v0 = vsel %vm954_vm5, %v2605_v39, %v2624_v48 }
 0x6f7   : > { %v2649_v57 = vrot.slane %v2647_v54, 1  ;;  %v2652_v58 = vrot.slane %v2650_v41, 2  ;;  %v2670_v32 = vunpack.i.h.s16 %v2645_v25  ;;  %v3378_v62 = vpack.i.b16 %v2645_v25, %v2641_v51 }
 0x6f8   : > { %v2655_v10 = vrot.slane %v2653_v0, 3  ;;  %vm2776_vm4 = vcmask 523264  }
 0x6f9   : > { %v2598_v24 = vld [vmem:[#allocation1] sm:$0xff]  ;;  %v2672_v3 = vunpack.i.h.s16 %v2649_v57  ;;  %v2674_v4 = vunpack.i.h.s16 %v2652_v58  ;;  %v3379_v11 = vpack.i.b16 %v2649_v57, %v2670_v32 }
 0x6fa   : > { %2695 = vst [vmem:[#allocation1] ss:$9 sm:$0xff] %v2628_v63  ;;  %v2606_v5 = vpack.c.bf16 %v2598_v24, %v2598_v24  ;;  %v2676_v15 = vunpack.i.h.s16 %v2655_v10 }
 0x6fb   : > { %2698 = vst [vmem:[#allocation1 + $0x1] ss:$9 sm:$0xff] %v2632_v1  ;;  %v3380_v59 = vpack.i.b16 %v2652_v58, %v2672_v3  ;;  %v3381_v12 = vpack.i.b16 %v2655_v10, %v2674_v4 }
 0x6fc   : > { %2701 = vst [vmem:[#allocation1 + $0x2] ss:$9 sm:$0xff] %v2635_v45  ;;  %v2625_v42 = vrot.slane %v2606_v5, 3 }
 0x6fd   : > { %2704 = vst [vmem:[#allocation1 + $0x3] ss:$9 sm:$0xff] %v2638_v9 }
 0x6fe   : > { %2707 = vst [vmem:[#allocation1 + $0x4] ss:$9 sm:$0xff] %v3378_v62  ;;  %v2658_v14 = vsel %vm941_vm2, %v2606_v5, %v2625_v42 }
 0x6ff   : > { %2710 = vst [vmem:[#allocation1 + $0x5] ss:$9 sm:$0xff] %v3379_v11  ;;  %v3382_v40 = vpack.i.b16 %v2658_v14, %v2676_v15 }
 0x700   : > { %2713 = vst [vmem:[#allocation1 + $0x6] ss:$9 sm:$0xff] %v3380_v59 }
 0x701   : > { %2716 = vst [vmem:[#allocation1 + $0x7] ss:$9 sm:$0xff] %v3381_v12 }
 0x708   : > { %v2717_v46 = vld [vmem:[#allocation1] sm:$0xff] }
 0x709   : > { %3399 = vmatmul.msk.bf16.vlgmr.msra.gmra.mxu3 %vm2776_vm4, %v2717_v46  ;;  %2719 = vst [vmem:[#allocation1] ss:$9 sm:$0xff] %v3382_v40 }
 0x710   : > { %v2720_v21 = vld [vmem:[#allocation1] sm:$0xff] }
 0x711   : > { %2745 = vst [vmem:[#allocation1] ss:$9 sm:$0xff] %v3577_v20 }
 0x712   : > { %2747 = vst [vmem:[#allocation1 + $0x1] ss:$9 sm:$0xff] %v2678_v29 }
 0x713   : > { %2749 = vst [vmem:[#allocation1 + $0x2] ss:$9 sm:$0xff] %v2679_v52 }
 0x714   : > { %2751 = vst [vmem:[#allocation1 + $0x3] ss:$9 sm:$0xff] %v2680_v8 }
 0x715   : > { %2753 = vst [vmem:[#allocation1 + $0x4] ss:$9 sm:$0xff] %v2681_v7 }
 0x716   : > { %2755 = vst [vmem:[#allocation1 + $0x5] ss:$9 sm:$0xff] %v2682_v23 }
 0x717   : > { %2757 = vst [vmem:[#allocation1 + $0x6] ss:$9 sm:$0xff] %v2683_v27 }
 0x718   : > { %2759 = vst [vmem:[#allocation1 + $0x7] ss:$9 sm:$0xff] %v2684_v30 }
 0x719   : > { %3400 = vmatmul.msk.bf16.gmra.mxu3 %vm2776_vm4, %v2720_v21 }
 0x71f   : > { %v2760_v17 = vld [vmem:[#allocation1] sm:$0xff] }
 0x720   : > { %2761 = vst [vmem:[#allocation1] ss:$9 sm:$0xff] %v3577_v20 }
 0x721   : > { %2762 = vst [vmem:[#allocation1 + $0x1] ss:$9 sm:$0xff] %v3577_v20 }
 0x722   : > { %2763 = vst [vmem:[#allocation1 + $0x2] ss:$9 sm:$0xff] %v2678_v29 }
 0x723   : > { %2764 = vst [vmem:[#allocation1 + $0x3] ss:$9 sm:$0xff] %v2679_v52 }
 0x724   : > { %2765 = vst [vmem:[#allocation1 + $0x4] ss:$9 sm:$0xff] %v2680_v8 }
 0x725   : > { %2766 = vst [vmem:[#allocation1 + $0x5] ss:$9 sm:$0xff] %v2681_v7 }
 0x726   : > { %2767 = vst [vmem:[#allocation1 + $0x6] ss:$9 sm:$0xff] %v2682_v23  ;;  %v4894_v23 = vld [vmem:[%s895_s20] ss:$0 sm:$0xff]  ;;  %s5020_s20 = sld [smem:[#allocation37_spill]] (!%p3401_p3) }
 0x727   : > { %2768 = vst [vmem:[#allocation1 + $0x7] ss:$9 sm:$0xff] %v2683_v27 }
 0x72e   : > { %v2769_v33 = vld [vmem:[#allocation1] sm:$0xff] }
 0x72f   : > { %2770 = vst [vmem:[#allocation1] ss:$9 sm:$0xff] %v2684_v30 }
 0x730   : > { %2771 = vst [vmem:[#allocation1 + $0x1] ss:$9 sm:$0xff] %v3577_v20 }
 0x737   : > { %v2772_v34 = vld [vmem:[#allocation1] sm:$0xff] }
 0x78c   : > { %v2790_v2 = vpop.f32.mrf.mxu3 }
 0x78d   : > { %v2791_v28 = vadd.f32 %v2790_v2, %v2760_v17  ;;  %v4898_v17 = vld [vmem:[%s5019_s26] ss:$0 sm:$0xff] }
 0x78f   : > { %v2802_v35 = vrot.slane %v2791_v28, 1  ;;  %v2803_v37 = vrot.slane %v2791_v28, 2  ;;  %v2804_v38 = vrot.slane %v2791_v28, 3  ;;  %2817 = vst [vmem:[#allocation1] ss:$9 sm:$0xff] %v2791_v28  ;;  %v2805_v49 = vrot.slane %v2791_v28, 4 }
 0x790   : > { %v2806_v44 = vrot.slane %v2791_v28, 5  ;;  %v2807_v26 = vrot.slane %v2791_v28, 6  ;;  %v2808_v47 = vrot.slane %v2791_v28, 7 }
 0x791   : > { %2819 = vst [vmem:[#allocation1 + $0x1] ss:$9 sm:$0xff] %v2802_v35 }
 0x792   : > { %2821 = vst [vmem:[#allocation1 + $0x2] ss:$9 sm:$0xff] %v2803_v37 }
 0x793   : > { %2823 = vst [vmem:[#allocation1 + $0x3] ss:$9 sm:$0xff] %v2804_v38 }
 0x794   : > { %v2792_v13 = vpop.f32.mrf.mxu3  ;;  %2825 = vst [vmem:[#allocation1 + $0x4] ss:$9 sm:$0xff] %v2805_v49 }
 0x795   : > { %2827 = vst [vmem:[#allocation1 + $0x5] ss:$9 sm:$0xff] %v2806_v44  ;;  %v2793_v36 = vadd.f32 %v2792_v13, %v2769_v33 }
 0x796   : > { %2829 = vst [vmem:[#allocation1 + $0x6] ss:$9 sm:$0xff] %v2807_v26 }
 0x797   : > { %2831 = vst [vmem:[#allocation1 + $0x7] ss:$9 sm:$0xff] %v2808_v47  ;;  %v2809_v50 = vrot.slane %v2793_v36, 1  ;;  %v2810_v25 = vrot.slane %v2793_v36, 2  ;;  %v2811_v41 = vrot.slane %v2793_v36, 3  ;;  %v2813_v57 = vrot.slane %v2793_v36, 5 }
 0x798   : > { %v2814_v58 = vrot.slane %v2793_v36, 6  ;;  %v2815_v32 = vrot.slane %v2793_v36, 7 }
 0x79c   : > { %v2795_v61 = vpop.f32.mrf.mxu3 }
 0x79d   : > { %v2796_v22 = vadd.f32 %v2795_v61, %v2772_v34 }
 0x79e   : > { %v2832_v16 = vld [vmem:[#allocation1] sm:$0xff] }
 0x79f   : > { %v4855_v53 = vadd.f32 %v2832_v16, %v4786_v6  ;;  %2833 = vst [vmem:[#allocation1] ss:$9 sm:$0xff] %v2793_v36  ;;  %v2812_v6 = vrot.slane %v2793_v36, 4  ;;  %v2816_v0 = vrot.slane %v2796_v22, 1 }
 0x7a1   : > { %v2854_v39 = vsel %vm1083_vm6, %v4855_v53, 0.0  ;;  %v2870_v55 = vmul.f32 %v4855_v53, %v4855_v53 }
 0x7a2   : > { %2855 = vadd.xlane.f32.xlu0 %v2854_v39 }
 0x7a3   : > { %v2874_v48 = vsel %vm1083_vm6, %v2870_v55, 0.0 }
 0x7a4   : > { %2875 = vadd.xlane.f32.xlu1 %v2874_v48  ;;  %v2797_v31 = vpop.f32.mrf.mxu3 }
 0x7a6   : > { %v2834_v54 = vld [vmem:[#allocation1] sm:$0xff] }
 0x7a7   : > { %v4863_v56 = vadd.f32 %v2834_v54, %v4818_v19  ;;  %2835 = vst [vmem:[#allocation1] ss:$9 sm:$0xff] %v2809_v50 }
 0x7a8   : > { %2836 = vst [vmem:[#allocation1 + $0x1] ss:$9 sm:$0xff] %v2810_v25 }
 0x7a9   : > { %2837 = vst [vmem:[#allocation1 + $0x2] ss:$9 sm:$0xff] %v2811_v41  ;;  %v2857_v63 = vsel %vm2205_vm14, %v4863_v56, 0.0  ;;  %v2871_v51 = vmul.f32 %v4863_v56, %v4863_v56 }
 0x7aa   : > { %2838 = vst [vmem:[#allocation1 + $0x3] ss:$9 sm:$0xff] %v2812_v6 }
 0x7ab   : > { %2839 = vst [vmem:[#allocation1 + $0x4] ss:$9 sm:$0xff] %v2813_v57  ;;  %v2877_v45 = vsel %vm2205_vm14, %v2871_v51, 0.0 }
 0x7ac   : > { %2858 = vadd.xlane.f32.xlu1 %v2857_v63  ;;  %2840 = vst [vmem:[#allocation1 + $0x5] ss:$9 sm:$0xff] %v2814_v58 }
 0x7ad   : > { %2841 = vst [vmem:[#allocation1 + $0x6] ss:$9 sm:$0xff] %v2815_v32 }
 0x7ae   : > { %2842 = vst [vmem:[#allocation1 + $0x7] ss:$9 sm:$0xff] %v2796_v22 }
 0x7b5   : > { %v2843_v19 = vld [vmem:[#allocation1] sm:$0xff] }
 0x7b6   : > { %v4868_v24 = vadd.f32 %v2843_v19, %v4806_v43  ;;  %2844 = vst [vmem:[#allocation1] ss:$9 sm:$0xff] %v2816_v0 }
 0x7b8   : > { %v2860_v1 = vsel %vm1083_vm6, %v4868_v24, 0.0  ;;  %v2872_v10 = vmul.f32 %v4868_v24, %v4868_v24 }
 0x7b9   : > { %2861 = vadd.xlane.f32.xlu2 %v2860_v1 }
 0x7ba   : > { %v2880_v11 = vsel %vm1083_vm6, %v2872_v10, 0.0 }
 0x7bd   : > { %v2845_v3 = vld [vmem:[#allocation1] sm:$0xff] }
 0x7be   : > { %v4875_v4 = vadd.f32 %v2845_v3, %v4827_v18 }
 0x7c0   : > { %v2863_v62 = vsel %vm2205_vm14, %v4875_v4, 0.0  ;;  %v2873_v43 = vmul.f32 %v4875_v4, %v4875_v4 }
 0x7c1   : > { %2878 = vadd.xlane.f32.xlu2 %v2877_v45  ;;  %2864 = vadd.xlane.f32.xlu0 %v2863_v62 }
 0x7c2   : > { %v2883_v9 = vsel %vm2205_vm14, %v2873_v43, 0.0 }
 0x7c3   : > { %2884 = vadd.xlane.f32.xlu1 %v2883_v9 }
 0x7c9   : > { %2881 = vadd.xlane.f32.xlu0 %v2880_v11 }
 0x815   : > { %v2856_v18 = vpop.xlane.xlu0 %2855 }
 0x816   : > { %v2866_v5 = vmul.f32 %v2856_v18, %v4759_v60 }
 0x817   : > { %v2876_v59 = vpop.xlane.xlu1 %2875 }
 0x818   : > { %v2890_v12 = vmul.f32 %v2866_v5, %v2866_v5  ;;  %v2886_v42 = vmul.f32 %v2876_v59, %v4759_v60  ;;  %v2898_v7 = vsub.f32 %v4855_v53, %v2866_v5 }
 0x81a   : > { %v2894_v14 = vsub.f32 %v2886_v42, %v2890_v12 }
 0x81c   : > { %v2902_v15 = vadd.f32 1e-05, %v2894_v14 }
 0x81e   : > { %3654 = vrsqrt.f32 %v2902_v15  ;;  %vm2912_vm5 = vweird.f32 %v2902_v15 }
 0x81f   : > { %v2859_v27 = vpop.xlane.xlu1 %2858 }
 0x820   : > { %v2867_v2 = vmul.f32 %v2859_v27, %v4759_v60 }
 0x822   : > { %v2891_v38 = vmul.f32 %v2867_v2, %v2867_v2 }
 0x824   : > { %v3655_v40 = vpop.eup %3654 }
 0x825   : > { %v2907_v46 = vmul.f32 %v3655_v40, %v2902_v15  ;;  %vm2913_vm2 = vweird.f32 %v3655_v40 }
 0x826   : > { %vm2914_vm7 = vmor %vm2912_vm5, %vm2913_vm2 }
 0x827   : > { %v2908_v20 = vmul.f32 %v3655_v40, %v2907_v46 }
 0x829   : > { %v2909_v29 = vmul.f32 0.5, %v2908_v20 }
 0x82b   : > { %v2910_v52 = vsub.f32 1.5, %v2909_v29 }
 0x82c   : > { %v2862_v21 = vpop.xlane.xlu2 %2861 }
 0x82d   : > { %v2911_v8 = vmul.f32 %v3655_v40, %v2910_v52  ;;  %v2868_v36 = vmul.f32 %v2862_v21, %v4759_v60 }
 0x82f   : > { %v2915_v30 = vsel %vm2914_vm7, %v3655_v40, %v2911_v8  ;;  %v2892_v48 = vmul.f32 %v2868_v36, %v2868_v36  ;;  %v2900_v15 = vsub.f32 %v4868_v24, %v2868_v36 }
 0x830   : > { %v2946_v33 = vmul.f32 %v2915_v30, %v2898_v7 }
 0x832   : > { %v2954_v34 = vmul.f32 %v4894_v23, %v2946_v33 }
 0x834   : > { %v4903_v28 = vadd.f32 %v4898_v17, %v2954_v34  ;;  %v2879_v35 = vpop.xlane.xlu2 %2878  ;;  %v2865_v37 = vpop.xlane.xlu0 %2864 }
 0x835   : > { %v2887_v49 = vmul.f32 %v2879_v35, %v4759_v60  ;;  %v2869_v44 = vmul.f32 %v2865_v37, %v4759_v60 }
 0x836   : > { %2966 = vst.msk [vmem:[#allocation2] sm:$0xff] %vm1083_vm6, %v4903_v28  ;;  %v2885_v26 = vpop.xlane.xlu1 %2884 }
 0x837   : > { %v2895_v47 = vsub.f32 %v2887_v49, %v2891_v38  ;;  %v2893_v13 = vmul.f32 %v2869_v44, %v2869_v44  ;;  %v2889_v61 = vmul.f32 %v2885_v26, %v4759_v60  ;;  %v2901_v10 = vsub.f32 %v4875_v4, %v2869_v44 }
 0x839   : > { %v2903_v16 = vadd.f32 1e-05, %v2895_v47  ;;  %v2897_v53 = vsub.f32 %v2889_v61, %v2893_v13 }
 0x83b   : > { %3656 = vrsqrt.f32 %v2903_v16  ;;  %v2905_v39 = vadd.f32 1e-05, %v2897_v53  ;;  %vm2922_vm9 = vweird.f32 %v2903_v16 }
 0x83c   : > { %v2882_v55 = vpop.xlane.xlu0 %2881 }
 0x83d   : > { %3658 = vrsqrt.f32 %v2905_v39  ;;  %v2888_v31 = vmul.f32 %v2882_v55, %v4759_v60  ;;  %v2899_v60 = vsub.f32 %v4863_v56, %v2867_v2  ;;  %vm2942_vm12 = vweird.f32 %v2905_v39 }
 0x83f   : > { %v2896_v50 = vsub.f32 %v2888_v31, %v2892_v48 }
 0x841   : > { %v3657_v25 = vpop.eup %3656  ;;  %v2904_v54 = vadd.f32 1e-05, %v2896_v50 }
 0x842   : > { %v2917_v41 = vmul.f32 %v3657_v25, %v2903_v16  ;;  %vm2923_vm8 = vweird.f32 %v3657_v25 }
 0x843   : > { %v3659_v6 = vpop.eup %3658  ;;  %3660 = vrsqrt.f32 %v2904_v54  ;;  %vm2924_vm11 = vmor %vm2922_vm9, %vm2923_vm8  ;;  %vm2932_vm0 = vweird.f32 %v2904_v54 }
 0x844   : > { %v2918_v57 = vmul.f32 %v3657_v25, %v2917_v41  ;;  %v2937_v58 = vmul.f32 %v3659_v6, %v2905_v39  ;;  %vm2943_vm10 = vweird.f32 %v3659_v6 }
 0x845   : > { %vm2944_vm13 = vmor %vm2942_vm12, %vm2943_vm10 }
 0x846   : > { %v2919_v32 = vmul.f32 0.5, %v2918_v57  ;;  %v2938_v63 = vmul.f32 %v3659_v6, %v2937_v58 }
 0x848   : > { %v2920_v22 = vsub.f32 1.5, %v2919_v32  ;;  %v2939_v0 = vmul.f32 0.5, %v2938_v63 }
 0x849   : > { %v3661_v19 = vpop.eup %3660 }
 0x84a   : > { %v2921_v1 = vmul.f32 %v3657_v25, %v2920_v22  ;;  %v2940_v51 = vsub.f32 1.5, %v2939_v0  ;;  %v2927_v3 = vmul.f32 %v3661_v19, %v2904_v54  ;;  %vm2933_vm15 = vweird.f32 %v3661_v19 }
 0x84b   : > { %vm2934_vm1 = vmor %vm2932_vm0, %vm2933_vm15 }
 0x84c   : > { %v2925_v45 = vsel %vm2924_vm11, %v3657_v25, %v2921_v1  ;;  %v2941_v62 = vmul.f32 %v3659_v6, %v2940_v51  ;;  %v2928_v43 = vmul.f32 %v3661_v19, %v2927_v3 }
 0x84d   : > { %v2947_v9 = vmul.f32 %v2925_v45, %v2899_v60 }
 0x84e   : > { %v2945_v11 = vsel %vm2944_vm13, %v3659_v6, %v2941_v62  ;;  %v2929_v18 = vmul.f32 0.5, %v2928_v43 }
 0x84f   : > { %v2955_v5 = vmul.f32 %v4894_v23, %v2947_v9  ;;  %v2949_v59 = vmul.f32 %v2945_v11, %v2901_v10 }
 0x850   : > { %v2930_v12 = vsub.f32 1.5, %v2929_v18 }
 0x851   : > { %v2963_v42 = vadd.f32 %v4898_v17, %v2955_v5  ;;  %v2957_v56 = vmul.f32 %v4894_v23, %v2949_v59 }
 0x852   : > { %v2931_v14 = vmul.f32 %v3661_v19, %v2930_v12 }
 0x853   : > { %2967 = vst.msk [vmem:[#allocation2 + $0x8] sm:$0x1] %vm2205_vm14, %v2963_v42  ;;  %v2965_v4 = vadd.f32 %v4898_v17, %v2957_v56 }
 0x854   : > { %v2935_v40 = vsel %vm2934_vm1, %v3661_v19, %v2931_v14 }
 0x855   : > { %2969 = vst.msk [vmem:[#allocation2 + $0x18] sm:$0x1] %vm2205_vm14, %v2965_v4  ;;  %v2948_v46 = vmul.f32 %v2935_v40, %v2900_v15 }
 0x857   : > { %v2956_v20 = vmul.f32 %v4894_v23, %v2948_v46  ;;  %2973 = sbr.rel (%p3401_p3) target bundleno = 2285 (0x8ed), region = 124 }
 0x859   : > { %v2964_v29 = vadd.f32 %v4898_v17, %v2956_v20 }
 0x85b   : > { %2968 = vst.msk [vmem:[#allocation2 + $0x10] sm:$0xff] %vm1083_vm6, %v2964_v29 }
 0x85c   : > { %v3432_v52 = vld [vmem:[#allocation15 + $0x8] sm:$0xff]  ;;  %v2974_v24 = vpack.c.bf16 %v4903_v28, %v4903_v28  ;;  %v2975_v21 = vpack.c.bf16 %v2964_v29, %v2964_v29  ;;  %v3431_v7 = vld [vmem:[#allocation15] sm:$0xff] }
 0x85d   : > { %v2980_v8 = vld [vmem:[%s5020_s20] sm:$0x1]  ;;  %3019 = vmatpush.bf16.msra.mxu0 %v3432_v52 }
 0x85e   : > { %3005 = vst [vmem:[#allocation1] ss:$9 sm:$0xff] %v2980_v8  ;;  %v2983_v23 = vunpack.c.l.b16 %v2974_v24  ;;  %v2984_v27 = vunpack.c.l.b16 %v2975_v21 }
 0x85f   : > { %3007 = vst [vmem:[#allocation1 + $0x1] ss:$9 sm:$0xff] %v2980_v8 }
 0x860   : > { %v3402_v30 = vunpack.i.l.s16 %v2983_v23  ;;  %v3403_v17 = vunpack.i.l.s16 %v2984_v27 }
 0x861   : > { %3020 = vmatpush.bf16.msra.mxu0 %v3431_v7 }
 0x862   : > { %v2989_v33 = vrot.slane %v3403_v17, 7 }
 0x864   : > { %v2990_v2 = vsel %vm946_vm3, %v2989_v33, %v3402_v30 }
 0x865   : > { %v2991_v34 = vpack.c.b16 %v2990_v2, %v2990_v2 }
 0x866   : > { %v3008_v28 = vld [vmem:[#allocation1] sm:$0xff] }
 0x867   : > { %3412 = vmatmul.msk.bf16.vlgmr.msra.gmra.mxu0 %vm1083_vm6, %v2991_v34 }
 0x8e4   : > { %v3022_v35 = vpop.f32.mrf.mxu0 }
 0x8e5   : > { %v3023_v37 = vadd.f32 %v3022_v35, %v3008_v28 }
 0x8e7   : > { %v3027_v38 = vrot.slane %v3023_v37, 1  ;;  %3029 = vst [vmem:[#allocation17] sm:$0x1] %v3023_v37 }
 0x8e9   : > { %3030 = vst [vmem:[#allocation17 + $0x1] sm:$0x1] %v3027_v38 }
 0x8ec   : > { %v3024_v49 = vpop.f32.mrf.mxu0 }
 0x8ed PF: > { %p3484_p4 = scmp.eq.s32.totalorder %s4196_s5, 1  ;;  %s5021_s19 = sld [smem:[#allocation38_spill]] }
 0x8ee   : > { %s4025_s18 = smov [#allocation17]   ;;  %s4026_s21 = smov 1  }
 0x8ef   : > { %s3038_s12 = sshll.u32 %s4025_s18, 4  ;;  %s3039_s12 = int_to_ptr.vmem [resolvable:$true] %s3038_s12 }
 0x8f3   : > { %s3040_s15 = sshll.u32 %s5021_s19, 4  ;;  %s3041_s15 = int_to_ptr.hbm [resolvable:$true] %s3040_s15 }
 0x8f4   : > { %3452 = dma.vmem_to_hbm [thread:$0]  (%p3484_p4), %s3039_s12, 32, %s3041_s15, [#allocation5], %s4022_s16, %s4022_s16, %s4026_s21  }
 0x8f5   : > { %3979 = dma.done.wait (%p3484_p4), [#allocation5], 32  }
 0x8f6   : > { %3981 = vsyncadd (%p3484_p4), [#allocation5], 4294967264 }
 0x8f7 PF: > { %s5022_s11 = sld [smem:[#allocation25_spill]]  ;;  %s5026_s21 = smov %s3988_s22 }
 0x8f8   : > { %s5023_s5 = sld [smem:[#allocation24_spill]]  ;;  %s5028_s24 = smov %s4000_s25 }
 0x8f9   : > { %s5024_s23 = sld [smem:[#allocation27_spill]] }
 0x8fa   : > { %s5025_s28 = sld [smem:[#allocation26_spill]] }
 0x8fd   : > { %s40_s26 = sadd.s32 1, %s5022_s11  }
 0x8fe   : > { %p37_p5 = scmp.ge.s32.totalorder %s40_s26, 4   ;;  %s5027_s22 = smov %s5023_s5 }
 0x900   : > { %s5029_s25 = smov %s5025_s28  ;;  %39 = sbr.rel (!%p37_p5) target bundleno = 24 (0x18), region = 326 }
 0x905   :  { %3057 = vsyncpa [#allocation4], 1 }
 0x906   :  { %3059 = vsyncpa [#allocation4 + $0x1], 1 }
 0x907   :  { %3060 = vsyncpa [#allocation7], 1 }
 0x908   :  { %3062 = vsyncpa [#allocation7 + $0x1], 1 }
 0x909   :  { %3063 = vsyncpa [#allocation10], 1 }
 0x90a   :  { %3065 = vsyncpa [#allocation10 + $0x1], 1 }
 0x90b   :  { %3066 = vsyncpa [#allocation13], 1 }
 0x90c   :  { %3068 = vsyncpa [#allocation13 + $0x1], 1 }
 0x90d   :  { %3069 = vsyncpa [#allocation16], 1 }
 0x90e   :  { %3070 = vsyncpa [#allocation5], 1 }
 0x90f   :  { %3072 = vsyncpa [#allocation5 + $0x1], 1 }

</bundles_post_ra>
